<compile_context>
chip_gen: v5e
topology: v5e:2x2
jax: 0.10.0
libtpu: 0.0.40
codegen_flags: <defaults>
</compile_context>

<pallas_src>
import functools

import numpy as np
import jax
import jax.numpy as jnp
from jax import lax
from jax.experimental import pallas as pl
from jax.experimental.pallas import tpu as pltpu

# ----------------------------------------------------------------------------
# Small (but structurally faithful) hyper-parameters.
# ----------------------------------------------------------------------------
INPUT_SIZE = 1
INPUT_LEN = 46
LAYER_DIMS_A = (8, 16, 16, 16)
KERNELS_A = (1, 7, 3, 3)
OUTPUT_DIM_B = 16
LAYER_DIMS_C = (8, 8)
KERNELS_C = (3, 1)
LATENT = 16
AVG_WINDOW = 2
BN_EPS = 1e-5

BATCH = 2
T_IN = 4
T_OUT = 3

LPAD = 64                           # fixed per-sample lane segment length
CONV_DTYPE = jnp.bfloat16           # MXU operand dtype for conv frames (f32 accumulate)
BN_SCALE = float(1.0 / np.sqrt(1.0 + BN_EPS))


def conv_out_len(L, pad, k, stride=1):
    return (L + 2 * pad - (k - 1) - 1) // stride + 1


def _rup8(x):
    return ((x + 7) // 8) * 8


# ----------------------------------------------------------------------------
# Derived lengths (mirrors the PyTorch __init__ bookkeeping)
# ----------------------------------------------------------------------------
_L = INPUT_LEN
ENC_A_LOUT = []
for _k in KERNELS_A:
    _L = conv_out_len(_L, 0, _k)
    ENC_A_LOUT.append(_L)
L_BLOCK_A = ENC_A_LOUT[-1]                       # 36
L_POOL_A = conv_out_len(L_BLOCK_A, 0, 3, 3)      # 12
L_POOL_B = conv_out_len(L_POOL_A, 0, 3, 3)       # 4
_L = L_POOL_B
ENC_C_LOUT = []
for _k in KERNELS_C:
    _L = conv_out_len(_L, 0, _k)
    ENC_C_LOUT.append(_L)
FLAT_LEN = ENC_C_LOUT[-1]                        # 2
FLAT_CH = LAYER_DIMS_C[-1]                       # 8

DEC_A_KERNELS = KERNELS_C[::-1]                                   # (1, 3)
DEC_A_DIMS = tuple(LAYER_DIMS_C[::-1][1:]) + (OUTPUT_DIM_B,)      # (8, 16)
_L = FLAT_LEN
DEC_A_LOUT = []
for _k in DEC_A_KERNELS:
    _L = _L + _k - 1
    DEC_A_LOUT.append(_L)                        # 2, 4
L_UP_A = DEC_A_LOUT[-1] * 3                      # 12
L_UP_B = L_UP_A * 3                              # 36
DEC_C_KERNELS = KERNELS_A[::-1]                                   # (3, 3, 7, 1)
DEC_C_DIMS = tuple(LAYER_DIMS_A[::-1][1:]) + (INPUT_SIZE,)        # (16, 16, 8, 1)
_L = L_UP_B
DEC_C_LOUT = []
for _k in DEC_C_KERNELS:
    _L = _L + _k - 1
    DEC_C_LOUT.append(_L)                        # 38, 40, 46, 46
assert DEC_C_LOUT[-1] == INPUT_LEN

# static layer configs (kernel_size, equiv-conv padding, output length)
ENC_A_CFG = tuple((KERNELS_A[i], 0, ENC_A_LOUT[i]) for i in range(len(KERNELS_A)))
DEC_C_CFG = tuple((DEC_C_KERNELS[i], DEC_C_KERNELS[i] - 1, DEC_C_LOUT[i])
                  for i in range(len(DEC_C_KERNELS)))


# ----------------------------------------------------------------------------
# In-kernel building blocks
# ----------------------------------------------------------------------------
def _lane_pos(nl):
    col = lax.broadcasted_iota(jnp.int32, (1, nl), 1)
    return jnp.bitwise_and(col, LPAD - 1)        # position within its 64-lane segment


def _conv_frame(h, w, b, k, pad, l_out, col):
    """Conv1d (+folded BN) + ReLU on a frame value h: (C_in_p, nl) f32.

    w: (k, C_out_p, C_in_p) CONV_DTYPE, b: (C_out_p, 1) f32.  Taps are built
    with lane rolls; wrapped-in values land either on zero padding or on
    columns >= l_out, which are masked to zero afterwards (frame invariant:
    columns beyond the content length of each 64-lane segment are zero).
    """
    nl = h.shape[-1]
    acc = None
    for j in range(k):
        shift = (pad - j) % nl
        xs = pltpu.roll(h, shift, 1) if shift else h
        t = jnp.dot(w[j], xs.astype(w.dtype), preferred_element_type=jnp.float32)
        acc = t if acc is None else acc + t
    acc = acc + b
    acc = jnp.maximum(acc, 0.0)
    return jnp.where(col < l_out, acc, 0.0)


def _chain_kernel(*refs, layers):
    """Fused chain of conv / transpose-conv layers on one frame block."""
    x_ref = refs[0]
    o_ref = refs[-1]
    wb = refs[1:-1]
    col = _lane_pos(x_ref.shape[-1])
    h = x_ref[...]
    for i, (k, pad, l_out) in enumerate(layers):
        h = _conv_frame(h, wb[2 * i][...], wb[2 * i + 1][...], k, pad, l_out, col)
    o_ref[...] = h


def _block_b_kernel(x_ref, wm, bm, w1, b1, w2a, b2a, w2b, b2b, w3, b3, o_ref,
                    *, l_cur, bo):
    """CoderBlockB: 4 branches fused in one kernel (concat == row-disjoint sum)."""
    nl = x_ref.shape[-1]
    col = _lane_pos(nl)
    x = x_ref[...]
    # merged 1x1 convs of branches 0/1/2 -> output rows [0:bo], [bo:2bo], [2bo:3bo]
    m = _conv_frame(x, wm[...], bm[...], 1, 0, l_cur, col)
    # branch 1: 7-tap conv reading rows [bo:2bo] of m, written at rows [bo:2bo]
    o1 = _conv_frame(m, w1[...], b1[...], 7, 3, l_cur, col)
    # branch 2: two 3-tap convs, final output placed at rows [2bo:3bo]
    t2 = _conv_frame(m, w2a[...], b2a[...], 3, 1, l_cur, col)
    o2 = _conv_frame(t2, w2b[...], b2b[...], 3, 1, l_cur, col)
    # branch 3: maxpool(k=3, stride=1, pad=1) then 1x1 conv at rows [3bo:4bo]
    # (zero padding == -inf padding here because x is post-ReLU, i.e. >= 0)
    pooled = jnp.maximum(jnp.maximum(x, pltpu.roll(x, 1, 1)),
                         pltpu.roll(x, nl - 1, 1))
    pooled = jnp.where(col < l_cur, pooled, 0.0)
    o3 = _conv_frame(pooled, w3[...], b3[...], 1, 0, l_cur, col)
    row = lax.broadcasted_iota(jnp.int32, (m.shape[0], 1), 0)
    o_ref[...] = jnp.where(row < bo, m, 0.0) + o1 + o2 + o3


def _latent_kernel(feat_ref, tin_ref, tout_ref,
                   t1_ref, bv1_ref, t2_ref, bv2_ref, wenc_ref, benc_ref,
                   w1_ref, b1_ref, w2_ref, b2_ref,
                   wih_ref, whh_ref, bg_ref,
                   wdec_ref, bdec_ref, m1_ref, bm1_ref, m2_ref, bm2_ref,
                   o_ref, *, batch, t_in_steps, t_out_steps, hidden):
    """Encoder block_c + flatten + linear + time embedding + LSTM + decoder head."""

    def mm(x, w, b, relu=True):
        y = jnp.dot(x, w, preferred_element_type=jnp.float32) + b
        return jnp.maximum(y, 0.0) if relu else y

    def temb(tcol):
        h = jnp.maximum(tcol * w1_ref[...] + b1_ref[...], 0.0)
        return jnp.dot(h, w2_ref[...], preferred_element_type=jnp.float32) + b2_ref[...]

    # encoder tail (block_c convs folded to matmuls) + flatten + last linear
    h = mm(feat_ref[...], t1_ref[...], bv1_ref[...])
    h = mm(h, t2_ref[...], bv2_ref[...])
    z = mm(h, wenc_ref[...], benc_ref[...])
    z = z + temb(tin_ref[...])                       # (T_in*B, H), t-major rows

    # single-layer LSTM (PyTorch gate order i,f,g,o), statically unrolled,
    # per-gate weight slabs -> no lane slicing of the gate vector.
    wih = wih_ref[...]
    whh = whh_ref[...]
    bg = bg_ref[...]
    xg = [jnp.dot(z, wih[q], preferred_element_type=jnp.float32) + bg[q]
          for q in range(4)]
    hs = jnp.zeros((batch, hidden), jnp.float32)
    cs = jnp.zeros((batch, hidden), jnp.float32)
    for t in range(t_in_steps):
        r0 = t * batch
        pre = [xg[q][r0:r0 + batch]
               + jnp.dot(hs, whh[q], preferred_element_type=jnp.float32)
               for q in range(4)]
        gi = jax.nn.sigmoid(pre[0])
        gf = jax.nn.sigmoid(pre[1])
        gg = jnp.tanh(pre[2])
        go = jax.nn.sigmoid(pre[3])
        cs = gf * cs + gi * gg
        hs = go * jnp.tanh(cs)

    # broadcast final hidden state over output timesteps (bt-major rows)
    rows = batch * t_out_steps
    ridx = lax.broadcasted_iota(jnp.int32, (rows, 1), 0)
    hexp = jnp.zeros((rows, hidden), jnp.float32)
    for b in range(batch):
        sel = jnp.logical_and(ridx >= b * t_out_steps, ridx < (b + 1) * t_out_steps)
        hexp = hexp + jnp.where(sel, jnp.broadcast_to(hs[b:b + 1], (rows, hidden)), 0.0)
    zo = hexp + temb(tout_ref[...])

    # decoder head: linear + unflatten + block_a transpose-convs (folded)
    d = mm(zo, wdec_ref[...], bdec_ref[...])
    d = mm(d, m1_ref[...], bm1_ref[...])
    d = mm(d, m2_ref[...], bm2_ref[...])
    o_ref[...] = d


# ----------------------------------------------------------------------------
# pallas_call wrappers
# ----------------------------------------------------------------------------
def _const_spec(a):
    nd = a.ndim
    return pl.BlockSpec(a.shape, lambda i, _nd=nd: (0,) * _nd)


def _frame_call(body, wparams, frame, cout_p):
    cin_p, nl = frame.shape
    blk = 256 if nl % 256 == 0 else 128            # lane-dense 128-multiple blocks
    nsplit = nl // blk
    args = [frame]
    in_specs = [pl.BlockSpec((cin_p, blk), lambda i: (0, i))]
    for d in wparams:
        args.extend([d['w'], d['b']])
        in_specs.extend([_const_spec(d['w']), _const_spec(d['b'])])
    return pl.pallas_call(
        body,
        out_shape=jax.ShapeDtypeStruct((cout_p, nl), jnp.float32),
        grid=(nsplit,),
        in_specs=in_specs,
        out_specs=pl.BlockSpec((cout_p, blk), lambda i: (0, i)),
        compiler_params=pltpu.CompilerParams(dimension_semantics=("parallel",)),
    )(*args)


def conv_chain(wparams, layer_cfg, frame, cout_p):
    body = functools.partial(_chain_kernel, layers=tuple(layer_cfg))
    return _frame_call(body, wparams, frame, cout_p)


def block_b(wparams, frame, l_cur, bo):
    body = functools.partial(_block_b_kernel, l_cur=l_cur, bo=bo)
    order = [wparams['m'], wparams['b1c'], wparams['b2c1'],
             wparams['b2c2'], wparams['b3c']]
    return _frame_call(body, order, frame, 4 * bo)


def latent(pk, feat, t_in_tm, t_out_bt, batch, t_in_steps, t_out_steps):
    args = [feat, t_in_tm, t_out_bt,
            pk['t1'], pk['bv1'], pk['t2'], pk['bv2'], pk['wenc'], pk['benc'],
            pk['w1'], pk['b1'], pk['w2'], pk['b2'],
            pk['wih'], pk['whh'], pk['bg'],
            pk['wdec'], pk['bdec'], pk['m1'], pk['bm1'], pk['m2'], pk['bm2']]
    out_cols = pk['m2'].shape[1]
    return pl.pallas_call(
        functools.partial(_latent_kernel, batch=batch, t_in_steps=t_in_steps,
                          t_out_steps=t_out_steps, hidden=LATENT),
        out_shape=jax.ShapeDtypeStruct((batch * t_out_steps, out_cols), jnp.float32),
        grid=(1,),
        in_specs=[_const_spec(a) for a in args],
        out_specs=pl.BlockSpec((batch * t_out_steps, out_cols), lambda i: (0, 0)),
        compiler_params=pltpu.CompilerParams(dimension_semantics=("arbitrary",)),
    )(*args)


# ----------------------------------------------------------------------------
# XLA glue (cheap, KB-sized): frame (un)packing, pool, upsample
# ----------------------------------------------------------------------------
def pack_frame(x_ncl, c_pad):
    n, c, l = x_ncl.shape
    x = jnp.transpose(x_ncl, (1, 0, 2))
    x = jnp.pad(x, ((0, c_pad - c), (0, 0), (0, LPAD - l)))
    return x.reshape(c_pad, n * LPAD)


def unpack_frame(frame, n, c, l):
    return jnp.transpose(frame.reshape(frame.shape[0], n, LPAD)[:c, :, :l], (1, 0, 2))


def maxpool3(x):
    n, c, l = x.shape
    return jnp.max(x.reshape(n, c, l // 3, 3), axis=-1)


def upsample3(x):
    return jnp.repeat(x, 3, axis=-1)


# ----------------------------------------------------------------------------
# Deterministic raw parameters (synthetic init, PyTorch layouts)
# ----------------------------------------------------------------------------
class ParamGen:
    def __init__(self, seed):
        self._key = jax.random.PRNGKey(seed)
        self._count = 0

    def next(self, shape, scale=0.1):
        self._count += 1
        k = jax.random.fold_in(self._key, self._count)
        return scale * jax.random.normal(k, shape, dtype=jnp.float32)


def _conv_p(g, c_in, c_out, k):
    return {'w': g.next((c_out, c_in, k)), 'b': g.next((c_out,))}


def _tconv_p(g, c_in, c_out, k):
    return {'w': g.next((c_in, c_out, k)), 'b': g.next((c_out,))}


def _linear_p(g, d_in, d_out):
    return {'w': g.next((d_out, d_in)), 'b': g.next((d_out,))}


def _block_b_p(g, c_in, c_out):
    bo = c_out // 4
    return {'b0': [_conv_p(g, c_in, bo, 1)],
            'b1': [_conv_p(g, c_in, bo, 1), _conv_p(g, bo, bo, 7)],
            'b2': [_conv_p(g, c_in, bo, 1), _conv_p(g, bo, bo, 3),
                   _conv_p(g, bo, bo, 3)],
            'b3': [_conv_p(g, c_in, bo, 1)]}


def build_params(seed=1234):
    g = ParamGen(seed)
    p = {}
    dims_a = (INPUT_SIZE,) + LAYER_DIMS_A
    p['enc_a'] = [_conv_p(g, dims_a[i], dims_a[i + 1], KERNELS_A[i])
                  for i in range(len(KERNELS_A))]
    p['enc_b'] = _block_b_p(g, LAYER_DIMS_A[-1], OUTPUT_DIM_B)
    dims_c = (OUTPUT_DIM_B,) + LAYER_DIMS_C
    p['enc_c'] = [_conv_p(g, dims_c[i], dims_c[i + 1], KERNELS_C[i])
                  for i in range(len(KERNELS_C))]
    p['enc_linear'] = _linear_p(g, FLAT_CH * FLAT_LEN, LATENT)
    p['temb'] = [_linear_p(g, 1, LATENT), _linear_p(g, LATENT, LATENT)]
    p['lstm'] = {'w_ih': g.next((4 * LATENT, LATENT)),
                 'w_hh': g.next((4 * LATENT, LATENT)),
                 'b_ih': g.next((4 * LATENT,)),
                 'b_hh': g.next((4 * LATENT,))}
    p['dec_linear'] = _linear_p(g, LATENT, FLAT_CH * FLAT_LEN)
    dec_a_dims = (FLAT_CH,) + DEC_A_DIMS
    p['dec_a'] = [_tconv_p(g, dec_a_dims[i], dec_a_dims[i + 1], DEC_A_KERNELS[i])
                  for i in range(len(DEC_A_KERNELS))]
    p['dec_b'] = _block_b_p(g, OUTPUT_DIM_B, LAYER_DIMS_A[-1])
    dec_c_dims = (LAYER_DIMS_A[-1],) + DEC_C_DIMS
    p['dec_c'] = [_tconv_p(g, dec_c_dims[i], dec_c_dims[i + 1], DEC_C_KERNELS[i])
                  for i in range(len(DEC_C_KERNELS))]
    return p


# ----------------------------------------------------------------------------
# One-time weight packing (done OUTSIDE the jitted forward)
# ----------------------------------------------------------------------------
def _np(x):
    return np.asarray(jax.device_get(x), np.float32)


def _equiv_conv_w(w, transpose):
    w = _np(w)
    if transpose:
        # ConvTranspose1d(stride=1, pad=0) == Conv1d with transposed, k-flipped
        # kernel and equivalent padding k-1.
        w = np.ascontiguousarray(np.transpose(w, (1, 0, 2))[:, :, ::-1])
    return w


def _pack_frame_conv(w, b, cin_p, cout_p, in_off=0, out_off=0, transpose=False):
    w = _equiv_conv_w(w, transpose) * BN_SCALE
    b = _np(b) * BN_SCALE
    c_out, c_in, k = w.shape
    wk = np.zeros((k, cout_p, cin_p), np.float32)
    wk[:, out_off:out_off + c_out, in_off:in_off + c_in] = np.transpose(w, (2, 0, 1))
    bb = np.zeros((cout_p, 1), np.float32)
    bb[out_off:out_off + c_out, 0] = b
    return {'w': jnp.asarray(wk, CONV_DTYPE), 'b': jnp.asarray(bb, jnp.float32)}


def _pack_chain(raw_layers, chan_specs, transpose):
    return [_pack_frame_conv(layer['w'], layer['b'],
                             cin_p=_rup8(ci), cout_p=_rup8(co), transpose=transpose)
            for layer, (ci, co) in zip(raw_layers, chan_specs)]


def _pack_block_b(raw, c_in, c_out):
    bo = c_out // 4
    cin_p = _rup8(c_in)
    cout_p = _rup8(c_out)
    bo_p = _rup8(bo)
    # merged 1x1 convs of branches 0, 1, 2
    k_w = np.zeros((1, cout_p, cin_p), np.float32)
    k_b = np.zeros((cout_p, 1), np.float32)
    for idx, layer in enumerate([raw['b0'][0], raw['b1'][0], raw['b2'][0]]):
        w = _np(layer['w']) * BN_SCALE
        k_w[0, idx * bo:(idx + 1) * bo, :c_in] = w[:, :, 0]
        k_b[idx * bo:(idx + 1) * bo, 0] = _np(layer['b']) * BN_SCALE
    merged = {'w': jnp.asarray(k_w, CONV_DTYPE), 'b': jnp.asarray(k_b, jnp.float32)}
    return {
        'm': merged,
        'b1c': _pack_frame_conv(raw['b1'][1]['w'], raw['b1'][1]['b'],
                                cin_p=cout_p, cout_p=cout_p, in_off=bo, out_off=bo),
        'b2c1': _pack_frame_conv(raw['b2'][1]['w'], raw['b2'][1]['b'],
                                 cin_p=cout_p, cout_p=bo_p, in_off=2 * bo, out_off=0),
        'b2c2': _pack_frame_conv(raw['b2'][2]['w'], raw['b2'][2]['b'],
                                 cin_p=bo_p, cout_p=cout_p, in_off=0, out_off=2 * bo),
        'b3c': _pack_frame_conv(raw['b3'][0]['w'], raw['b3'][0]['b'],
                                cin_p=cin_p, cout_p=cout_p, in_off=0, out_off=3 * bo),
    }


def _fold_conv_matrix(w, b, l_in, l_out, eq_pad, transpose, scale=BN_SCALE):
    """Fold a (transpose-)conv on tiny (C, L) tensors into one (Cin*Lin, Cout*Lout) matmul."""
    w = _equiv_conv_w(w, transpose) * scale
    b = _np(b) * scale
    c_out, c_in, k = w.shape
    mat = np.zeros((c_in * l_in, c_out * l_out), np.float32)
    for co in range(c_out):
        for ci in range(c_in):
            for j in range(k):
                for lo in range(l_out):
                    li = lo + j - eq_pad
                    if 0 <= li < l_in:
                        mat[ci * l_in + li, co * l_out + lo] += w[co, ci, j]
    bias = np.zeros((1, c_out * l_out), np.float32)
    for co in range(c_out):
        bias[0, co * l_out:(co + 1) * l_out] = b[co]
    return jnp.asarray(mat), jnp.asarray(bias)


def _pack_latent(raw):
    h = LATENT
    pk = {}
    pk['t1'], pk['bv1'] = _fold_conv_matrix(raw['enc_c'][0]['w'], raw['enc_c'][0]['b'],
                                            l_in=L_POOL_B, l_out=ENC_C_LOUT[0],
                                            eq_pad=0, transpose=False)
    pk['t2'], pk['bv2'] = _fold_conv_matrix(raw['enc_c'][1]['w'], raw['enc_c'][1]['b'],
                                            l_in=ENC_C_LOUT[0], l_out=ENC_C_LOUT[1],
                                            eq_pad=0, transpose=False)
    pk['wenc'] = jnp.asarray(_np(raw['enc_linear']['w']).T)
    pk['benc'] = jnp.asarray(_np(raw['enc_linear']['b'])[None, :])
    pk['w1'] = jnp.asarray(_np(raw['temb'][0]['w']).T)
    pk['b1'] = jnp.asarray(_np(raw['temb'][0]['b'])[None, :])
    pk['w2'] = jnp.asarray(_np(raw['temb'][1]['w']).T)
    pk['b2'] = jnp.asarray(_np(raw['temb'][1]['b'])[None, :])
    wih = _np(raw['lstm']['w_ih'])
    whh = _np(raw['lstm']['w_hh'])
    bsum = _np(raw['lstm']['b_ih']) + _np(raw['lstm']['b_hh'])
    pk['wih'] = jnp.asarray(np.stack([wih[q * h:(q + 1) * h].T for q in range(4)]))
    pk['whh'] = jnp.asarray(np.stack([whh[q * h:(q + 1) * h].T for q in range(4)]))
    pk['bg'] = jnp.asarray(np.stack([bsum[q * h:(q + 1) * h][None, :] for q in range(4)]))
    pk['wdec'] = jnp.asarray(_np(raw['dec_linear']['w']).T)
    pk['bdec'] = jnp.asarray(_np(raw['dec_linear']['b'])[None, :])
    pk['m1'], pk['bm1'] = _fold_conv_matrix(raw['dec_a'][0]['w'], raw['dec_a'][0]['b'],
                                            l_in=FLAT_LEN, l_out=DEC_A_LOUT[0],
                                            eq_pad=DEC_A_KERNELS[0] - 1, transpose=True)
    pk['m2'], pk['bm2'] = _fold_conv_matrix(raw['dec_a'][1]['w'], raw['dec_a'][1]['b'],
                                            l_in=DEC_A_LOUT[0], l_out=DEC_A_LOUT[1],
                                            eq_pad=DEC_A_KERNELS[1] - 1, transpose=True)
    return pk


def pack_params(raw):
    dims_a = (INPUT_SIZE,) + LAYER_DIMS_A
    enc_a_chan = [(dims_a[i], dims_a[i + 1]) for i in range(len(KERNELS_A))]
    dec_c_dims = (LAYER_DIMS_A[-1],) + DEC_C_DIMS
    dec_c_chan = [(dec_c_dims[i], dec_c_dims[i + 1]) for i in range(len(DEC_C_KERNELS))]
    return {
        'enc_a': _pack_chain(raw['enc_a'], enc_a_chan, transpose=False),
        'enc_b': _pack_block_b(raw['enc_b'], LAYER_DIMS_A[-1], OUTPUT_DIM_B),
        'dec_b': _pack_block_b(raw['dec_b'], OUTPUT_DIM_B, LAYER_DIMS_A[-1]),
        'dec_c': _pack_chain(raw['dec_c'], dec_c_chan, transpose=True),
        'latent': _pack_latent(raw),
    }


# ----------------------------------------------------------------------------
# Full forward pass
# ----------------------------------------------------------------------------
def forward(packed, x, t_in, t_out):
    B, Tin, C, L = x.shape
    Tout = t_out.shape[1]
    n = AVG_WINDOW

    # weighted average of the last n input timepoints (tiny -> plain JAX)
    wts = 1.0 - jnp.abs(t_out[:, None, :] - t_in[:, -n:, None]) / t_out[:, None, :]
    last_x = jnp.sum(x[:, -n:, None, :, :] * wts[..., None, None], axis=1)

    # ---------------- encoder (TimeDistributed; t-major sample order) ----------------
    xt = jnp.transpose(x, (1, 0, 2, 3)).reshape(Tin * B, C, L)
    f = pack_frame(xt, _rup8(C))
    f = conv_chain(packed['enc_a'], ENC_A_CFG, f, _rup8(LAYER_DIMS_A[-1]))
    h = maxpool3(unpack_frame(f, Tin * B, LAYER_DIMS_A[-1], L_BLOCK_A))
    f = pack_frame(h, _rup8(LAYER_DIMS_A[-1]))
    f = block_b(packed['enc_b'], f, L_POOL_A, OUTPUT_DIM_B // 4)
    h = maxpool3(unpack_frame(f, Tin * B, OUTPUT_DIM_B, L_POOL_A))
    feat = h.reshape(Tin * B, OUTPUT_DIM_B * L_POOL_B)          # (T_in*B, 64)

    # -------- latent: enc block_c + flatten + linear + temb + LSTM + dec head --------
    t_in_tm = jnp.transpose(t_in, (1, 0)).reshape(Tin * B, 1)   # t-major
    t_out_bt = t_out.reshape(B * Tout, 1)                       # bt-major
    d = latent(packed['latent'], feat, t_in_tm, t_out_bt, B, Tin, Tout)

    # ---------------- decoder (TimeDistributed; bt-major sample order) ---------------
    d = upsample3(d.reshape(B * Tout, DEC_A_DIMS[-1], DEC_A_LOUT[-1]))
    f = pack_frame(d, _rup8(DEC_A_DIMS[-1]))
    f = block_b(packed['dec_b'], f, L_UP_A, LAYER_DIMS_A[-1] // 4)
    h = upsample3(unpack_frame(f, B * Tout, LAYER_DIMS_A[-1], L_UP_A))
    f = pack_frame(h, _rup8(LAYER_DIMS_A[-1]))
    f = conv_chain(packed['dec_c'], DEC_C_CFG, f, _rup8(INPUT_SIZE))
    dec = unpack_frame(f, B * Tout, INPUT_SIZE, INPUT_LEN)
    dec = dec.reshape(B, Tout, INPUT_SIZE, INPUT_LEN)

    return last_x + dec


# ----------------------------------------------------------------------------
if __name__ == "__main__":
    raw = build_params(seed=1234)
    packed = pack_params(raw)

    key = jax.random.PRNGKey(0)
    x = jax.random.normal(key, (BATCH, T_IN, INPUT_SIZE, INPUT_LEN), dtype=jnp.float32)
    t_in = (jnp.tile(jnp.arange(1.0, T_IN + 1.0, dtype=jnp.float32), (BATCH, 1))
            + jnp.array([[0.0], [0.5]], dtype=jnp.float32))
    t_out = (jnp.tile(jnp.arange(T_IN + 1.0, T_IN + 1.0 + T_OUT, dtype=jnp.float32), (BATCH, 1))
             + jnp.array([[0.0], [0.5]], dtype=jnp.float32))

    out = jax.jit(forward)(packed, x, t_in, t_out)
    out = jax.block_until_ready(out)
    assert out.shape == (BATCH, T_OUT, INPUT_SIZE, INPUT_LEN)
    assert jnp.all(jnp.isfinite(out))
    print("KERNEL_OK")
</pallas_src>

<mosaic_0001>
module attributes {stable_mosaic.version = 11 : i64} {
  func.func @_chain_kernel(%arg0: i32, %arg1: memref<8x256xf32, #tpu.memory_space<vmem>>, %arg2: memref<1x8x8xbf16, #tpu.memory_space<vmem>>, %arg3: memref<8x1xf32, #tpu.memory_space<vmem>>, %arg4: memref<7x16x8xbf16, #tpu.memory_space<vmem>>, %arg5: memref<16x1xf32, #tpu.memory_space<vmem>>, %arg6: memref<3x16x16xbf16, #tpu.memory_space<vmem>>, %arg7: memref<16x1xf32, #tpu.memory_space<vmem>>, %arg8: memref<3x16x16xbf16, #tpu.memory_space<vmem>>, %arg9: memref<16x1xf32, #tpu.memory_space<vmem>>, %arg10: memref<16x256xf32, #tpu.memory_space<vmem>>) attributes {dimension_semantics = [#tpu.dimension_semantics<parallel>], iteration_bounds = array<i64: 2>, scalar_prefetch = 0 : i64, scratch_operands = 0 : i64, tpu.core_type = #tpu.core_type<tc>, window_params = [{transform_indices = @transform_0, window_bounds = array<i64: 8, 256>}, {pipeline_mode = #tpu.pipeline_mode<synchronous>, transform_indices = @transform_1, window_bounds = array<i64: 1, 8, 8>}, {pipeline_mode = #tpu.pipeline_mode<synchronous>, transform_indices = @transform_2, window_bounds = array<i64: 8, 1>}, {pipeline_mode = #tpu.pipeline_mode<synchronous>, transform_indices = @transform_3, window_bounds = array<i64: 7, 16, 8>}, {pipeline_mode = #tpu.pipeline_mode<synchronous>, transform_indices = @transform_4, window_bounds = array<i64: 16, 1>}, {pipeline_mode = #tpu.pipeline_mode<synchronous>, transform_indices = @transform_5, window_bounds = array<i64: 3, 16, 16>}, {pipeline_mode = #tpu.pipeline_mode<synchronous>, transform_indices = @transform_6, window_bounds = array<i64: 16, 1>}, {pipeline_mode = #tpu.pipeline_mode<synchronous>, transform_indices = @transform_7, window_bounds = array<i64: 3, 16, 16>}, {pipeline_mode = #tpu.pipeline_mode<synchronous>, transform_indices = @transform_8, window_bounds = array<i64: 16, 1>}, {transform_indices = @transform_9, window_bounds = array<i64: 16, 256>}]} {
    %0 = tpu.iota {dimensions = array<i32: 1>} : vector<1x256xi32>
    %c63_i32 = arith.constant 63 : i32
    %1 = vector.broadcast %c63_i32 : i32 to vector<1x256xi32>
    %2 = arith.andi %0, %1 : vector<1x256xi32>
    %c0 = arith.constant 0 : index
    %c0_0 = arith.constant 0 : index
    %3 = vector.load %arg1[%c0, %c0_0] : memref<8x256xf32, #tpu.memory_space<vmem>>, vector<8x256xf32>
    %c0_1 = arith.constant 0 : index
    %c0_2 = arith.constant 0 : index
    %c0_3 = arith.constant 0 : index
    %4 = vector.load %arg2[%c0_1, %c0_2, %c0_3] : memref<1x8x8xbf16, #tpu.memory_space<vmem>>, vector<1x8x8xbf16>
    %c0_4 = arith.constant 0 : index
    %c0_5 = arith.constant 0 : index
    %5 = vector.load %arg3[%c0_4, %c0_5] : memref<8x1xf32, #tpu.memory_space<vmem>>, vector<8x1xf32>
    %6 = vector.shape_cast %4 : vector<1x8x8xbf16> to vector<8x8xbf16>
    %7 = arith.truncf %3 : vector<8x256xf32> to vector<8x256xbf16>
    %cst = arith.constant dense<0.000000e+00> : vector<8x256xf32>
    %8 = tpu.matmul %6, %7, %cst {dimension_numbers = #tpu.dot_dimension_numbers<[1], [0], [0], [1], [0, 0, 1, 1], [], []>} : vector<8x8xbf16>, vector<8x256xbf16>, vector<8x256xf32> -> vector<8x256xf32>
    %9 = vector.broadcast %5 : vector<8x1xf32> to vector<8x256xf32>
    %10 = arith.addf %8, %9 : vector<8x256xf32>
    %cst_6 = arith.constant 0.000000e+00 : f32
    %11 = vector.broadcast %cst_6 : f32 to vector<8x256xf32>
    %12 = arith.maximumf %10, %11 : vector<8x256xf32>
    %c46_i32 = arith.constant 46 : i32
    %13 = vector.broadcast %c46_i32 : i32 to vector<1x256xi32>
    %14 = arith.cmpi slt, %2, %13 : vector<1x256xi32>
    %cst_7 = arith.constant 0.000000e+00 : f32
    %15 = vector.shape_cast %14 : vector<1x256xi1> to vector<1x256xi1>
    %16 = vector.broadcast %15 : vector<1x256xi1> to vector<8x256xi1>
    %17 = vector.broadcast %cst_7 : f32 to vector<8x256xf32>
    %18 = arith.select %16, %12, %17 : vector<8x256xi1>, vector<8x256xf32>
    %c0_8 = arith.constant 0 : index
    %c0_9 = arith.constant 0 : index
    %c0_10 = arith.constant 0 : index
    %19 = vector.load %arg4[%c0_8, %c0_9, %c0_10] : memref<7x16x8xbf16, #tpu.memory_space<vmem>>, vector<7x16x8xbf16>
    %c0_11 = arith.constant 0 : index
    %c0_12 = arith.constant 0 : index
    %20 = vector.load %arg5[%c0_11, %c0_12] : memref<16x1xf32, #tpu.memory_space<vmem>>, vector<16x1xf32>
    %21 = vector.extract_strided_slice %19 {offsets = [0, 0, 0], sizes = [1, 16, 8], strides = [1, 1, 1]} : vector<7x16x8xbf16> to vector<1x16x8xbf16>
    %22 = vector.shape_cast %21 : vector<1x16x8xbf16> to vector<16x8xbf16>
    %23 = arith.truncf %18 : vector<8x256xf32> to vector<8x256xbf16>
    %cst_13 = arith.constant dense<0.000000e+00> : vector<16x256xf32>
    %24 = tpu.matmul %22, %23, %cst_13 {dimension_numbers = #tpu.dot_dimension_numbers<[1], [0], [0], [1], [0, 0, 1, 1], [], []>} : vector<16x8xbf16>, vector<8x256xbf16>, vector<16x256xf32> -> vector<16x256xf32>
    %c255_i32 = arith.constant 255 : i32
    %25 = tpu.dynamic_rotate %18 by %c255_i32 dim 1 : vector<8x256xf32>, i32 -> vector<8x256xf32>
    %26 = vector.extract_strided_slice %19 {offsets = [1, 0, 0], sizes = [1, 16, 8], strides = [1, 1, 1]} : vector<7x16x8xbf16> to vector<1x16x8xbf16>
    %27 = vector.shape_cast %26 : vector<1x16x8xbf16> to vector<16x8xbf16>
    %28 = arith.truncf %25 : vector<8x256xf32> to vector<8x256xbf16>
    %cst_14 = arith.constant dense<0.000000e+00> : vector<16x256xf32>
    %29 = tpu.matmul %27, %28, %cst_14 {dimension_numbers = #tpu.dot_dimension_numbers<[1], [0], [0], [1], [0, 0, 1, 1], [], []>} : vector<16x8xbf16>, vector<8x256xbf16>, vector<16x256xf32> -> vector<16x256xf32>
    %30 = arith.addf %24, %29 : vector<16x256xf32>
    %c254_i32 = arith.constant 254 : i32
    %31 = tpu.dynamic_rotate %18 by %c254_i32 dim 1 : vector<8x256xf32>, i32 -> vector<8x256xf32>
    %32 = vector.extract_strided_slice %19 {offsets = [2, 0, 0], sizes = [1, 16, 8], strides = [1, 1, 1]} : vector<7x16x8xbf16> to vector<1x16x8xbf16>
    %33 = vector.shape_cast %32 : vector<1x16x8xbf16> to vector<16x8xbf16>
    %34 = arith.truncf %31 : vector<8x256xf32> to vector<8x256xbf16>
    %cst_15 = arith.constant dense<0.000000e+00> : vector<16x256xf32>
    %35 = tpu.matmul %33, %34, %cst_15 {dimension_numbers = #tpu.dot_dimension_numbers<[1], [0], [0], [1], [0, 0, 1, 1], [], []>} : vector<16x8xbf16>, vector<8x256xbf16>, vector<16x256xf32> -> vector<16x256xf32>
    %36 = arith.addf %30, %35 : vector<16x256xf32>
    %c253_i32 = arith.constant 253 : i32
    %37 = tpu.dynamic_rotate %18 by %c253_i32 dim 1 : vector<8x256xf32>, i32 -> vector<8x256xf32>
    %38 = vector.extract_strided_slice %19 {offsets = [3, 0, 0], sizes = [1, 16, 8], strides = [1, 1, 1]} : vector<7x16x8xbf16> to vector<1x16x8xbf16>
    %39 = vector.shape_cast %38 : vector<1x16x8xbf16> to vector<16x8xbf16>
    %40 = arith.truncf %37 : vector<8x256xf32> to vector<8x256xbf16>
    %cst_16 = arith.constant dense<0.000000e+00> : vector<16x256xf32>
    %41 = tpu.matmul %39, %40, %cst_16 {dimension_numbers = #tpu.dot_dimension_numbers<[1], [0], [0], [1], [0, 0, 1, 1], [], []>} : vector<16x8xbf16>, vector<8x256xbf16>, vector<16x256xf32> -> vector<16x256xf32>
    %42 = arith.addf %36, %41 : vector<16x256xf32>
    %c252_i32 = arith.constant 252 : i32
    %43 = tpu.dynamic_rotate %18 by %c252_i32 dim 1 : vector<8x256xf32>, i32 -> vector<8x256xf32>
    %44 = vector.extract_strided_slice %19 {offsets = [4, 0, 0], sizes = [1, 16, 8], strides = [1, 1, 1]} : vector<7x16x8xbf16> to vector<1x16x8xbf16>
    %45 = vector.shape_cast %44 : vector<1x16x8xbf16> to vector<16x8xbf16>
    %46 = arith.truncf %43 : vector<8x256xf32> to vector<8x256xbf16>
    %cst_17 = arith.constant dense<0.000000e+00> : vector<16x256xf32>
    %47 = tpu.matmul %45, %46, %cst_17 {dimension_numbers = #tpu.dot_dimension_numbers<[1], [0], [0], [1], [0, 0, 1, 1], [], []>} : vector<16x8xbf16>, vector<8x256xbf16>, vector<16x256xf32> -> vector<16x256xf32>
    %48 = arith.addf %42, %47 : vector<16x256xf32>
    %c251_i32 = arith.constant 251 : i32
    %49 = tpu.dynamic_rotate %18 by %c251_i32 dim 1 : vector<8x256xf32>, i32 -> vector<8x256xf32>
    %50 = vector.extract_strided_slice %19 {offsets = [5, 0, 0], sizes = [1, 16, 8], strides = [1, 1, 1]} : vector<7x16x8xbf16> to vector<1x16x8xbf16>
    %51 = vector.shape_cast %50 : vector<1x16x8xbf16> to vector<16x8xbf16>
    %52 = arith.truncf %49 : vector<8x256xf32> to vector<8x256xbf16>
    %cst_18 = arith.constant dense<0.000000e+00> : vector<16x256xf32>
    %53 = tpu.matmul %51, %52, %cst_18 {dimension_numbers = #tpu.dot_dimension_numbers<[1], [0], [0], [1], [0, 0, 1, 1], [], []>} : vector<16x8xbf16>, vector<8x256xbf16>, vector<16x256xf32> -> vector<16x256xf32>
    %54 = arith.addf %48, %53 : vector<16x256xf32>
    %c250_i32 = arith.constant 250 : i32
    %55 = tpu.dynamic_rotate %18 by %c250_i32 dim 1 : vector<8x256xf32>, i32 -> vector<8x256xf32>
    %56 = vector.extract_strided_slice %19 {offsets = [6, 0, 0], sizes = [1, 16, 8], strides = [1, 1, 1]} : vector<7x16x8xbf16> to vector<1x16x8xbf16>
    %57 = vector.shape_cast %56 : vector<1x16x8xbf16> to vector<16x8xbf16>
    %58 = arith.truncf %55 : vector<8x256xf32> to vector<8x256xbf16>
    %cst_19 = arith.constant dense<0.000000e+00> : vector<16x256xf32>
    %59 = tpu.matmul %57, %58, %cst_19 {dimension_numbers = #tpu.dot_dimension_numbers<[1], [0], [0], [1], [0, 0, 1, 1], [], []>} : vector<16x8xbf16>, vector<8x256xbf16>, vector<16x256xf32> -> vector<16x256xf32>
    %60 = arith.addf %54, %59 : vector<16x256xf32>
    %61 = vector.broadcast %20 : vector<16x1xf32> to vector<16x256xf32>
    %62 = arith.addf %60, %61 : vector<16x256xf32>
    %cst_20 = arith.constant 0.000000e+00 : f32
    %63 = vector.broadcast %cst_20 : f32 to vector<16x256xf32>
    %64 = arith.maximumf %62, %63 : vector<16x256xf32>
    %c40_i32 = arith.constant 40 : i32
    %65 = vector.broadcast %c40_i32 : i32 to vector<1x256xi32>
    %66 = arith.cmpi slt, %2, %65 : vector<1x256xi32>
    %cst_21 = arith.constant 0.000000e+00 : f32
    %67 = vector.shape_cast %66 : vector<1x256xi1> to vector<1x256xi1>
    %68 = vector.broadcast %67 : vector<1x256xi1> to vector<16x256xi1>
    %69 = vector.broadcast %cst_21 : f32 to vector<16x256xf32>
    %70 = arith.select %68, %64, %69 : vector<16x256xi1>, vector<16x256xf32>
    %c0_22 = arith.constant 0 : index
    %c0_23 = arith.constant 0 : index
    %c0_24 = arith.constant 0 : index
    %71 = vector.load %arg6[%c0_22, %c0_23, %c0_24] : memref<3x16x16xbf16, #tpu.memory_space<vmem>>, vector<3x16x16xbf16>
    %c0_25 = arith.constant 0 : index
    %c0_26 = arith.constant 0 : index
    %72 = vector.load %arg7[%c0_25, %c0_26] : memref<16x1xf32, #tpu.memory_space<vmem>>, vector<16x1xf32>
    %73 = vector.extract_strided_slice %71 {offsets = [0, 0, 0], sizes = [1, 16, 16], strides = [1, 1, 1]} : vector<3x16x16xbf16> to vector<1x16x16xbf16>
    %74 = vector.shape_cast %73 : vector<1x16x16xbf16> to vector<16x16xbf16>
    %75 = arith.truncf %70 : vector<16x256xf32> to vector<16x256xbf16>
    %cst_27 = arith.constant dense<0.000000e+00> : vector<16x256xf32>
    %76 = tpu.matmul %74, %75, %cst_27 {dimension_numbers = #tpu.dot_dimension_numbers<[1], [0], [0], [1], [0, 0, 1, 1], [], []>} : vector<16x16xbf16>, vector<16x256xbf16>, vector<16x256xf32> -> vector<16x256xf32>
    %c255_i32_28 = arith.constant 255 : i32
    %77 = tpu.dynamic_rotate %70 by %c255_i32_28 dim 1 : vector<16x256xf32>, i32 -> vector<16x256xf32>
    %78 = vector.extract_strided_slice %71 {offsets = [1, 0, 0], sizes = [1, 16, 16], strides = [1, 1, 1]} : vector<3x16x16xbf16> to vector<1x16x16xbf16>
    %79 = vector.shape_cast %78 : vector<1x16x16xbf16> to vector<16x16xbf16>
    %80 = arith.truncf %77 : vector<16x256xf32> to vector<16x256xbf16>
    %cst_29 = arith.constant dense<0.000000e+00> : vector<16x256xf32>
    %81 = tpu.matmul %79, %80, %cst_29 {dimension_numbers = #tpu.dot_dimension_numbers<[1], [0], [0], [1], [0, 0, 1, 1], [], []>} : vector<16x16xbf16>, vector<16x256xbf16>, vector<16x256xf32> -> vector<16x256xf32>
    %82 = arith.addf %76, %81 : vector<16x256xf32>
    %c254_i32_30 = arith.constant 254 : i32
    %83 = tpu.dynamic_rotate %70 by %c254_i32_30 dim 1 : vector<16x256xf32>, i32 -> vector<16x256xf32>
    %84 = vector.extract_strided_slice %71 {offsets = [2, 0, 0], sizes = [1, 16, 16], strides = [1, 1, 1]} : vector<3x16x16xbf16> to vector<1x16x16xbf16>
    %85 = vector.shape_cast %84 : vector<1x16x16xbf16> to vector<16x16xbf16>
    %86 = arith.truncf %83 : vector<16x256xf32> to vector<16x256xbf16>
    %cst_31 = arith.constant dense<0.000000e+00> : vector<16x256xf32>
    %87 = tpu.matmul %85, %86, %cst_31 {dimension_numbers = #tpu.dot_dimension_numbers<[1], [0], [0], [1], [0, 0, 1, 1], [], []>} : vector<16x16xbf16>, vector<16x256xbf16>, vector<16x256xf32> -> vector<16x256xf32>
    %88 = arith.addf %82, %87 : vector<16x256xf32>
    %89 = vector.broadcast %72 : vector<16x1xf32> to vector<16x256xf32>
    %90 = arith.addf %88, %89 : vector<16x256xf32>
    %cst_32 = arith.constant 0.000000e+00 : f32
    %91 = vector.broadcast %cst_32 : f32 to vector<16x256xf32>
    %92 = arith.maximumf %90, %91 : vector<16x256xf32>
    %c38_i32 = arith.constant 38 : i32
    %93 = vector.broadcast %c38_i32 : i32 to vector<1x256xi32>
    %94 = arith.cmpi slt, %2, %93 : vector<1x256xi32>
    %cst_33 = arith.constant 0.000000e+00 : f32
    %95 = vector.shape_cast %94 : vector<1x256xi1> to vector<1x256xi1>
    %96 = vector.broadcast %95 : vector<1x256xi1> to vector<16x256xi1>
    %97 = vector.broadcast %cst_33 : f32 to vector<16x256xf32>
    %98 = arith.select %96, %92, %97 : vector<16x256xi1>, vector<16x256xf32>
    %c0_34 = arith.constant 0 : index
    %c0_35 = arith.constant 0 : index
    %c0_36 = arith.constant 0 : index
    %99 = vector.load %arg8[%c0_34, %c0_35, %c0_36] : memref<3x16x16xbf16, #tpu.memory_space<vmem>>, vector<3x16x16xbf16>
    %c0_37 = arith.constant 0 : index
    %c0_38 = arith.constant 0 : index
    %100 = vector.load %arg9[%c0_37, %c0_38] : memref<16x1xf32, #tpu.memory_space<vmem>>, vector<16x1xf32>
    %101 = vector.extract_strided_slice %99 {offsets = [0, 0, 0], sizes = [1, 16, 16], strides = [1, 1, 1]} : vector<3x16x16xbf16> to vector<1x16x16xbf16>
    %102 = vector.shape_cast %101 : vector<1x16x16xbf16> to vector<16x16xbf16>
    %103 = arith.truncf %98 : vector<16x256xf32> to vector<16x256xbf16>
    %cst_39 = arith.constant dense<0.000000e+00> : vector<16x256xf32>
    %104 = tpu.matmul %102, %103, %cst_39 {dimension_numbers = #tpu.dot_dimension_numbers<[1], [0], [0], [1], [0, 0, 1, 1], [], []>} : vector<16x16xbf16>, vector<16x256xbf16>, vector<16x256xf32> -> vector<16x256xf32>
    %c255_i32_40 = arith.constant 255 : i32
    %105 = tpu.dynamic_rotate %98 by %c255_i32_40 dim 1 : vector<16x256xf32>, i32 -> vector<16x256xf32>
    %106 = vector.extract_strided_slice %99 {offsets = [1, 0, 0], sizes = [1, 16, 16], strides = [1, 1, 1]} : vector<3x16x16xbf16> to vector<1x16x16xbf16>
    %107 = vector.shape_cast %106 : vector<1x16x16xbf16> to vector<16x16xbf16>
    %108 = arith.truncf %105 : vector<16x256xf32> to vector<16x256xbf16>
    %cst_41 = arith.constant dense<0.000000e+00> : vector<16x256xf32>
    %109 = tpu.matmul %107, %108, %cst_41 {dimension_numbers = #tpu.dot_dimension_numbers<[1], [0], [0], [1], [0, 0, 1, 1], [], []>} : vector<16x16xbf16>, vector<16x256xbf16>, vector<16x256xf32> -> vector<16x256xf32>
    %110 = arith.addf %104, %109 : vector<16x256xf32>
    %c254_i32_42 = arith.constant 254 : i32
    %111 = tpu.dynamic_rotate %98 by %c254_i32_42 dim 1 : vector<16x256xf32>, i32 -> vector<16x256xf32>
    %112 = vector.extract_strided_slice %99 {offsets = [2, 0, 0], sizes = [1, 16, 16], strides = [1, 1, 1]} : vector<3x16x16xbf16> to vector<1x16x16xbf16>
    %113 = vector.shape_cast %112 : vector<1x16x16xbf16> to vector<16x16xbf16>
    %114 = arith.truncf %111 : vector<16x256xf32> to vector<16x256xbf16>
    %cst_43 = arith.constant dense<0.000000e+00> : vector<16x256xf32>
    %115 = tpu.matmul %113, %114, %cst_43 {dimension_numbers = #tpu.dot_dimension_numbers<[1], [0], [0], [1], [0, 0, 1, 1], [], []>} : vector<16x16xbf16>, vector<16x256xbf16>, vector<16x256xf32> -> vector<16x256xf32>
    %116 = arith.addf %110, %115 : vector<16x256xf32>
    %117 = vector.broadcast %100 : vector<16x1xf32> to vector<16x256xf32>
    %118 = arith.addf %116, %117 : vector<16x256xf32>
    %cst_44 = arith.constant 0.000000e+00 : f32
    %119 = vector.broadcast %cst_44 : f32 to vector<16x256xf32>
    %120 = arith.maximumf %118, %119 : vector<16x256xf32>
    %c36_i32 = arith.constant 36 : i32
    %121 = vector.broadcast %c36_i32 : i32 to vector<1x256xi32>
    %122 = arith.cmpi slt, %2, %121 : vector<1x256xi32>
    %cst_45 = arith.constant 0.000000e+00 : f32
    %123 = vector.shape_cast %122 : vector<1x256xi1> to vector<1x256xi1>
    %124 = vector.broadcast %123 : vector<1x256xi1> to vector<16x256xi1>
    %125 = vector.broadcast %cst_45 : f32 to vector<16x256xf32>
    %126 = arith.select %124, %120, %125 : vector<16x256xi1>, vector<16x256xf32>
    %c0_46 = arith.constant 0 : index
    %c0_47 = arith.constant 0 : index
    %127 = vector.load %arg10[%c0_46, %c0_47] : memref<16x256xf32, #tpu.memory_space<vmem>>, vector<16x256xf32>
    tpu.vector_store %arg10[%c0_46, %c0_47], %126 {strides = array<i32>} : memref<16x256xf32, #tpu.memory_space<vmem>>, vector<16x256xf32>,
    return
  }
  func.func @transform_0(%arg0: i32) -> (i32, i32) {
    %c0_i32 = arith.constant 0 : i32
    %c0_i32_0 = arith.constant 0 : i32
    return %c0_i32, %arg0 : i32, i32
  }
  func.func @transform_1(%arg0: i32) -> (i32, i32, i32) {
    %c0_i32 = arith.constant 0 : i32
    %c0_i32_0 = arith.constant 0 : i32
    %c0_i32_1 = arith.constant 0 : i32
    %c0_i32_2 = arith.constant 0 : i32
    return %c0_i32, %c0_i32_0, %c0_i32_1 : i32, i32, i32
  }
  func.func @transform_2(%arg0: i32) -> (i32, i32) {
    %c0_i32 = arith.constant 0 : i32
    %c0_i32_0 = arith.constant 0 : i32
    %c0_i32_1 = arith.constant 0 : i32
    return %c0_i32, %c0_i32_0 : i32, i32
  }
  func.func @transform_3(%arg0: i32) -> (i32, i32, i32) {
    %c0_i32 = arith.constant 0 : i32
    %c0_i32_0 = arith.constant 0 : i32
    %c0_i32_1 = arith.constant 0 : i32
    %c0_i32_2 = arith.constant 0 : i32
    return %c0_i32, %c0_i32_0, %c0_i32_1 : i32, i32, i32
  }
  func.func @transform_4(%arg0: i32) -> (i32, i32) {
    %c0_i32 = arith.constant 0 : i32
    %c0_i32_0 = arith.constant 0 : i32
    %c0_i32_1 = arith.constant 0 : i32
    return %c0_i32, %c0_i32_0 : i32, i32
  }
  func.func @transform_5(%arg0: i32) -> (i32, i32, i32) {
    %c0_i32 = arith.constant 0 : i32
    %c0_i32_0 = arith.constant 0 : i32
    %c0_i32_1 = arith.constant 0 : i32
    %c0_i32_2 = arith.constant 0 : i32
    return %c0_i32, %c0_i32_0, %c0_i32_1 : i32, i32, i32
  }
  func.func @transform_6(%arg0: i32) -> (i32, i32) {
    %c0_i32 = arith.constant 0 : i32
    %c0_i32_0 = arith.constant 0 : i32
    %c0_i32_1 = arith.constant 0 : i32
    return %c0_i32, %c0_i32_0 : i32, i32
  }
  func.func @transform_7(%arg0: i32) -> (i32, i32, i32) {
    %c0_i32 = arith.constant 0 : i32
    %c0_i32_0 = arith.constant 0 : i32
    %c0_i32_1 = arith.constant 0 : i32
    %c0_i32_2 = arith.constant 0 : i32
    return %c0_i32, %c0_i32_0, %c0_i32_1 : i32, i32, i32
  }
  func.func @transform_8(%arg0: i32) -> (i32, i32) {
    %c0_i32 = arith.constant 0 : i32
    %c0_i32_0 = arith.constant 0 : i32
    %c0_i32_1 = arith.constant 0 : i32
    return %c0_i32, %c0_i32_0 : i32, i32
  }
  func.func @transform_9(%arg0: i32) -> (i32, i32) {
    %c0_i32 = arith.constant 0 : i32
    %c0_i32_0 = arith.constant 0 : i32
    return %c0_i32, %arg0 : i32, i32
  }
}

module attributes {stable_mosaic.version = 11 : i64} {
  func.func @_block_b_kernel(%arg0: i32, %arg1: memref<16x256xf32, #tpu.memory_space<vmem>>, %arg2: memref<1x16x16xbf16, #tpu.memory_space<vmem>>, %arg3: memref<16x1xf32, #tpu.memory_space<vmem>>, %arg4: memref<7x16x16xbf16, #tpu.memory_space<vmem>>, %arg5: memref<16x1xf32, #tpu.memory_space<vmem>>, %arg6: memref<3x8x16xbf16, #tpu.memory_space<vmem>>, %arg7: memref<8x1xf32, #tpu.memory_space<vmem>>, %arg8: memref<3x16x8xbf16, #tpu.memory_space<vmem>>, %arg9: memref<16x1xf32, #tpu.memory_space<vmem>>, %arg10: memref<1x16x16xbf16, #tpu.memory_space<vmem>>, %arg11: memref<16x1xf32, #tpu.memory_space<vmem>>, %arg12: memref<16x256xf32, #tpu.memory_space<vmem>>) attributes {dimension_semantics = [#tpu.dimension_semantics<parallel>], iteration_bounds = array<i64: 2>, scalar_prefetch = 0 : i64, scratch_operands = 0 : i64, tpu.core_type = #tpu.core_type<tc>, window_params = [{transform_indices = @transform_0, window_bounds = array<i64: 16, 256>}, {pipeline_mode = #tpu.pipeline_mode<synchronous>, transform_indices = @transform_1, window_bounds = array<i64: 1, 16, 16>}, {pipeline_mode = #tpu.pipeline_mode<synchronous>, transform_indices = @transform_2, window_bounds = array<i64: 16, 1>}, {pipeline_mode = #tpu.pipeline_mode<synchronous>, transform_indices = @transform_3, window_bounds = array<i64: 7, 16, 16>}, {pipeline_mode = #tpu.pipeline_mode<synchronous>, transform_indices = @transform_4, window_bounds = array<i64: 16, 1>}, {pipeline_mode = #tpu.pipeline_mode<synchronous>, transform_indices = @transform_5, window_bounds = array<i64: 3, 8, 16>}, {pipeline_mode = #tpu.pipeline_mode<synchronous>, transform_indices = @transform_6, window_bounds = array<i64: 8, 1>}, {pipeline_mode = #tpu.pipeline_mode<synchronous>, transform_indices = @transform_7, window_bounds = array<i64: 3, 16, 8>}, {pipeline_mode = #tpu.pipeline_mode<synchronous>, transform_indices = @transform_8, window_bounds = array<i64: 16, 1>}, {pipeline_mode = #tpu.pipeline_mode<synchronous>, transform_indices = @transform_9, window_bounds = array<i64: 1, 16, 16>}, {pipeline_mode = #tpu.pipeline_mode<synchronous>, transform_indices = @transform_10, window_bounds = array<i64: 16, 1>}, {transform_indices = @transform_11, window_bounds = array<i64: 16, 256>}]} {
    %0 = tpu.iota {dimensions = array<i32: 1>} : vector<1x256xi32>
    %c63_i32 = arith.constant 63 : i32
    %1 = vector.broadcast %c63_i32 : i32 to vector<1x256xi32>
    %2 = arith.andi %0, %1 : vector<1x256xi32>
    %c0 = arith.constant 0 : index
    %c0_0 = arith.constant 0 : index
    %3 = vector.load %arg1[%c0, %c0_0] : memref<16x256xf32, #tpu.memory_space<vmem>>, vector<16x256xf32>
    %c0_1 = arith.constant 0 : index
    %c0_2 = arith.constant 0 : index
    %c0_3 = arith.constant 0 : index
    %4 = vector.load %arg2[%c0_1, %c0_2, %c0_3] : memref<1x16x16xbf16, #tpu.memory_space<vmem>>, vector<1x16x16xbf16>
    %c0_4 = arith.constant 0 : index
    %c0_5 = arith.constant 0 : index
    %5 = vector.load %arg3[%c0_4, %c0_5] : memref<16x1xf32, #tpu.memory_space<vmem>>, vector<16x1xf32>
    %6 = vector.shape_cast %4 : vector<1x16x16xbf16> to vector<16x16xbf16>
    %7 = arith.truncf %3 : vector<16x256xf32> to vector<16x256xbf16>
    %cst = arith.constant dense<0.000000e+00> : vector<16x256xf32>
    %8 = tpu.matmul %6, %7, %cst {dimension_numbers = #tpu.dot_dimension_numbers<[1], [0], [0], [1], [0, 0, 1, 1], [], []>} : vector<16x16xbf16>, vector<16x256xbf16>, vector<16x256xf32> -> vector<16x256xf32>
    %9 = vector.broadcast %5 : vector<16x1xf32> to vector<16x256xf32>
    %10 = arith.addf %8, %9 : vector<16x256xf32>
    %cst_6 = arith.constant 0.000000e+00 : f32
    %11 = vector.broadcast %cst_6 : f32 to vector<16x256xf32>
    %12 = arith.maximumf %10, %11 : vector<16x256xf32>
    %c12_i32 = arith.constant 12 : i32
    %13 = vector.broadcast %c12_i32 : i32 to vector<1x256xi32>
    %14 = arith.cmpi slt, %2, %13 : vector<1x256xi32>
    %cst_7 = arith.constant 0.000000e+00 : f32
    %15 = vector.shape_cast %14 : vector<1x256xi1> to vector<1x256xi1>
    %16 = vector.broadcast %15 : vector<1x256xi1> to vector<16x256xi1>
    %17 = vector.broadcast %cst_7 : f32 to vector<16x256xf32>
    %18 = arith.select %16, %12, %17 : vector<16x256xi1>, vector<16x256xf32>
    %c0_8 = arith.constant 0 : index
    %c0_9 = arith.constant 0 : index
    %c0_10 = arith.constant 0 : index
    %19 = vector.load %arg4[%c0_8, %c0_9, %c0_10] : memref<7x16x16xbf16, #tpu.memory_space<vmem>>, vector<7x16x16xbf16>
    %c0_11 = arith.constant 0 : index
    %c0_12 = arith.constant 0 : index
    %20 = vector.load %arg5[%c0_11, %c0_12] : memref<16x1xf32, #tpu.memory_space<vmem>>, vector<16x1xf32>
    %c3_i32 = arith.constant 3 : i32
    %21 = tpu.dynamic_rotate %18 by %c3_i32 dim 1 : vector<16x256xf32>, i32 -> vector<16x256xf32>
    %22 = vector.extract_strided_slice %19 {offsets = [0, 0, 0], sizes = [1, 16, 16], strides = [1, 1, 1]} : vector<7x16x16xbf16> to vector<1x16x16xbf16>
    %23 = vector.shape_cast %22 : vector<1x16x16xbf16> to vector<16x16xbf16>
    %24 = arith.truncf %21 : vector<16x256xf32> to vector<16x256xbf16>
    %cst_13 = arith.constant dense<0.000000e+00> : vector<16x256xf32>
    %25 = tpu.matmul %23, %24, %cst_13 {dimension_numbers = #tpu.dot_dimension_numbers<[1], [0], [0], [1], [0, 0, 1, 1], [], []>} : vector<16x16xbf16>, vector<16x256xbf16>, vector<16x256xf32> -> vector<16x256xf32>
    %c2_i32 = arith.constant 2 : i32
    %26 = tpu.dynamic_rotate %18 by %c2_i32 dim 1 : vector<16x256xf32>, i32 -> vector<16x256xf32>
    %27 = vector.extract_strided_slice %19 {offsets = [1, 0, 0], sizes = [1, 16, 16], strides = [1, 1, 1]} : vector<7x16x16xbf16> to vector<1x16x16xbf16>
    %28 = vector.shape_cast %27 : vector<1x16x16xbf16> to vector<16x16xbf16>
    %29 = arith.truncf %26 : vector<16x256xf32> to vector<16x256xbf16>
    %cst_14 = arith.constant dense<0.000000e+00> : vector<16x256xf32>
    %30 = tpu.matmul %28, %29, %cst_14 {dimension_numbers = #tpu.dot_dimension_numbers<[1], [0], [0], [1], [0, 0, 1, 1], [], []>} : vector<16x16xbf16>, vector<16x256xbf16>, vector<16x256xf32> -> vector<16x256xf32>
    %31 = arith.addf %25, %30 : vector<16x256xf32>
    %c1_i32 = arith.constant 1 : i32
    %32 = tpu.dynamic_rotate %18 by %c1_i32 dim 1 : vector<16x256xf32>, i32 -> vector<16x256xf32>
    %33 = vector.extract_strided_slice %19 {offsets = [2, 0, 0], sizes = [1, 16, 16], strides = [1, 1, 1]} : vector<7x16x16xbf16> to vector<1x16x16xbf16>
    %34 = vector.shape_cast %33 : vector<1x16x16xbf16> to vector<16x16xbf16>
    %35 = arith.truncf %32 : vector<16x256xf32> to vector<16x256xbf16>
    %cst_15 = arith.constant dense<0.000000e+00> : vector<16x256xf32>
    %36 = tpu.matmul %34, %35, %cst_15 {dimension_numbers = #tpu.dot_dimension_numbers<[1], [0], [0], [1], [0, 0, 1, 1], [], []>} : vector<16x16xbf16>, vector<16x256xbf16>, vector<16x256xf32> -> vector<16x256xf32>
    %37 = arith.addf %31, %36 : vector<16x256xf32>
    %38 = vector.extract_strided_slice %19 {offsets = [3, 0, 0], sizes = [1, 16, 16], strides = [1, 1, 1]} : vector<7x16x16xbf16> to vector<1x16x16xbf16>
    %39 = vector.shape_cast %38 : vector<1x16x16xbf16> to vector<16x16xbf16>
    %40 = arith.truncf %18 : vector<16x256xf32> to vector<16x256xbf16>
    %cst_16 = arith.constant dense<0.000000e+00> : vector<16x256xf32>
    %41 = tpu.matmul %39, %40, %cst_16 {dimension_numbers = #tpu.dot_dimension_numbers<[1], [0], [0], [1], [0, 0, 1, 1], [], []>} : vector<16x16xbf16>, vector<16x256xbf16>, vector<16x256xf32> -> vector<16x256xf32>
    %42 = arith.addf %37, %41 : vector<16x256xf32>
    %c255_i32 = arith.constant 255 : i32
    %43 = tpu.dynamic_rotate %18 by %c255_i32 dim 1 : vector<16x256xf32>, i32 -> vector<16x256xf32>
    %44 = vector.extract_strided_slice %19 {offsets = [4, 0, 0], sizes = [1, 16, 16], strides = [1, 1, 1]} : vector<7x16x16xbf16> to vector<1x16x16xbf16>
    %45 = vector.shape_cast %44 : vector<1x16x16xbf16> to vector<16x16xbf16>
    %46 = arith.truncf %43 : vector<16x256xf32> to vector<16x256xbf16>
    %cst_17 = arith.constant dense<0.000000e+00> : vector<16x256xf32>
    %47 = tpu.matmul %45, %46, %cst_17 {dimension_numbers = #tpu.dot_dimension_numbers<[1], [0], [0], [1], [0, 0, 1, 1], [], []>} : vector<16x16xbf16>, vector<16x256xbf16>, vector<16x256xf32> -> vector<16x256xf32>
    %48 = arith.addf %42, %47 : vector<16x256xf32>
    %c254_i32 = arith.constant 254 : i32
    %49 = tpu.dynamic_rotate %18 by %c254_i32 dim 1 : vector<16x256xf32>, i32 -> vector<16x256xf32>
    %50 = vector.extract_strided_slice %19 {offsets = [5, 0, 0], sizes = [1, 16, 16], strides = [1, 1, 1]} : vector<7x16x16xbf16> to vector<1x16x16xbf16>
    %51 = vector.shape_cast %50 : vector<1x16x16xbf16> to vector<16x16xbf16>
    %52 = arith.truncf %49 : vector<16x256xf32> to vector<16x256xbf16>
    %cst_18 = arith.constant dense<0.000000e+00> : vector<16x256xf32>
    %53 = tpu.matmul %51, %52, %cst_18 {dimension_numbers = #tpu.dot_dimension_numbers<[1], [0], [0], [1], [0, 0, 1, 1], [], []>} : vector<16x16xbf16>, vector<16x256xbf16>, vector<16x256xf32> -> vector<16x256xf32>
    %54 = arith.addf %48, %53 : vector<16x256xf32>
    %c253_i32 = arith.constant 253 : i32
    %55 = tpu.dynamic_rotate %18 by %c253_i32 dim 1 : vector<16x256xf32>, i32 -> vector<16x256xf32>
    %56 = vector.extract_strided_slice %19 {offsets = [6, 0, 0], sizes = [1, 16, 16], strides = [1, 1, 1]} : vector<7x16x16xbf16> to vector<1x16x16xbf16>
    %57 = vector.shape_cast %56 : vector<1x16x16xbf16> to vector<16x16xbf16>
    %58 = arith.truncf %55 : vector<16x256xf32> to vector<16x256xbf16>
    %cst_19 = arith.constant dense<0.000000e+00> : vector<16x256xf32>
    %59 = tpu.matmul %57, %58, %cst_19 {dimension_numbers = #tpu.dot_dimension_numbers<[1], [0], [0], [1], [0, 0, 1, 1], [], []>} : vector<16x16xbf16>, vector<16x256xbf16>, vector<16x256xf32> -> vector<16x256xf32>
    %60 = arith.addf %54, %59 : vector<16x256xf32>
    %61 = vector.broadcast %20 : vector<16x1xf32> to vector<16x256xf32>
    %62 = arith.addf %60, %61 : vector<16x256xf32>
    %cst_20 = arith.constant 0.000000e+00 : f32
    %63 = vector.broadcast %cst_20 : f32 to vector<16x256xf32>
    %64 = arith.maximumf %62, %63 : vector<16x256xf32>
    %c12_i32_21 = arith.constant 12 : i32
    %65 = vector.broadcast %c12_i32_21 : i32 to vector<1x256xi32>
    %66 = arith.cmpi slt, %2, %65 : vector<1x256xi32>
    %cst_22 = arith.constant 0.000000e+00 : f32
    %67 = vector.shape_cast %66 : vector<1x256xi1> to vector<1x256xi1>
    %68 = vector.broadcast %67 : vector<1x256xi1> to vector<16x256xi1>
    %69 = vector.broadcast %cst_22 : f32 to vector<16x256xf32>
    %70 = arith.select %68, %64, %69 : vector<16x256xi1>, vector<16x256xf32>
    %c0_23 = arith.constant 0 : index
    %c0_24 = arith.constant 0 : index
    %c0_25 = arith.constant 0 : index
    %71 = vector.load %arg6[%c0_23, %c0_24, %c0_25] : memref<3x8x16xbf16, #tpu.memory_space<vmem>>, vector<3x8x16xbf16>
    %c0_26 = arith.constant 0 : index
    %c0_27 = arith.constant 0 : index
    %72 = vector.load %arg7[%c0_26, %c0_27] : memref<8x1xf32, #tpu.memory_space<vmem>>, vector<8x1xf32>
    %c1_i32_28 = arith.constant 1 : i32
    %73 = tpu.dynamic_rotate %18 by %c1_i32_28 dim 1 : vector<16x256xf32>, i32 -> vector<16x256xf32>
    %74 = vector.extract_strided_slice %71 {offsets = [0, 0, 0], sizes = [1, 8, 16], strides = [1, 1, 1]} : vector<3x8x16xbf16> to vector<1x8x16xbf16>
    %75 = vector.shape_cast %74 : vector<1x8x16xbf16> to vector<8x16xbf16>
    %76 = arith.truncf %73 : vector<16x256xf32> to vector<16x256xbf16>
    %cst_29 = arith.constant dense<0.000000e+00> : vector<8x256xf32>
    %77 = tpu.matmul %75, %76, %cst_29 {dimension_numbers = #tpu.dot_dimension_numbers<[1], [0], [0], [1], [0, 0, 1, 1], [], []>} : vector<8x16xbf16>, vector<16x256xbf16>, vector<8x256xf32> -> vector<8x256xf32>
    %78 = vector.extract_strided_slice %71 {offsets = [1, 0, 0], sizes = [1, 8, 16], strides = [1, 1, 1]} : vector<3x8x16xbf16> to vector<1x8x16xbf16>
    %79 = vector.shape_cast %78 : vector<1x8x16xbf16> to vector<8x16xbf16>
    %80 = arith.truncf %18 : vector<16x256xf32> to vector<16x256xbf16>
    %cst_30 = arith.constant dense<0.000000e+00> : vector<8x256xf32>
    %81 = tpu.matmul %79, %80, %cst_30 {dimension_numbers = #tpu.dot_dimension_numbers<[1], [0], [0], [1], [0, 0, 1, 1], [], []>} : vector<8x16xbf16>, vector<16x256xbf16>, vector<8x256xf32> -> vector<8x256xf32>
    %82 = arith.addf %77, %81 : vector<8x256xf32>
    %c255_i32_31 = arith.constant 255 : i32
    %83 = tpu.dynamic_rotate %18 by %c255_i32_31 dim 1 : vector<16x256xf32>, i32 -> vector<16x256xf32>
    %84 = vector.extract_strided_slice %71 {offsets = [2, 0, 0], sizes = [1, 8, 16], strides = [1, 1, 1]} : vector<3x8x16xbf16> to vector<1x8x16xbf16>
    %85 = vector.shape_cast %84 : vector<1x8x16xbf16> to vector<8x16xbf16>
    %86 = arith.truncf %83 : vector<16x256xf32> to vector<16x256xbf16>
    %cst_32 = arith.constant dense<0.000000e+00> : vector<8x256xf32>
    %87 = tpu.matmul %85, %86, %cst_32 {dimension_numbers = #tpu.dot_dimension_numbers<[1], [0], [0], [1], [0, 0, 1, 1], [], []>} : vector<8x16xbf16>, vector<16x256xbf16>, vector<8x256xf32> -> vector<8x256xf32>
    %88 = arith.addf %82, %87 : vector<8x256xf32>
    %89 = vector.broadcast %72 : vector<8x1xf32> to vector<8x256xf32>
    %90 = arith.addf %88, %89 : vector<8x256xf32>
    %cst_33 = arith.constant 0.000000e+00 : f32
    %91 = vector.broadcast %cst_33 : f32 to vector<8x256xf32>
    %92 = arith.maximumf %90, %91 : vector<8x256xf32>
    %c12_i32_34 = arith.constant 12 : i32
    %93 = vector.broadcast %c12_i32_34 : i32 to vector<1x256xi32>
    %94 = arith.cmpi slt, %2, %93 : vector<1x256xi32>
    %cst_35 = arith.constant 0.000000e+00 : f32
    %95 = vector.shape_cast %94 : vector<1x256xi1> to vector<1x256xi1>
    %96 = vector.broadcast %95 : vector<1x256xi1> to vector<8x256xi1>
    %97 = vector.broadcast %cst_35 : f32 to vector<8x256xf32>
    %98 = arith.select %96, %92, %97 : vector<8x256xi1>, vector<8x256xf32>
    %c0_36 = arith.constant 0 : index
    %c0_37 = arith.constant 0 : index
    %c0_38 = arith.constant 0 : index
    %99 = vector.load %arg8[%c0_36, %c0_37, %c0_38] : memref<3x16x8xbf16, #tpu.memory_space<vmem>>, vector<3x16x8xbf16>
    %c0_39 = arith.constant 0 : index
    %c0_40 = arith.constant 0 : index
    %100 = vector.load %arg9[%c0_39, %c0_40] : memref<16x1xf32, #tpu.memory_space<vmem>>, vector<16x1xf32>
    %c1_i32_41 = arith.constant 1 : i32
    %101 = tpu.dynamic_rotate %98 by %c1_i32_41 dim 1 : vector<8x256xf32>, i32 -> vector<8x256xf32>
    %102 = vector.extract_strided_slice %99 {offsets = [0, 0, 0], sizes = [1, 16, 8], strides = [1, 1, 1]} : vector<3x16x8xbf16> to vector<1x16x8xbf16>
    %103 = vector.shape_cast %102 : vector<1x16x8xbf16> to vector<16x8xbf16>
    %104 = arith.truncf %101 : vector<8x256xf32> to vector<8x256xbf16>
    %cst_42 = arith.constant dense<0.000000e+00> : vector<16x256xf32>
    %105 = tpu.matmul %103, %104, %cst_42 {dimension_numbers = #tpu.dot_dimension_numbers<[1], [0], [0], [1], [0, 0, 1, 1], [], []>} : vector<16x8xbf16>, vector<8x256xbf16>, vector<16x256xf32> -> vector<16x256xf32>
    %106 = vector.extract_strided_slice %99 {offsets = [1, 0, 0], sizes = [1, 16, 8], strides = [1, 1, 1]} : vector<3x16x8xbf16> to vector<1x16x8xbf16>
    %107 = vector.shape_cast %106 : vector<1x16x8xbf16> to vector<16x8xbf16>
    %108 = arith.truncf %98 : vector<8x256xf32> to vector<8x256xbf16>
    %cst_43 = arith.constant dense<0.000000e+00> : vector<16x256xf32>
    %109 = tpu.matmul %107, %108, %cst_43 {dimension_numbers = #tpu.dot_dimension_numbers<[1], [0], [0], [1], [0, 0, 1, 1], [], []>} : vector<16x8xbf16>, vector<8x256xbf16>, vector<16x256xf32> -> vector<16x256xf32>
    %110 = arith.addf %105, %109 : vector<16x256xf32>
    %c255_i32_44 = arith.constant 255 : i32
    %111 = tpu.dynamic_rotate %98 by %c255_i32_44 dim 1 : vector<8x256xf32>, i32 -> vector<8x256xf32>
    %112 = vector.extract_strided_slice %99 {offsets = [2, 0, 0], sizes = [1, 16, 8], strides = [1, 1, 1]} : vector<3x16x8xbf16> to vector<1x16x8xbf16>
    %113 = vector.shape_cast %112 : vector<1x16x8xbf16> to vector<16x8xbf16>
    %114 = arith.truncf %111 : vector<8x256xf32> to vector<8x256xbf16>
    %cst_45 = arith.constant dense<0.000000e+00> : vector<16x256xf32>
    %115 = tpu.matmul %113, %114, %cst_45 {dimension_numbers = #tpu.dot_dimension_numbers<[1], [0], [0], [1], [0, 0, 1, 1], [], []>} : vector<16x8xbf16>, vector<8x256xbf16>, vector<16x256xf32> -> vector<16x256xf32>
    %116 = arith.addf %110, %115 : vector<16x256xf32>
    %117 = vector.broadcast %100 : vector<16x1xf32> to vector<16x256xf32>
    %118 = arith.addf %116, %117 : vector<16x256xf32>
    %cst_46 = arith.constant 0.000000e+00 : f32
    %119 = vector.broadcast %cst_46 : f32 to vector<16x256xf32>
    %120 = arith.maximumf %118, %119 : vector<16x256xf32>
    %c12_i32_47 = arith.constant 12 : i32
    %121 = vector.broadcast %c12_i32_47 : i32 to vector<1x256xi32>
    %122 = arith.cmpi slt, %2, %121 : vector<1x256xi32>
    %cst_48 = arith.constant 0.000000e+00 : f32
    %123 = vector.shape_cast %122 : vector<1x256xi1> to vector<1x256xi1>
    %124 = vector.broadcast %123 : vector<1x256xi1> to vector<16x256xi1>
    %125 = vector.broadcast %cst_48 : f32 to vector<16x256xf32>
    %126 = arith.select %124, %120, %125 : vector<16x256xi1>, vector<16x256xf32>
    %c1_i32_49 = arith.constant 1 : i32
    %127 = tpu.dynamic_rotate %3 by %c1_i32_49 dim 1 : vector<16x256xf32>, i32 -> vector<16x256xf32>
    %128 = arith.maximumf %3, %127 : vector<16x256xf32>
    %c255_i32_50 = arith.constant 255 : i32
    %129 = tpu.dynamic_rotate %3 by %c255_i32_50 dim 1 : vector<16x256xf32>, i32 -> vector<16x256xf32>
    %130 = arith.maximumf %128, %129 : vector<16x256xf32>
    %c12_i32_51 = arith.constant 12 : i32
    %131 = vector.broadcast %c12_i32_51 : i32 to vector<1x256xi32>
    %132 = arith.cmpi slt, %2, %131 : vector<1x256xi32>
    %cst_52 = arith.constant 0.000000e+00 : f32
    %133 = vector.shape_cast %132 : vector<1x256xi1> to vector<1x256xi1>
    %134 = vector.broadcast %133 : vector<1x256xi1> to vector<16x256xi1>
    %135 = vector.broadcast %cst_52 : f32 to vector<16x256xf32>
    %136 = arith.select %134, %130, %135 : vector<16x256xi1>, vector<16x256xf32>
    %c0_53 = arith.constant 0 : index
    %c0_54 = arith.constant 0 : index
    %c0_55 = arith.constant 0 : index
    %137 = vector.load %arg10[%c0_53, %c0_54, %c0_55] : memref<1x16x16xbf16, #tpu.memory_space<vmem>>, vector<1x16x16xbf16>
    %c0_56 = arith.constant 0 : index
    %c0_57 = arith.constant 0 : index
    %138 = vector.load %arg11[%c0_56, %c0_57] : memref<16x1xf32, #tpu.memory_space<vmem>>, vector<16x1xf32>
    %139 = vector.shape_cast %137 : vector<1x16x16xbf16> to vector<16x16xbf16>
    %140 = arith.truncf %136 : vector<16x256xf32> to vector<16x256xbf16>
    %cst_58 = arith.constant dense<0.000000e+00> : vector<16x256xf32>
    %141 = tpu.matmul %139, %140, %cst_58 {dimension_numbers = #tpu.dot_dimension_numbers<[1], [0], [0], [1], [0, 0, 1, 1], [], []>} : vector<16x16xbf16>, vector<16x256xbf16>, vector<16x256xf32> -> vector<16x256xf32>
    %142 = vector.broadcast %138 : vector<16x1xf32> to vector<16x256xf32>
    %143 = arith.addf %141, %142 : vector<16x256xf32>
    %cst_59 = arith.constant 0.000000e+00 : f32
    %144 = vector.broadcast %cst_59 : f32 to vector<16x256xf32>
    %145 = arith.maximumf %143, %144 : vector<16x256xf32>
    %c12_i32_60 = arith.constant 12 : i32
    %146 = vector.broadcast %c12_i32_60 : i32 to vector<1x256xi32>
    %147 = arith.cmpi slt, %2, %146 : vector<1x256xi32>
    %cst_61 = arith.constant 0.000000e+00 : f32
    %148 = vector.shape_cast %147 : vector<1x256xi1> to vector<1x256xi1>
    %149 = vector.broadcast %148 : vector<1x256xi1> to vector<16x256xi1>
    %150 = vector.broadcast %cst_61 : f32 to vector<16x256xf32>
    %151 = arith.select %149, %145, %150 : vector<16x256xi1>, vector<16x256xf32>
    %152 = tpu.iota {dimensions = array<i32: 0>} : vector<16x1xi32>
    %c4_i32 = arith.constant 4 : i32
    %153 = vector.broadcast %c4_i32 : i32 to vector<16x1xi32>
    %154 = arith.cmpi slt, %152, %153 : vector<16x1xi32>
    %cst_62 = arith.constant 0.000000e+00 : f32
    %155 = vector.shape_cast %154 : vector<16x1xi1> to vector<16x1xi1>
    %156 = vector.broadcast %155 : vector<16x1xi1> to vector<16x256xi1>
    %157 = vector.broadcast %cst_62 : f32 to vector<16x256xf32>
    %158 = arith.select %156, %18, %157 : vector<16x256xi1>, vector<16x256xf32>
    %159 = arith.addf %158, %70 : vector<16x256xf32>
    %160 = arith.addf %159, %126 : vector<16x256xf32>
    %161 = arith.addf %160, %151 : vector<16x256xf32>
    %c0_63 = arith.constant 0 : index
    %c0_64 = arith.constant 0 : index
    %162 = vector.load %arg12[%c0_63, %c0_64] : memref<16x256xf32, #tpu.memory_space<vmem>>, vector<16x256xf32>
    tpu.vector_store %arg12[%c0_63, %c0_64], %161 {strides = array<i32>} : memref<16x256xf32, #tpu.memory_space<vmem>>, vector<16x256xf32>,
    return
  }
  func.func @transform_0(%arg0: i32) -> (i32, i32) {
    %c0_i32 = arith.constant 0 : i32
    %c0_i32_0 = arith.constant 0 : i32
    return %c0_i32, %arg0 : i32, i32
  }
  func.func @transform_1(%arg0: i32) -> (i32, i32, i32) {
    %c0_i32 = arith.constant 0 : i32
    %c0_i32_0 = arith.constant 0 : i32
    %c0_i32_1 = arith.constant 0 : i32
    %c0_i32_2 = arith.constant 0 : i32
    return %c0_i32, %c0_i32_0, %c0_i32_1 : i32, i32, i32
  }
  func.func @transform_2(%arg0: i32) -> (i32, i32) {
    %c0_i32 = arith.constant 0 : i32
    %c0_i32_0 = arith.constant 0 : i32
    %c0_i32_1 = arith.constant 0 : i32
    return %c0_i32, %c0_i32_0 : i32, i32
  }
  func.func @transform_3(%arg0: i32) -> (i32, i32, i32) {
    %c0_i32 = arith.constant 0 : i32
    %c0_i32_0 = arith.constant 0 : i32
    %c0_i32_1 = arith.constant 0 : i32
    %c0_i32_2 = arith.constant 0 : i32
    return %c0_i32, %c0_i32_0, %c0_i32_1 : i32, i32, i32
  }
  func.func @transform_4(%arg0: i32) -> (i32, i32) {
    %c0_i32 = arith.constant 0 : i32
    %c0_i32_0 = arith.constant 0 : i32
    %c0_i32_1 = arith.constant 0 : i32
    return %c0_i32, %c0_i32_0 : i32, i32
  }
  func.func @transform_5(%arg0: i32) -> (i32, i32, i32) {
    %c0_i32 = arith.constant 0 : i32
    %c0_i32_0 = arith.constant 0 : i32
    %c0_i32_1 = arith.constant 0 : i32
    %c0_i32_2 = arith.constant 0 : i32
    return %c0_i32, %c0_i32_0, %c0_i32_1 : i32, i32, i32
  }
  func.func @transform_6(%arg0: i32) -> (i32, i32) {
    %c0_i32 = arith.constant 0 : i32
    %c0_i32_0 = arith.constant 0 : i32
    %c0_i32_1 = arith.constant 0 : i32
    return %c0_i32, %c0_i32_0 : i32, i32
  }
  func.func @transform_7(%arg0: i32) -> (i32, i32, i32) {
    %c0_i32 = arith.constant 0 : i32
    %c0_i32_0 = arith.constant 0 : i32
    %c0_i32_1 = arith.constant 0 : i32
    %c0_i32_2 = arith.constant 0 : i32
    return %c0_i32, %c0_i32_0, %c0_i32_1 : i32, i32, i32
  }
  func.func @transform_8(%arg0: i32) -> (i32, i32) {
    %c0_i32 = arith.constant 0 : i32
    %c0_i32_0 = arith.constant 0 : i32
    %c0_i32_1 = arith.constant 0 : i32
    return %c0_i32, %c0_i32_0 : i32, i32
  }
  func.func @transform_9(%arg0: i32) -> (i32, i32, i32) {
    %c0_i32 = arith.constant 0 : i32
    %c0_i32_0 = arith.constant 0 : i32
    %c0_i32_1 = arith.constant 0 : i32
    %c0_i32_2 = arith.constant 0 : i32
    return %c0_i32, %c0_i32_0, %c0_i32_1 : i32, i32, i32
  }
  func.func @transform_10(%arg0: i32) -> (i32, i32) {
    %c0_i32 = arith.constant 0 : i32
    %c0_i32_0 = arith.constant 0 : i32
    %c0_i32_1 = arith.constant 0 : i32
    return %c0_i32, %c0_i32_0 : i32, i32
  }
  func.func @transform_11(%arg0: i32) -> (i32, i32) {
    %c0_i32 = arith.constant 0 : i32
    %c0_i32_0 = arith.constant 0 : i32
    return %c0_i32, %arg0 : i32, i32
  }
}

module attributes {stable_mosaic.version = 11 : i64} {
  func.func @_latent_kernel(%arg0: i32, %arg1: memref<8x64xf32, #tpu.memory_space<vmem>>, %arg2: memref<8x1xf32, #tpu.memory_space<vmem>>, %arg3: memref<6x1xf32, #tpu.memory_space<vmem>>, %arg4: memref<64x16xf32, #tpu.memory_space<vmem>>, %arg5: memref<1x16xf32, #tpu.memory_space<vmem>>, %arg6: memref<16x16xf32, #tpu.memory_space<vmem>>, %arg7: memref<1x16xf32, #tpu.memory_space<vmem>>, %arg8: memref<16x16xf32, #tpu.memory_space<vmem>>, %arg9: memref<1x16xf32, #tpu.memory_space<vmem>>, %arg10: memref<1x16xf32, #tpu.memory_space<vmem>>, %arg11: memref<1x16xf32, #tpu.memory_space<vmem>>, %arg12: memref<16x16xf32, #tpu.memory_space<vmem>>, %arg13: memref<1x16xf32, #tpu.memory_space<vmem>>, %arg14: memref<4x16x16xf32, #tpu.memory_space<vmem>>, %arg15: memref<4x16x16xf32, #tpu.memory_space<vmem>>, %arg16: memref<4x1x16xf32, #tpu.memory_space<vmem>>, %arg17: memref<16x16xf32, #tpu.memory_space<vmem>>, %arg18: memref<1x16xf32, #tpu.memory_space<vmem>>, %arg19: memref<16x16xf32, #tpu.memory_space<vmem>>, %arg20: memref<1x16xf32, #tpu.memory_space<vmem>>, %arg21: memref<16x64xf32, #tpu.memory_space<vmem>>, %arg22: memref<1x64xf32, #tpu.memory_space<vmem>>, %arg23: memref<6x64xf32, #tpu.memory_space<vmem>>) attributes {dimension_semantics = [#tpu.dimension_semantics<arbitrary>], iteration_bounds = array<i64: 1>, scalar_prefetch = 0 : i64, scratch_operands = 0 : i64, tpu.core_type = #tpu.core_type<tc>, window_params = [{pipeline_mode = #tpu.pipeline_mode<synchronous>, transform_indices = @transform_0, window_bounds = array<i64: 8, 64>}, {pipeline_mode = #tpu.pipeline_mode<synchronous>, transform_indices = @transform_1, window_bounds = array<i64: 8, 1>}, {pipeline_mode = #tpu.pipeline_mode<synchronous>, transform_indices = @transform_2, window_bounds = array<i64: 6, 1>}, {pipeline_mode = #tpu.pipeline_mode<synchronous>, transform_indices = @transform_3, window_bounds = array<i64: 64, 16>}, {pipeline_mode = #tpu.pipeline_mode<synchronous>, transform_indices = @transform_4, window_bounds = array<i64: 1, 16>}, {pipeline_mode = #tpu.pipeline_mode<synchronous>, transform_indices = @transform_5, window_bounds = array<i64: 16, 16>}, {pipeline_mode = #tpu.pipeline_mode<synchronous>, transform_indices = @transform_6, window_bounds = array<i64: 1, 16>}, {pipeline_mode = #tpu.pipeline_mode<synchronous>, transform_indices = @transform_7, window_bounds = array<i64: 16, 16>}, {pipeline_mode = #tpu.pipeline_mode<synchronous>, transform_indices = @transform_8, window_bounds = array<i64: 1, 16>}, {pipeline_mode = #tpu.pipeline_mode<synchronous>, transform_indices = @transform_9, window_bounds = array<i64: 1, 16>}, {pipeline_mode = #tpu.pipeline_mode<synchronous>, transform_indices = @transform_10, window_bounds = array<i64: 1, 16>}, {pipeline_mode = #tpu.pipeline_mode<synchronous>, transform_indices = @transform_11, window_bounds = array<i64: 16, 16>}, {pipeline_mode = #tpu.pipeline_mode<synchronous>, transform_indices = @transform_12, window_bounds = array<i64: 1, 16>}, {pipeline_mode = #tpu.pipeline_mode<synchronous>, transform_indices = @transform_13, window_bounds = array<i64: 4, 16, 16>}, {pipeline_mode = #tpu.pipeline_mode<synchronous>, transform_indices = @transform_14, window_bounds = array<i64: 4, 16, 16>}, {pipeline_mode = #tpu.pipeline_mode<synchronous>, transform_indices = @transform_15, window_bounds = array<i64: 4, 1, 16>}, {pipeline_mode = #tpu.pipeline_mode<synchronous>, transform_indices = @transform_16, window_bounds = array<i64: 16, 16>}, {pipeline_mode = #tpu.pipeline_mode<synchronous>, transform_indices = @transform_17, window_bounds = array<i64: 1, 16>}, {pipeline_mode = #tpu.pipeline_mode<synchronous>, transform_indices = @transform_18, window_bounds = array<i64: 16, 16>}, {pipeline_mode = #tpu.pipeline_mode<synchronous>, transform_indices = @transform_19, window_bounds = array<i64: 1, 16>}, {pipeline_mode = #tpu.pipeline_mode<synchronous>, transform_indices = @transform_20, window_bounds = array<i64: 16, 64>}, {pipeline_mode = #tpu.pipeline_mode<synchronous>, transform_indices = @transform_21, window_bounds = array<i64: 1, 64>}, {pipeline_mode = #tpu.pipeline_mode<synchronous>, transform_indices = @transform_22, window_bounds = array<i64: 6, 64>}]} {
    %c0 = arith.constant 0 : index
    %c0_0 = arith.constant 0 : index
    %0 = vector.load %arg1[%c0, %c0_0] : memref<8x64xf32, #tpu.memory_space<vmem>>, vector<8x64xf32>
    %c0_1 = arith.constant 0 : index
    %c0_2 = arith.constant 0 : index
    %1 = vector.load %arg4[%c0_1, %c0_2] : memref<64x16xf32, #tpu.memory_space<vmem>>, vector<64x16xf32>
    %c0_3 = arith.constant 0 : index
    %c0_4 = arith.constant 0 : index
    %2 = vector.load %arg5[%c0_3, %c0_4] : memref<1x16xf32, #tpu.memory_space<vmem>>, vector<1x16xf32>
    %cst = arith.constant dense<0.000000e+00> : vector<8x16xf32>
    %3 = tpu.matmul %0, %1, %cst {dimension_numbers = #tpu.dot_dimension_numbers<[1], [0], [0], [1], [0, 0, 1, 1], [], []>} : vector<8x64xf32>, vector<64x16xf32>, vector<8x16xf32> -> vector<8x16xf32>
    %4 = vector.broadcast %2 : vector<1x16xf32> to vector<8x16xf32>
    %5 = arith.addf %3, %4 : vector<8x16xf32>
    %cst_5 = arith.constant 0.000000e+00 : f32
    %6 = vector.broadcast %cst_5 : f32 to vector<8x16xf32>
    %7 = arith.maximumf %5, %6 : vector<8x16xf32>
    %c0_6 = arith.constant 0 : index
    %c0_7 = arith.constant 0 : index
    %8 = vector.load %arg6[%c0_6, %c0_7] : memref<16x16xf32, #tpu.memory_space<vmem>>, vector<16x16xf32>
    %c0_8 = arith.constant 0 : index
    %c0_9 = arith.constant 0 : index
    %9 = vector.load %arg7[%c0_8, %c0_9] : memref<1x16xf32, #tpu.memory_space<vmem>>, vector<1x16xf32>
    %cst_10 = arith.constant dense<0.000000e+00> : vector<8x16xf32>
    %10 = tpu.matmul %7, %8, %cst_10 {dimension_numbers = #tpu.dot_dimension_numbers<[1], [0], [0], [1], [0, 0, 1, 1], [], []>} : vector<8x16xf32>, vector<16x16xf32>, vector<8x16xf32> -> vector<8x16xf32>
    %11 = vector.broadcast %9 : vector<1x16xf32> to vector<8x16xf32>
    %12 = arith.addf %10, %11 : vector<8x16xf32>
    %cst_11 = arith.constant 0.000000e+00 : f32
    %13 = vector.broadcast %cst_11 : f32 to vector<8x16xf32>
    %14 = arith.maximumf %12, %13 : vector<8x16xf32>
    %c0_12 = arith.constant 0 : index
    %c0_13 = arith.constant 0 : index
    %15 = vector.load %arg8[%c0_12, %c0_13] : memref<16x16xf32, #tpu.memory_space<vmem>>, vector<16x16xf32>
    %c0_14 = arith.constant 0 : index
    %c0_15 = arith.constant 0 : index
    %16 = vector.load %arg9[%c0_14, %c0_15] : memref<1x16xf32, #tpu.memory_space<vmem>>, vector<1x16xf32>
    %cst_16 = arith.constant dense<0.000000e+00> : vector<8x16xf32>
    %17 = tpu.matmul %14, %15, %cst_16 {dimension_numbers = #tpu.dot_dimension_numbers<[1], [0], [0], [1], [0, 0, 1, 1], [], []>} : vector<8x16xf32>, vector<16x16xf32>, vector<8x16xf32> -> vector<8x16xf32>
    %18 = vector.broadcast %16 : vector<1x16xf32> to vector<8x16xf32>
    %19 = arith.addf %17, %18 : vector<8x16xf32>
    %cst_17 = arith.constant 0.000000e+00 : f32
    %20 = vector.broadcast %cst_17 : f32 to vector<8x16xf32>
    %21 = arith.maximumf %19, %20 : vector<8x16xf32>
    %c0_18 = arith.constant 0 : index
    %c0_19 = arith.constant 0 : index
    %22 = vector.load %arg2[%c0_18, %c0_19] : memref<8x1xf32, #tpu.memory_space<vmem>>, vector<8x1xf32>
    %c0_20 = arith.constant 0 : index
    %c0_21 = arith.constant 0 : index
    %23 = vector.load %arg10[%c0_20, %c0_21] : memref<1x16xf32, #tpu.memory_space<vmem>>, vector<1x16xf32>
    %24 = vector.broadcast %22 : vector<8x1xf32> to vector<8x16xf32>
    %25 = vector.broadcast %23 : vector<1x16xf32> to vector<8x16xf32>
    %26 = arith.mulf %24, %25 : vector<8x16xf32>
    %c0_22 = arith.constant 0 : index
    %c0_23 = arith.constant 0 : index
    %27 = vector.load %arg11[%c0_22, %c0_23] : memref<1x16xf32, #tpu.memory_space<vmem>>, vector<1x16xf32>
    %28 = vector.broadcast %27 : vector<1x16xf32> to vector<8x16xf32>
    %29 = arith.addf %26, %28 : vector<8x16xf32>
    %cst_24 = arith.constant 0.000000e+00 : f32
    %30 = vector.broadcast %cst_24 : f32 to vector<8x16xf32>
    %31 = arith.maximumf %29, %30 : vector<8x16xf32>
    %c0_25 = arith.constant 0 : index
    %c0_26 = arith.constant 0 : index
    %32 = vector.load %arg12[%c0_25, %c0_26] : memref<16x16xf32, #tpu.memory_space<vmem>>, vector<16x16xf32>
    %cst_27 = arith.constant dense<0.000000e+00> : vector<8x16xf32>
    %33 = tpu.matmul %31, %32, %cst_27 {dimension_numbers = #tpu.dot_dimension_numbers<[1], [0], [0], [1], [0, 0, 1, 1], [], []>} : vector<8x16xf32>, vector<16x16xf32>, vector<8x16xf32> -> vector<8x16xf32>
    %c0_28 = arith.constant 0 : index
    %c0_29 = arith.constant 0 : index
    %34 = vector.load %arg13[%c0_28, %c0_29] : memref<1x16xf32, #tpu.memory_space<vmem>>, vector<1x16xf32>
    %35 = vector.broadcast %34 : vector<1x16xf32> to vector<8x16xf32>
    %36 = arith.addf %33, %35 : vector<8x16xf32>
    %37 = arith.addf %21, %36 : vector<8x16xf32>
    %c0_30 = arith.constant 0 : index
    %c0_31 = arith.constant 0 : index
    %c0_32 = arith.constant 0 : index
    %38 = vector.load %arg14[%c0_30, %c0_31, %c0_32] : memref<4x16x16xf32, #tpu.memory_space<vmem>>, vector<4x16x16xf32>
    %c0_33 = arith.constant 0 : index
    %c0_34 = arith.constant 0 : index
    %c0_35 = arith.constant 0 : index
    %39 = vector.load %arg15[%c0_33, %c0_34, %c0_35] : memref<4x16x16xf32, #tpu.memory_space<vmem>>, vector<4x16x16xf32>
    %c0_36 = arith.constant 0 : index
    %c0_37 = arith.constant 0 : index
    %c0_38 = arith.constant 0 : index
    %40 = vector.load %arg16[%c0_36, %c0_37, %c0_38] : memref<4x1x16xf32, #tpu.memory_space<vmem>>, vector<4x1x16xf32>
    %41 = vector.extract_strided_slice %38 {offsets = [0, 0, 0], sizes = [1, 16, 16], strides = [1, 1, 1]} : vector<4x16x16xf32> to vector<1x16x16xf32>
    %42 = vector.shape_cast %41 : vector<1x16x16xf32> to vector<16x16xf32>
    %cst_39 = arith.constant dense<0.000000e+00> : vector<8x16xf32>
    %43 = tpu.matmul %37, %42, %cst_39 {dimension_numbers = #tpu.dot_dimension_numbers<[1], [0], [0], [1], [0, 0, 1, 1], [], []>} : vector<8x16xf32>, vector<16x16xf32>, vector<8x16xf32> -> vector<8x16xf32>
    %44 = vector.extract_strided_slice %40 {offsets = [0, 0, 0], sizes = [1, 1, 16], strides = [1, 1, 1]} : vector<4x1x16xf32> to vector<1x1x16xf32>
    %45 = vector.shape_cast %44 : vector<1x1x16xf32> to vector<1x16xf32>
    %46 = vector.broadcast %45 : vector<1x16xf32> to vector<8x16xf32>
    %47 = arith.addf %43, %46 : vector<8x16xf32>
    %48 = vector.extract_strided_slice %38 {offsets = [1, 0, 0], sizes = [1, 16, 16], strides = [1, 1, 1]} : vector<4x16x16xf32> to vector<1x16x16xf32>
    %49 = vector.shape_cast %48 : vector<1x16x16xf32> to vector<16x16xf32>
    %cst_40 = arith.constant dense<0.000000e+00> : vector<8x16xf32>
    %50 = tpu.matmul %37, %49, %cst_40 {dimension_numbers = #tpu.dot_dimension_numbers<[1], [0], [0], [1], [0, 0, 1, 1], [], []>} : vector<8x16xf32>, vector<16x16xf32>, vector<8x16xf32> -> vector<8x16xf32>
    %51 = vector.extract_strided_slice %40 {offsets = [1, 0, 0], sizes = [1, 1, 16], strides = [1, 1, 1]} : vector<4x1x16xf32> to vector<1x1x16xf32>
    %52 = vector.shape_cast %51 : vector<1x1x16xf32> to vector<1x16xf32>
    %53 = vector.broadcast %52 : vector<1x16xf32> to vector<8x16xf32>
    %54 = arith.addf %50, %53 : vector<8x16xf32>
    %55 = vector.extract_strided_slice %38 {offsets = [2, 0, 0], sizes = [1, 16, 16], strides = [1, 1, 1]} : vector<4x16x16xf32> to vector<1x16x16xf32>
    %56 = vector.shape_cast %55 : vector<1x16x16xf32> to vector<16x16xf32>
    %cst_41 = arith.constant dense<0.000000e+00> : vector<8x16xf32>
    %57 = tpu.matmul %37, %56, %cst_41 {dimension_numbers = #tpu.dot_dimension_numbers<[1], [0], [0], [1], [0, 0, 1, 1], [], []>} : vector<8x16xf32>, vector<16x16xf32>, vector<8x16xf32> -> vector<8x16xf32>
    %58 = vector.extract_strided_slice %40 {offsets = [2, 0, 0], sizes = [1, 1, 16], strides = [1, 1, 1]} : vector<4x1x16xf32> to vector<1x1x16xf32>
    %59 = vector.shape_cast %58 : vector<1x1x16xf32> to vector<1x16xf32>
    %60 = vector.broadcast %59 : vector<1x16xf32> to vector<8x16xf32>
    %61 = arith.addf %57, %60 : vector<8x16xf32>
    %62 = vector.extract_strided_slice %38 {offsets = [3, 0, 0], sizes = [1, 16, 16], strides = [1, 1, 1]} : vector<4x16x16xf32> to vector<1x16x16xf32>
    %63 = vector.shape_cast %62 : vector<1x16x16xf32> to vector<16x16xf32>
    %cst_42 = arith.constant dense<0.000000e+00> : vector<8x16xf32>
    %64 = tpu.matmul %37, %63, %cst_42 {dimension_numbers = #tpu.dot_dimension_numbers<[1], [0], [0], [1], [0, 0, 1, 1], [], []>} : vector<8x16xf32>, vector<16x16xf32>, vector<8x16xf32> -> vector<8x16xf32>
    %65 = vector.extract_strided_slice %40 {offsets = [3, 0, 0], sizes = [1, 1, 16], strides = [1, 1, 1]} : vector<4x1x16xf32> to vector<1x1x16xf32>
    %66 = vector.shape_cast %65 : vector<1x1x16xf32> to vector<1x16xf32>
    %67 = vector.broadcast %66 : vector<1x16xf32> to vector<8x16xf32>
    %68 = arith.addf %64, %67 : vector<8x16xf32>
    %cst_43 = arith.constant 0.000000e+00 : f32
    %69 = vector.broadcast %cst_43 : f32 to vector<2x16xf32>
    %cst_44 = arith.constant 0.000000e+00 : f32
    %70 = vector.broadcast %cst_44 : f32 to vector<2x16xf32>
    %71 = vector.extract_strided_slice %47 {offsets = [0, 0], sizes = [2, 16], strides = [1, 1]} : vector<8x16xf32> to vector<2x16xf32>
    %72 = vector.extract_strided_slice %39 {offsets = [0, 0, 0], sizes = [1, 16, 16], strides = [1, 1, 1]} : vector<4x16x16xf32> to vector<1x16x16xf32>
    %73 = vector.shape_cast %72 : vector<1x16x16xf32> to vector<16x16xf32>
    %cst_45 = arith.constant dense<0.000000e+00> : vector<2x16xf32>
    %74 = tpu.matmul %69, %73, %cst_45 {dimension_numbers = #tpu.dot_dimension_numbers<[1], [0], [0], [1], [0, 0, 1, 1], [], []>} : vector<2x16xf32>, vector<16x16xf32>, vector<2x16xf32> -> vector<2x16xf32>
    %75 = arith.addf %71, %74 : vector<2x16xf32>
    %76 = vector.extract_strided_slice %54 {offsets = [0, 0], sizes = [2, 16], strides = [1, 1]} : vector<8x16xf32> to vector<2x16xf32>
    %77 = vector.extract_strided_slice %39 {offsets = [1, 0, 0], sizes = [1, 16, 16], strides = [1, 1, 1]} : vector<4x16x16xf32> to vector<1x16x16xf32>
    %78 = vector.shape_cast %77 : vector<1x16x16xf32> to vector<16x16xf32>
    %cst_46 = arith.constant dense<0.000000e+00> : vector<2x16xf32>
    %79 = tpu.matmul %69, %78, %cst_46 {dimension_numbers = #tpu.dot_dimension_numbers<[1], [0], [0], [1], [0, 0, 1, 1], [], []>} : vector<2x16xf32>, vector<16x16xf32>, vector<2x16xf32> -> vector<2x16xf32>
    %80 = arith.addf %76, %79 : vector<2x16xf32>
    %81 = vector.extract_strided_slice %61 {offsets = [0, 0], sizes = [2, 16], strides = [1, 1]} : vector<8x16xf32> to vector<2x16xf32>
    %82 = vector.extract_strided_slice %39 {offsets = [2, 0, 0], sizes = [1, 16, 16], strides = [1, 1, 1]} : vector<4x16x16xf32> to vector<1x16x16xf32>
    %83 = vector.shape_cast %82 : vector<1x16x16xf32> to vector<16x16xf32>
    %cst_47 = arith.constant dense<0.000000e+00> : vector<2x16xf32>
    %84 = tpu.matmul %69, %83, %cst_47 {dimension_numbers = #tpu.dot_dimension_numbers<[1], [0], [0], [1], [0, 0, 1, 1], [], []>} : vector<2x16xf32>, vector<16x16xf32>, vector<2x16xf32> -> vector<2x16xf32>
    %85 = arith.addf %81, %84 : vector<2x16xf32>
    %86 = vector.extract_strided_slice %68 {offsets = [0, 0], sizes = [2, 16], strides = [1, 1]} : vector<8x16xf32> to vector<2x16xf32>
    %87 = vector.extract_strided_slice %39 {offsets = [3, 0, 0], sizes = [1, 16, 16], strides = [1, 1, 1]} : vector<4x16x16xf32> to vector<1x16x16xf32>
    %88 = vector.shape_cast %87 : vector<1x16x16xf32> to vector<16x16xf32>
    %cst_48 = arith.constant dense<0.000000e+00> : vector<2x16xf32>
    %89 = tpu.matmul %69, %88, %cst_48 {dimension_numbers = #tpu.dot_dimension_numbers<[1], [0], [0], [1], [0, 0, 1, 1], [], []>} : vector<2x16xf32>, vector<16x16xf32>, vector<2x16xf32> -> vector<2x16xf32>
    %90 = arith.addf %86, %89 : vector<2x16xf32>
    %91 = arith.negf %75 : vector<2x16xf32>
    %92 = math.exp %91 : vector<2x16xf32>
    %cst_49 = arith.constant 1.000000e+00 : f32
    %93 = vector.broadcast %cst_49 : f32 to vector<2x16xf32>
    %94 = arith.addf %93, %92 : vector<2x16xf32>
    %95 = arith.divf %93, %94 : vector<2x16xf32>
    %96 = arith.negf %80 : vector<2x16xf32>
    %97 = math.exp %96 : vector<2x16xf32>
    %cst_50 = arith.constant 1.000000e+00 : f32
    %98 = vector.broadcast %cst_50 : f32 to vector<2x16xf32>
    %99 = arith.addf %98, %97 : vector<2x16xf32>
    %100 = arith.divf %98, %99 : vector<2x16xf32>
    %101 = math.tanh %85 : vector<2x16xf32>
    %102 = arith.negf %90 : vector<2x16xf32>
    %103 = math.exp %102 : vector<2x16xf32>
    %cst_51 = arith.constant 1.000000e+00 : f32
    %104 = vector.broadcast %cst_51 : f32 to vector<2x16xf32>
    %105 = arith.addf %104, %103 : vector<2x16xf32>
    %106 = arith.divf %104, %105 : vector<2x16xf32>
    %107 = arith.mulf %100, %70 : vector<2x16xf32>
    %108 = arith.mulf %95, %101 : vector<2x16xf32>
    %109 = arith.addf %107, %108 : vector<2x16xf32>
    %110 = math.tanh %109 : vector<2x16xf32>
    %111 = arith.mulf %106, %110 : vector<2x16xf32>
    %112 = vector.extract_strided_slice %47 {offsets = [2, 0], sizes = [2, 16], strides = [1, 1]} : vector<8x16xf32> to vector<2x16xf32>
    %113 = vector.extract_strided_slice %39 {offsets = [0, 0, 0], sizes = [1, 16, 16], strides = [1, 1, 1]} : vector<4x16x16xf32> to vector<1x16x16xf32>
    %114 = vector.shape_cast %113 : vector<1x16x16xf32> to vector<16x16xf32>
    %cst_52 = arith.constant dense<0.000000e+00> : vector<2x16xf32>
    %115 = tpu.matmul %111, %114, %cst_52 {dimension_numbers = #tpu.dot_dimension_numbers<[1], [0], [0], [1], [0, 0, 1, 1], [], []>} : vector<2x16xf32>, vector<16x16xf32>, vector<2x16xf32> -> vector<2x16xf32>
    %116 = arith.addf %112, %115 : vector<2x16xf32>
    %117 = vector.extract_strided_slice %54 {offsets = [2, 0], sizes = [2, 16], strides = [1, 1]} : vector<8x16xf32> to vector<2x16xf32>
    %118 = vector.extract_strided_slice %39 {offsets = [1, 0, 0], sizes = [1, 16, 16], strides = [1, 1, 1]} : vector<4x16x16xf32> to vector<1x16x16xf32>
    %119 = vector.shape_cast %118 : vector<1x16x16xf32> to vector<16x16xf32>
    %cst_53 = arith.constant dense<0.000000e+00> : vector<2x16xf32>
    %120 = tpu.matmul %111, %119, %cst_53 {dimension_numbers = #tpu.dot_dimension_numbers<[1], [0], [0], [1], [0, 0, 1, 1], [], []>} : vector<2x16xf32>, vector<16x16xf32>, vector<2x16xf32> -> vector<2x16xf32>
    %121 = arith.addf %117, %120 : vector<2x16xf32>
    %122 = vector.extract_strided_slice %61 {offsets = [2, 0], sizes = [2, 16], strides = [1, 1]} : vector<8x16xf32> to vector<2x16xf32>
    %123 = vector.extract_strided_slice %39 {offsets = [2, 0, 0], sizes = [1, 16, 16], strides = [1, 1, 1]} : vector<4x16x16xf32> to vector<1x16x16xf32>
    %124 = vector.shape_cast %123 : vector<1x16x16xf32> to vector<16x16xf32>
    %cst_54 = arith.constant dense<0.000000e+00> : vector<2x16xf32>
    %125 = tpu.matmul %111, %124, %cst_54 {dimension_numbers = #tpu.dot_dimension_numbers<[1], [0], [0], [1], [0, 0, 1, 1], [], []>} : vector<2x16xf32>, vector<16x16xf32>, vector<2x16xf32> -> vector<2x16xf32>
    %126 = arith.addf %122, %125 : vector<2x16xf32>
    %127 = vector.extract_strided_slice %68 {offsets = [2, 0], sizes = [2, 16], strides = [1, 1]} : vector<8x16xf32> to vector<2x16xf32>
    %128 = vector.extract_strided_slice %39 {offsets = [3, 0, 0], sizes = [1, 16, 16], strides = [1, 1, 1]} : vector<4x16x16xf32> to vector<1x16x16xf32>
    %129 = vector.shape_cast %128 : vector<1x16x16xf32> to vector<16x16xf32>
    %cst_55 = arith.constant dense<0.000000e+00> : vector<2x16xf32>
    %130 = tpu.matmul %111, %129, %cst_55 {dimension_numbers = #tpu.dot_dimension_numbers<[1], [0], [0], [1], [0, 0, 1, 1], [], []>} : vector<2x16xf32>, vector<16x16xf32>, vector<2x16xf32> -> vector<2x16xf32>
    %131 = arith.addf %127, %130 : vector<2x16xf32>
    %132 = arith.negf %116 : vector<2x16xf32>
    %133 = math.exp %132 : vector<2x16xf32>
    %cst_56 = arith.constant 1.000000e+00 : f32
    %134 = vector.broadcast %cst_56 : f32 to vector<2x16xf32>
    %135 = arith.addf %134, %133 : vector<2x16xf32>
    %136 = arith.divf %134, %135 : vector<2x16xf32>
    %137 = arith.negf %121 : vector<2x16xf32>
    %138 = math.exp %137 : vector<2x16xf32>
    %cst_57 = arith.constant 1.000000e+00 : f32
    %139 = vector.broadcast %cst_57 : f32 to vector<2x16xf32>
    %140 = arith.addf %139, %138 : vector<2x16xf32>
    %141 = arith.divf %139, %140 : vector<2x16xf32>
    %142 = math.tanh %126 : vector<2x16xf32>
    %143 = arith.negf %131 : vector<2x16xf32>
    %144 = math.exp %143 : vector<2x16xf32>
    %cst_58 = arith.constant 1.000000e+00 : f32
    %145 = vector.broadcast %cst_58 : f32 to vector<2x16xf32>
    %146 = arith.addf %145, %144 : vector<2x16xf32>
    %147 = arith.divf %145, %146 : vector<2x16xf32>
    %148 = arith.mulf %141, %109 : vector<2x16xf32>
    %149 = arith.mulf %136, %142 : vector<2x16xf32>
    %150 = arith.addf %148, %149 : vector<2x16xf32>
    %151 = math.tanh %150 : vector<2x16xf32>
    %152 = arith.mulf %147, %151 : vector<2x16xf32>
    %153 = vector.extract_strided_slice %47 {offsets = [4, 0], sizes = [2, 16], strides = [1, 1]} : vector<8x16xf32> to vector<2x16xf32>
    %154 = vector.extract_strided_slice %39 {offsets = [0, 0, 0], sizes = [1, 16, 16], strides = [1, 1, 1]} : vector<4x16x16xf32> to vector<1x16x16xf32>
    %155 = vector.shape_cast %154 : vector<1x16x16xf32> to vector<16x16xf32>
    %cst_59 = arith.constant dense<0.000000e+00> : vector<2x16xf32>
    %156 = tpu.matmul %152, %155, %cst_59 {dimension_numbers = #tpu.dot_dimension_numbers<[1], [0], [0], [1], [0, 0, 1, 1], [], []>} : vector<2x16xf32>, vector<16x16xf32>, vector<2x16xf32> -> vector<2x16xf32>
    %157 = arith.addf %153, %156 : vector<2x16xf32>
    %158 = vector.extract_strided_slice %54 {offsets = [4, 0], sizes = [2, 16], strides = [1, 1]} : vector<8x16xf32> to vector<2x16xf32>
    %159 = vector.extract_strided_slice %39 {offsets = [1, 0, 0], sizes = [1, 16, 16], strides = [1, 1, 1]} : vector<4x16x16xf32> to vector<1x16x16xf32>
    %160 = vector.shape_cast %159 : vector<1x16x16xf32> to vector<16x16xf32>
    %cst_60 = arith.constant dense<0.000000e+00> : vector<2x16xf32>
    %161 = tpu.matmul %152, %160, %cst_60 {dimension_numbers = #tpu.dot_dimension_numbers<[1], [0], [0], [1], [0, 0, 1, 1], [], []>} : vector<2x16xf32>, vector<16x16xf32>, vector<2x16xf32> -> vector<2x16xf32>
    %162 = arith.addf %158, %161 : vector<2x16xf32>
    %163 = vector.extract_strided_slice %61 {offsets = [4, 0], sizes = [2, 16], strides = [1, 1]} : vector<8x16xf32> to vector<2x16xf32>
    %164 = vector.extract_strided_slice %39 {offsets = [2, 0, 0], sizes = [1, 16, 16], strides = [1, 1, 1]} : vector<4x16x16xf32> to vector<1x16x16xf32>
    %165 = vector.shape_cast %164 : vector<1x16x16xf32> to vector<16x16xf32>
    %cst_61 = arith.constant dense<0.000000e+00> : vector<2x16xf32>
    %166 = tpu.matmul %152, %165, %cst_61 {dimension_numbers = #tpu.dot_dimension_numbers<[1], [0], [0], [1], [0, 0, 1, 1], [], []>} : vector<2x16xf32>, vector<16x16xf32>, vector<2x16xf32> -> vector<2x16xf32>
    %167 = arith.addf %163, %166 : vector<2x16xf32>
    %168 = vector.extract_strided_slice %68 {offsets = [4, 0], sizes = [2, 16], strides = [1, 1]} : vector<8x16xf32> to vector<2x16xf32>
    %169 = vector.extract_strided_slice %39 {offsets = [3, 0, 0], sizes = [1, 16, 16], strides = [1, 1, 1]} : vector<4x16x16xf32> to vector<1x16x16xf32>
    %170 = vector.shape_cast %169 : vector<1x16x16xf32> to vector<16x16xf32>
    %cst_62 = arith.constant dense<0.000000e+00> : vector<2x16xf32>
    %171 = tpu.matmul %152, %170, %cst_62 {dimension_numbers = #tpu.dot_dimension_numbers<[1], [0], [0], [1], [0, 0, 1, 1], [], []>} : vector<2x16xf32>, vector<16x16xf32>, vector<2x16xf32> -> vector<2x16xf32>
    %172 = arith.addf %168, %171 : vector<2x16xf32>
    %173 = arith.negf %157 : vector<2x16xf32>
    %174 = math.exp %173 : vector<2x16xf32>
    %cst_63 = arith.constant 1.000000e+00 : f32
    %175 = vector.broadcast %cst_63 : f32 to vector<2x16xf32>
    %176 = arith.addf %175, %174 : vector<2x16xf32>
    %177 = arith.divf %175, %176 : vector<2x16xf32>
    %178 = arith.negf %162 : vector<2x16xf32>
    %179 = math.exp %178 : vector<2x16xf32>
    %cst_64 = arith.constant 1.000000e+00 : f32
    %180 = vector.broadcast %cst_64 : f32 to vector<2x16xf32>
    %181 = arith.addf %180, %179 : vector<2x16xf32>
    %182 = arith.divf %180, %181 : vector<2x16xf32>
    %183 = math.tanh %167 : vector<2x16xf32>
    %184 = arith.negf %172 : vector<2x16xf32>
    %185 = math.exp %184 : vector<2x16xf32>
    %cst_65 = arith.constant 1.000000e+00 : f32
    %186 = vector.broadcast %cst_65 : f32 to vector<2x16xf32>
    %187 = arith.addf %186, %185 : vector<2x16xf32>
    %188 = arith.divf %186, %187 : vector<2x16xf32>
    %189 = arith.mulf %182, %150 : vector<2x16xf32>
    %190 = arith.mulf %177, %183 : vector<2x16xf32>
    %191 = arith.addf %189, %190 : vector<2x16xf32>
    %192 = math.tanh %191 : vector<2x16xf32>
    %193 = arith.mulf %188, %192 : vector<2x16xf32>
    %194 = vector.extract_strided_slice %47 {offsets = [6, 0], sizes = [2, 16], strides = [1, 1]} : vector<8x16xf32> to vector<2x16xf32>
    %195 = vector.extract_strided_slice %39 {offsets = [0, 0, 0], sizes = [1, 16, 16], strides = [1, 1, 1]} : vector<4x16x16xf32> to vector<1x16x16xf32>
    %196 = vector.shape_cast %195 : vector<1x16x16xf32> to vector<16x16xf32>
    %cst_66 = arith.constant dense<0.000000e+00> : vector<2x16xf32>
    %197 = tpu.matmul %193, %196, %cst_66 {dimension_numbers = #tpu.dot_dimension_numbers<[1], [0], [0], [1], [0, 0, 1, 1], [], []>} : vector<2x16xf32>, vector<16x16xf32>, vector<2x16xf32> -> vector<2x16xf32>
    %198 = arith.addf %194, %197 : vector<2x16xf32>
    %199 = vector.extract_strided_slice %54 {offsets = [6, 0], sizes = [2, 16], strides = [1, 1]} : vector<8x16xf32> to vector<2x16xf32>
    %200 = vector.extract_strided_slice %39 {offsets = [1, 0, 0], sizes = [1, 16, 16], strides = [1, 1, 1]} : vector<4x16x16xf32> to vector<1x16x16xf32>
    %201 = vector.shape_cast %200 : vector<1x16x16xf32> to vector<16x16xf32>
    %cst_67 = arith.constant dense<0.000000e+00> : vector<2x16xf32>
    %202 = tpu.matmul %193, %201, %cst_67 {dimension_numbers = #tpu.dot_dimension_numbers<[1], [0], [0], [1], [0, 0, 1, 1], [], []>} : vector<2x16xf32>, vector<16x16xf32>, vector<2x16xf32> -> vector<2x16xf32>
    %203 = arith.addf %199, %202 : vector<2x16xf32>
    %204 = vector.extract_strided_slice %61 {offsets = [6, 0], sizes = [2, 16], strides = [1, 1]} : vector<8x16xf32> to vector<2x16xf32>
    %205 = vector.extract_strided_slice %39 {offsets = [2, 0, 0], sizes = [1, 16, 16], strides = [1, 1, 1]} : vector<4x16x16xf32> to vector<1x16x16xf32>
    %206 = vector.shape_cast %205 : vector<1x16x16xf32> to vector<16x16xf32>
    %cst_68 = arith.constant dense<0.000000e+00> : vector<2x16xf32>
    %207 = tpu.matmul %193, %206, %cst_68 {dimension_numbers = #tpu.dot_dimension_numbers<[1], [0], [0], [1], [0, 0, 1, 1], [], []>} : vector<2x16xf32>, vector<16x16xf32>, vector<2x16xf32> -> vector<2x16xf32>
    %208 = arith.addf %204, %207 : vector<2x16xf32>
    %209 = vector.extract_strided_slice %68 {offsets = [6, 0], sizes = [2, 16], strides = [1, 1]} : vector<8x16xf32> to vector<2x16xf32>
    %210 = vector.extract_strided_slice %39 {offsets = [3, 0, 0], sizes = [1, 16, 16], strides = [1, 1, 1]} : vector<4x16x16xf32> to vector<1x16x16xf32>
    %211 = vector.shape_cast %210 : vector<1x16x16xf32> to vector<16x16xf32>
    %cst_69 = arith.constant dense<0.000000e+00> : vector<2x16xf32>
    %212 = tpu.matmul %193, %211, %cst_69 {dimension_numbers = #tpu.dot_dimension_numbers<[1], [0], [0], [1], [0, 0, 1, 1], [], []>} : vector<2x16xf32>, vector<16x16xf32>, vector<2x16xf32> -> vector<2x16xf32>
    %213 = arith.addf %209, %212 : vector<2x16xf32>
    %214 = arith.negf %198 : vector<2x16xf32>
    %215 = math.exp %214 : vector<2x16xf32>
    %cst_70 = arith.constant 1.000000e+00 : f32
    %216 = vector.broadcast %cst_70 : f32 to vector<2x16xf32>
    %217 = arith.addf %216, %215 : vector<2x16xf32>
    %218 = arith.divf %216, %217 : vector<2x16xf32>
    %219 = arith.negf %203 : vector<2x16xf32>
    %220 = math.exp %219 : vector<2x16xf32>
    %cst_71 = arith.constant 1.000000e+00 : f32
    %221 = vector.broadcast %cst_71 : f32 to vector<2x16xf32>
    %222 = arith.addf %221, %220 : vector<2x16xf32>
    %223 = arith.divf %221, %222 : vector<2x16xf32>
    %224 = math.tanh %208 : vector<2x16xf32>
    %225 = arith.negf %213 : vector<2x16xf32>
    %226 = math.exp %225 : vector<2x16xf32>
    %cst_72 = arith.constant 1.000000e+00 : f32
    %227 = vector.broadcast %cst_72 : f32 to vector<2x16xf32>
    %228 = arith.addf %227, %226 : vector<2x16xf32>
    %229 = arith.divf %227, %228 : vector<2x16xf32>
    %230 = arith.mulf %223, %191 : vector<2x16xf32>
    %231 = arith.mulf %218, %224 : vector<2x16xf32>
    %232 = arith.addf %230, %231 : vector<2x16xf32>
    %233 = math.tanh %232 : vector<2x16xf32>
    %234 = arith.mulf %229, %233 : vector<2x16xf32>
    %235 = tpu.iota {dimensions = array<i32: 0>} : vector<6x1xi32>
    %cst_73 = arith.constant 0.000000e+00 : f32
    %236 = vector.broadcast %cst_73 : f32 to vector<6x16xf32>
    %c0_i32 = arith.constant 0 : i32
    %237 = vector.broadcast %c0_i32 : i32 to vector<6x1xi32>
    %238 = arith.cmpi sge, %235, %237 : vector<6x1xi32>
    %c3_i32 = arith.constant 3 : i32
    %239 = vector.broadcast %c3_i32 : i32 to vector<6x1xi32>
    %240 = arith.cmpi slt, %235, %239 : vector<6x1xi32>
    %241 = arith.andi %238, %240 : vector<6x1xi1>
    %242 = vector.extract_strided_slice %234 {offsets = [0, 0], sizes = [1, 16], strides = [1, 1]} : vector<2x16xf32> to vector<1x16xf32>
    %243 = vector.shape_cast %242 : vector<1x16xf32> to vector<1x16xf32>
    %244 = vector.broadcast %243 : vector<1x16xf32> to vector<6x16xf32>
    %cst_74 = arith.constant 0.000000e+00 : f32
    %245 = vector.shape_cast %241 : vector<6x1xi1> to vector<6x1xi1>
    %246 = vector.broadcast %245 : vector<6x1xi1> to vector<6x16xi1>
    %247 = vector.broadcast %cst_74 : f32 to vector<6x16xf32>
    %248 = arith.select %246, %244, %247 : vector<6x16xi1>, vector<6x16xf32>
    %249 = arith.addf %236, %248 : vector<6x16xf32>
    %c3_i32_75 = arith.constant 3 : i32
    %250 = vector.broadcast %c3_i32_75 : i32 to vector<6x1xi32>
    %251 = arith.cmpi sge, %235, %250 : vector<6x1xi32>
    %c6_i32 = arith.constant 6 : i32
    %252 = vector.broadcast %c6_i32 : i32 to vector<6x1xi32>
    %253 = arith.cmpi slt, %235, %252 : vector<6x1xi32>
    %254 = arith.andi %251, %253 : vector<6x1xi1>
    %255 = vector.extract_strided_slice %234 {offsets = [1, 0], sizes = [1, 16], strides = [1, 1]} : vector<2x16xf32> to vector<1x16xf32>
    %256 = vector.shape_cast %255 : vector<1x16xf32> to vector<1x16xf32>
    %257 = vector.broadcast %256 : vector<1x16xf32> to vector<6x16xf32>
    %cst_76 = arith.constant 0.000000e+00 : f32
    %258 = vector.shape_cast %254 : vector<6x1xi1> to vector<6x1xi1>
    %259 = vector.broadcast %258 : vector<6x1xi1> to vector<6x16xi1>
    %260 = vector.broadcast %cst_76 : f32 to vector<6x16xf32>
    %261 = arith.select %259, %257, %260 : vector<6x16xi1>, vector<6x16xf32>
    %262 = arith.addf %249, %261 : vector<6x16xf32>
    %c0_77 = arith.constant 0 : index
    %c0_78 = arith.constant 0 : index
    %263 = vector.load %arg3[%c0_77, %c0_78] : memref<6x1xf32, #tpu.memory_space<vmem>>, vector<6x1xf32>
    %c0_79 = arith.constant 0 : index
    %c0_80 = arith.constant 0 : index
    %264 = vector.load %arg10[%c0_79, %c0_80] : memref<1x16xf32, #tpu.memory_space<vmem>>, vector<1x16xf32>
    %265 = vector.broadcast %263 : vector<6x1xf32> to vector<6x16xf32>
    %266 = vector.broadcast %264 : vector<1x16xf32> to vector<6x16xf32>
    %267 = arith.mulf %265, %266 : vector<6x16xf32>
    %c0_81 = arith.constant 0 : index
    %c0_82 = arith.constant 0 : index
    %268 = vector.load %arg11[%c0_81, %c0_82] : memref<1x16xf32, #tpu.memory_space<vmem>>, vector<1x16xf32>
    %269 = vector.broadcast %268 : vector<1x16xf32> to vector<6x16xf32>
    %270 = arith.addf %267, %269 : vector<6x16xf32>
    %cst_83 = arith.constant 0.000000e+00 : f32
    %271 = vector.broadcast %cst_83 : f32 to vector<6x16xf32>
    %272 = arith.maximumf %270, %271 : vector<6x16xf32>
    %c0_84 = arith.constant 0 : index
    %c0_85 = arith.constant 0 : index
    %273 = vector.load %arg12[%c0_84, %c0_85] : memref<16x16xf32, #tpu.memory_space<vmem>>, vector<16x16xf32>
    %cst_86 = arith.constant dense<0.000000e+00> : vector<6x16xf32>
    %274 = tpu.matmul %272, %273, %cst_86 {dimension_numbers = #tpu.dot_dimension_numbers<[1], [0], [0], [1], [0, 0, 1, 1], [], []>} : vector<6x16xf32>, vector<16x16xf32>, vector<6x16xf32> -> vector<6x16xf32>
    %c0_87 = arith.constant 0 : index
    %c0_88 = arith.constant 0 : index
    %275 = vector.load %arg13[%c0_87, %c0_88] : memref<1x16xf32, #tpu.memory_space<vmem>>, vector<1x16xf32>
    %276 = vector.broadcast %275 : vector<1x16xf32> to vector<6x16xf32>
    %277 = arith.addf %274, %276 : vector<6x16xf32>
    %278 = arith.addf %262, %277 : vector<6x16xf32>
    %c0_89 = arith.constant 0 : index
    %c0_90 = arith.constant 0 : index
    %279 = vector.load %arg17[%c0_89, %c0_90] : memref<16x16xf32, #tpu.memory_space<vmem>>, vector<16x16xf32>
    %c0_91 = arith.constant 0 : index
    %c0_92 = arith.constant 0 : index
    %280 = vector.load %arg18[%c0_91, %c0_92] : memref<1x16xf32, #tpu.memory_space<vmem>>, vector<1x16xf32>
    %cst_93 = arith.constant dense<0.000000e+00> : vector<6x16xf32>
    %281 = tpu.matmul %278, %279, %cst_93 {dimension_numbers = #tpu.dot_dimension_numbers<[1], [0], [0], [1], [0, 0, 1, 1], [], []>} : vector<6x16xf32>, vector<16x16xf32>, vector<6x16xf32> -> vector<6x16xf32>
    %282 = vector.broadcast %280 : vector<1x16xf32> to vector<6x16xf32>
    %283 = arith.addf %281, %282 : vector<6x16xf32>
    %cst_94 = arith.constant 0.000000e+00 : f32
    %284 = vector.broadcast %cst_94 : f32 to vector<6x16xf32>
    %285 = arith.maximumf %283, %284 : vector<6x16xf32>
    %c0_95 = arith.constant 0 : index
    %c0_96 = arith.constant 0 : index
    %286 = vector.load %arg19[%c0_95, %c0_96] : memref<16x16xf32, #tpu.memory_space<vmem>>, vector<16x16xf32>
    %c0_97 = arith.constant 0 : index
    %c0_98 = arith.constant 0 : index
    %287 = vector.load %arg20[%c0_97, %c0_98] : memref<1x16xf32, #tpu.memory_space<vmem>>, vector<1x16xf32>
    %cst_99 = arith.constant dense<0.000000e+00> : vector<6x16xf32>
    %288 = tpu.matmul %285, %286, %cst_99 {dimension_numbers = #tpu.dot_dimension_numbers<[1], [0], [0], [1], [0, 0, 1, 1], [], []>} : vector<6x16xf32>, vector<16x16xf32>, vector<6x16xf32> -> vector<6x16xf32>
    %289 = vector.broadcast %287 : vector<1x16xf32> to vector<6x16xf32>
    %290 = arith.addf %288, %289 : vector<6x16xf32>
    %cst_100 = arith.constant 0.000000e+00 : f32
    %291 = vector.broadcast %cst_100 : f32 to vector<6x16xf32>
    %292 = arith.maximumf %290, %291 : vector<6x16xf32>
    %c0_101 = arith.constant 0 : index
    %c0_102 = arith.constant 0 : index
    %293 = vector.load %arg21[%c0_101, %c0_102] : memref<16x64xf32, #tpu.memory_space<vmem>>, vector<16x64xf32>
    %c0_103 = arith.constant 0 : index
    %c0_104 = arith.constant 0 : index
    %294 = vector.load %arg22[%c0_103, %c0_104] : memref<1x64xf32, #tpu.memory_space<vmem>>, vector<1x64xf32>
    %cst_105 = arith.constant dense<0.000000e+00> : vector<6x64xf32>
    %295 = tpu.matmul %292, %293, %cst_105 {dimension_numbers = #tpu.dot_dimension_numbers<[1], [0], [0], [1], [0, 0, 1, 1], [], []>} : vector<6x16xf32>, vector<16x64xf32>, vector<6x64xf32> -> vector<6x64xf32>
    %296 = vector.broadcast %294 : vector<1x64xf32> to vector<6x64xf32>
    %297 = arith.addf %295, %296 : vector<6x64xf32>
    %cst_106 = arith.constant 0.000000e+00 : f32
    %298 = vector.broadcast %cst_106 : f32 to vector<6x64xf32>
    %299 = arith.maximumf %297, %298 : vector<6x64xf32>
    %c0_107 = arith.constant 0 : index
    %c0_108 = arith.constant 0 : index
    %300 = vector.load %arg23[%c0_107, %c0_108] : memref<6x64xf32, #tpu.memory_space<vmem>>, vector<6x64xf32>
    tpu.vector_store %arg23[%c0_107, %c0_108], %299 {strides = array<i32>} : memref<6x64xf32, #tpu.memory_space<vmem>>, vector<6x64xf32>,
    return
  }
  func.func @transform_0(%arg0: i32) -> (i32, i32) {
    %c0_i32 = arith.constant 0 : i32
    %c0_i32_0 = arith.constant 0 : i32
    %c0_i32_1 = arith.constant 0 : i32
    return %c0_i32, %c0_i32_0 : i32, i32
  }
  func.func @transform_1(%arg0: i32) -> (i32, i32) {
    %c0_i32 = arith.constant 0 : i32
    %c0_i32_0 = arith.constant 0 : i32
    %c0_i32_1 = arith.constant 0 : i32
    return %c0_i32, %c0_i32_0 : i32, i32
  }
  func.func @transform_2(%arg0: i32) -> (i32, i32) {
    %c0_i32 = arith.constant 0 : i32
    %c0_i32_0 = arith.constant 0 : i32
    %c0_i32_1 = arith.constant 0 : i32
    return %c0_i32, %c0_i32_0 : i32, i32
  }
  func.func @transform_3(%arg0: i32) -> (i32, i32) {
    %c0_i32 = arith.constant 0 : i32
    %c0_i32_0 = arith.constant 0 : i32
    %c0_i32_1 = arith.constant 0 : i32
    return %c0_i32, %c0_i32_0 : i32, i32
  }
  func.func @transform_4(%arg0: i32) -> (i32, i32) {
    %c0_i32 = arith.constant 0 : i32
    %c0_i32_0 = arith.constant 0 : i32
    %c0_i32_1 = arith.constant 0 : i32
    return %c0_i32, %c0_i32_0 : i32, i32
  }
  func.func @transform_5(%arg0: i32) -> (i32, i32) {
    %c0_i32 = arith.constant 0 : i32
    %c0_i32_0 = arith.constant 0 : i32
    %c0_i32_1 = arith.constant 0 : i32
    return %c0_i32, %c0_i32_0 : i32, i32
  }
  func.func @transform_6(%arg0: i32) -> (i32, i32) {
    %c0_i32 = arith.constant 0 : i32
    %c0_i32_0 = arith.constant 0 : i32
    %c0_i32_1 = arith.constant 0 : i32
    return %c0_i32, %c0_i32_0 : i32, i32
  }
  func.func @transform_7(%arg0: i32) -> (i32, i32) {
    %c0_i32 = arith.constant 0 : i32
    %c0_i32_0 = arith.constant 0 : i32
    %c0_i32_1 = arith.constant 0 : i32
    return %c0_i32, %c0_i32_0 : i32, i32
  }
  func.func @transform_8(%arg0: i32) -> (i32, i32) {
    %c0_i32 = arith.constant 0 : i32
    %c0_i32_0 = arith.constant 0 : i32
    %c0_i32_1 = arith.constant 0 : i32
    return %c0_i32, %c0_i32_0 : i32, i32
  }
  func.func @transform_9(%arg0: i32) -> (i32, i32) {
    %c0_i32 = arith.constant 0 : i32
    %c0_i32_0 = arith.constant 0 : i32
    %c0_i32_1 = arith.constant 0 : i32
    return %c0_i32, %c0_i32_0 : i32, i32
  }
  func.func @transform_10(%arg0: i32) -> (i32, i32) {
    %c0_i32 = arith.constant 0 : i32
    %c0_i32_0 = arith.constant 0 : i32
    %c0_i32_1 = arith.constant 0 : i32
    return %c0_i32, %c0_i32_0 : i32, i32
  }
  func.func @transform_11(%arg0: i32) -> (i32, i32) {
    %c0_i32 = arith.constant 0 : i32
    %c0_i32_0 = arith.constant 0 : i32
    %c0_i32_1 = arith.constant 0 : i32
    return %c0_i32, %c0_i32_0 : i32, i32
  }
  func.func @transform_12(%arg0: i32) -> (i32, i32) {
    %c0_i32 = arith.constant 0 : i32
    %c0_i32_0 = arith.constant 0 : i32
    %c0_i32_1 = arith.constant 0 : i32
    return %c0_i32, %c0_i32_0 : i32, i32
  }
  func.func @transform_13(%arg0: i32) -> (i32, i32, i32) {
    %c0_i32 = arith.constant 0 : i32
    %c0_i32_0 = arith.constant 0 : i32
    %c0_i32_1 = arith.constant 0 : i32
    %c0_i32_2 = arith.constant 0 : i32
    return %c0_i32, %c0_i32_0, %c0_i32_1 : i32, i32, i32
  }
  func.func @transform_14(%arg0: i32) -> (i32, i32, i32) {
    %c0_i32 = arith.constant 0 : i32
    %c0_i32_0 = arith.constant 0 : i32
    %c0_i32_1 = arith.constant 0 : i32
    %c0_i32_2 = arith.constant 0 : i32
    return %c0_i32, %c0_i32_0, %c0_i32_1 : i32, i32, i32
  }
  func.func @transform_15(%arg0: i32) -> (i32, i32, i32) {
    %c0_i32 = arith.constant 0 : i32
    %c0_i32_0 = arith.constant 0 : i32
    %c0_i32_1 = arith.constant 0 : i32
    %c0_i32_2 = arith.constant 0 : i32
    return %c0_i32, %c0_i32_0, %c0_i32_1 : i32, i32, i32
  }
  func.func @transform_16(%arg0: i32) -> (i32, i32) {
    %c0_i32 = arith.constant 0 : i32
    %c0_i32_0 = arith.constant 0 : i32
    %c0_i32_1 = arith.constant 0 : i32
    return %c0_i32, %c0_i32_0 : i32, i32
  }
  func.func @transform_17(%arg0: i32) -> (i32, i32) {
    %c0_i32 = arith.constant 0 : i32
    %c0_i32_0 = arith.constant 0 : i32
    %c0_i32_1 = arith.constant 0 : i32
    return %c0_i32, %c0_i32_0 : i32, i32
  }
  func.func @transform_18(%arg0: i32) -> (i32, i32) {
    %c0_i32 = arith.constant 0 : i32
    %c0_i32_0 = arith.constant 0 : i32
    %c0_i32_1 = arith.constant 0 : i32
    return %c0_i32, %c0_i32_0 : i32, i32
  }
  func.func @transform_19(%arg0: i32) -> (i32, i32) {
    %c0_i32 = arith.constant 0 : i32
    %c0_i32_0 = arith.constant 0 : i32
    %c0_i32_1 = arith.constant 0 : i32
    return %c0_i32, %c0_i32_0 : i32, i32
  }
  func.func @transform_20(%arg0: i32) -> (i32, i32) {
    %c0_i32 = arith.constant 0 : i32
    %c0_i32_0 = arith.constant 0 : i32
    %c0_i32_1 = arith.constant 0 : i32
    return %c0_i32, %c0_i32_0 : i32, i32
  }
  func.func @transform_21(%arg0: i32) -> (i32, i32) {
    %c0_i32 = arith.constant 0 : i32
    %c0_i32_0 = arith.constant 0 : i32
    %c0_i32_1 = arith.constant 0 : i32
    return %c0_i32, %c0_i32_0 : i32, i32
  }
  func.func @transform_22(%arg0: i32) -> (i32, i32) {
    %c0_i32 = arith.constant 0 : i32
    %c0_i32_0 = arith.constant 0 : i32
    %c0_i32_1 = arith.constant 0 : i32
    return %c0_i32, %c0_i32_0 : i32, i32
  }
}

module attributes {stable_mosaic.version = 11 : i64} {
  func.func @_block_b_kernel(%arg0: i32, %arg1: memref<16x128xf32, #tpu.memory_space<vmem>>, %arg2: memref<1x16x16xbf16, #tpu.memory_space<vmem>>, %arg3: memref<16x1xf32, #tpu.memory_space<vmem>>, %arg4: memref<7x16x16xbf16, #tpu.memory_space<vmem>>, %arg5: memref<16x1xf32, #tpu.memory_space<vmem>>, %arg6: memref<3x8x16xbf16, #tpu.memory_space<vmem>>, %arg7: memref<8x1xf32, #tpu.memory_space<vmem>>, %arg8: memref<3x16x8xbf16, #tpu.memory_space<vmem>>, %arg9: memref<16x1xf32, #tpu.memory_space<vmem>>, %arg10: memref<1x16x16xbf16, #tpu.memory_space<vmem>>, %arg11: memref<16x1xf32, #tpu.memory_space<vmem>>, %arg12: memref<16x128xf32, #tpu.memory_space<vmem>>) attributes {dimension_semantics = [#tpu.dimension_semantics<parallel>], iteration_bounds = array<i64: 3>, scalar_prefetch = 0 : i64, scratch_operands = 0 : i64, tpu.core_type = #tpu.core_type<tc>, window_params = [{transform_indices = @transform_0, window_bounds = array<i64: 16, 128>}, {pipeline_mode = #tpu.pipeline_mode<synchronous>, transform_indices = @transform_1, window_bounds = array<i64: 1, 16, 16>}, {pipeline_mode = #tpu.pipeline_mode<synchronous>, transform_indices = @transform_2, window_bounds = array<i64: 16, 1>}, {pipeline_mode = #tpu.pipeline_mode<synchronous>, transform_indices = @transform_3, window_bounds = array<i64: 7, 16, 16>}, {pipeline_mode = #tpu.pipeline_mode<synchronous>, transform_indices = @transform_4, window_bounds = array<i64: 16, 1>}, {pipeline_mode = #tpu.pipeline_mode<synchronous>, transform_indices = @transform_5, window_bounds = array<i64: 3, 8, 16>}, {pipeline_mode = #tpu.pipeline_mode<synchronous>, transform_indices = @transform_6, window_bounds = array<i64: 8, 1>}, {pipeline_mode = #tpu.pipeline_mode<synchronous>, transform_indices = @transform_7, window_bounds = array<i64: 3, 16, 8>}, {pipeline_mode = #tpu.pipeline_mode<synchronous>, transform_indices = @transform_8, window_bounds = array<i64: 16, 1>}, {pipeline_mode = #tpu.pipeline_mode<synchronous>, transform_indices = @transform_9, window_bounds = array<i64: 1, 16, 16>}, {pipeline_mode = #tpu.pipeline_mode<synchronous>, transform_indices = @transform_10, window_bounds = array<i64: 16, 1>}, {transform_indices = @transform_11, window_bounds = array<i64: 16, 128>}]} {
    %0 = tpu.iota {dimensions = array<i32: 1>} : vector<1x128xi32>
    %c63_i32 = arith.constant 63 : i32
    %1 = vector.broadcast %c63_i32 : i32 to vector<1x128xi32>
    %2 = arith.andi %0, %1 : vector<1x128xi32>
    %c0 = arith.constant 0 : index
    %c0_0 = arith.constant 0 : index
    %3 = vector.load %arg1[%c0, %c0_0] : memref<16x128xf32, #tpu.memory_space<vmem>>, vector<16x128xf32>
    %c0_1 = arith.constant 0 : index
    %c0_2 = arith.constant 0 : index
    %c0_3 = arith.constant 0 : index
    %4 = vector.load %arg2[%c0_1, %c0_2, %c0_3] : memref<1x16x16xbf16, #tpu.memory_space<vmem>>, vector<1x16x16xbf16>
    %c0_4 = arith.constant 0 : index
    %c0_5 = arith.constant 0 : index
    %5 = vector.load %arg3[%c0_4, %c0_5] : memref<16x1xf32, #tpu.memory_space<vmem>>, vector<16x1xf32>
    %6 = vector.shape_cast %4 : vector<1x16x16xbf16> to vector<16x16xbf16>
    %7 = arith.truncf %3 : vector<16x128xf32> to vector<16x128xbf16>
    %cst = arith.constant dense<0.000000e+00> : vector<16x128xf32>
    %8 = tpu.matmul %6, %7, %cst {dimension_numbers = #tpu.dot_dimension_numbers<[1], [0], [0], [1], [0, 0, 1, 1], [], []>} : vector<16x16xbf16>, vector<16x128xbf16>, vector<16x128xf32> -> vector<16x128xf32>
    %9 = vector.broadcast %5 : vector<16x1xf32> to vector<16x128xf32>
    %10 = arith.addf %8, %9 : vector<16x128xf32>
    %cst_6 = arith.constant 0.000000e+00 : f32
    %11 = vector.broadcast %cst_6 : f32 to vector<16x128xf32>
    %12 = arith.maximumf %10, %11 : vector<16x128xf32>
    %c12_i32 = arith.constant 12 : i32
    %13 = vector.broadcast %c12_i32 : i32 to vector<1x128xi32>
    %14 = arith.cmpi slt, %2, %13 : vector<1x128xi32>
    %cst_7 = arith.constant 0.000000e+00 : f32
    %15 = vector.shape_cast %14 : vector<1x128xi1> to vector<1x128xi1>
    %16 = vector.broadcast %15 : vector<1x128xi1> to vector<16x128xi1>
    %17 = vector.broadcast %cst_7 : f32 to vector<16x128xf32>
    %18 = arith.select %16, %12, %17 : vector<16x128xi1>, vector<16x128xf32>
    %c0_8 = arith.constant 0 : index
    %c0_9 = arith.constant 0 : index
    %c0_10 = arith.constant 0 : index
    %19 = vector.load %arg4[%c0_8, %c0_9, %c0_10] : memref<7x16x16xbf16, #tpu.memory_space<vmem>>, vector<7x16x16xbf16>
    %c0_11 = arith.constant 0 : index
    %c0_12 = arith.constant 0 : index
    %20 = vector.load %arg5[%c0_11, %c0_12] : memref<16x1xf32, #tpu.memory_space<vmem>>, vector<16x1xf32>
    %c3_i32 = arith.constant 3 : i32
    %21 = tpu.dynamic_rotate %18 by %c3_i32 dim 1 : vector<16x128xf32>, i32 -> vector<16x128xf32>
    %22 = vector.extract_strided_slice %19 {offsets = [0, 0, 0], sizes = [1, 16, 16], strides = [1, 1, 1]} : vector<7x16x16xbf16> to vector<1x16x16xbf16>
    %23 = vector.shape_cast %22 : vector<1x16x16xbf16> to vector<16x16xbf16>
    %24 = arith.truncf %21 : vector<16x128xf32> to vector<16x128xbf16>
    %cst_13 = arith.constant dense<0.000000e+00> : vector<16x128xf32>
    %25 = tpu.matmul %23, %24, %cst_13 {dimension_numbers = #tpu.dot_dimension_numbers<[1], [0], [0], [1], [0, 0, 1, 1], [], []>} : vector<16x16xbf16>, vector<16x128xbf16>, vector<16x128xf32> -> vector<16x128xf32>
    %c2_i32 = arith.constant 2 : i32
    %26 = tpu.dynamic_rotate %18 by %c2_i32 dim 1 : vector<16x128xf32>, i32 -> vector<16x128xf32>
    %27 = vector.extract_strided_slice %19 {offsets = [1, 0, 0], sizes = [1, 16, 16], strides = [1, 1, 1]} : vector<7x16x16xbf16> to vector<1x16x16xbf16>
    %28 = vector.shape_cast %27 : vector<1x16x16xbf16> to vector<16x16xbf16>
    %29 = arith.truncf %26 : vector<16x128xf32> to vector<16x128xbf16>
    %cst_14 = arith.constant dense<0.000000e+00> : vector<16x128xf32>
    %30 = tpu.matmul %28, %29, %cst_14 {dimension_numbers = #tpu.dot_dimension_numbers<[1], [0], [0], [1], [0, 0, 1, 1], [], []>} : vector<16x16xbf16>, vector<16x128xbf16>, vector<16x128xf32> -> vector<16x128xf32>
    %31 = arith.addf %25, %30 : vector<16x128xf32>
    %c1_i32 = arith.constant 1 : i32
    %32 = tpu.dynamic_rotate %18 by %c1_i32 dim 1 : vector<16x128xf32>, i32 -> vector<16x128xf32>
    %33 = vector.extract_strided_slice %19 {offsets = [2, 0, 0], sizes = [1, 16, 16], strides = [1, 1, 1]} : vector<7x16x16xbf16> to vector<1x16x16xbf16>
    %34 = vector.shape_cast %33 : vector<1x16x16xbf16> to vector<16x16xbf16>
    %35 = arith.truncf %32 : vector<16x128xf32> to vector<16x128xbf16>
    %cst_15 = arith.constant dense<0.000000e+00> : vector<16x128xf32>
    %36 = tpu.matmul %34, %35, %cst_15 {dimension_numbers = #tpu.dot_dimension_numbers<[1], [0], [0], [1], [0, 0, 1, 1], [], []>} : vector<16x16xbf16>, vector<16x128xbf16>, vector<16x128xf32> -> vector<16x128xf32>
    %37 = arith.addf %31, %36 : vector<16x128xf32>
    %38 = vector.extract_strided_slice %19 {offsets = [3, 0, 0], sizes = [1, 16, 16], strides = [1, 1, 1]} : vector<7x16x16xbf16> to vector<1x16x16xbf16>
    %39 = vector.shape_cast %38 : vector<1x16x16xbf16> to vector<16x16xbf16>
    %40 = arith.truncf %18 : vector<16x128xf32> to vector<16x128xbf16>
    %cst_16 = arith.constant dense<0.000000e+00> : vector<16x128xf32>
    %41 = tpu.matmul %39, %40, %cst_16 {dimension_numbers = #tpu.dot_dimension_numbers<[1], [0], [0], [1], [0, 0, 1, 1], [], []>} : vector<16x16xbf16>, vector<16x128xbf16>, vector<16x128xf32> -> vector<16x128xf32>
    %42 = arith.addf %37, %41 : vector<16x128xf32>
    %c127_i32 = arith.constant 127 : i32
    %43 = tpu.dynamic_rotate %18 by %c127_i32 dim 1 : vector<16x128xf32>, i32 -> vector<16x128xf32>
    %44 = vector.extract_strided_slice %19 {offsets = [4, 0, 0], sizes = [1, 16, 16], strides = [1, 1, 1]} : vector<7x16x16xbf16> to vector<1x16x16xbf16>
    %45 = vector.shape_cast %44 : vector<1x16x16xbf16> to vector<16x16xbf16>
    %46 = arith.truncf %43 : vector<16x128xf32> to vector<16x128xbf16>
    %cst_17 = arith.constant dense<0.000000e+00> : vector<16x128xf32>
    %47 = tpu.matmul %45, %46, %cst_17 {dimension_numbers = #tpu.dot_dimension_numbers<[1], [0], [0], [1], [0, 0, 1, 1], [], []>} : vector<16x16xbf16>, vector<16x128xbf16>, vector<16x128xf32> -> vector<16x128xf32>
    %48 = arith.addf %42, %47 : vector<16x128xf32>
    %c126_i32 = arith.constant 126 : i32
    %49 = tpu.dynamic_rotate %18 by %c126_i32 dim 1 : vector<16x128xf32>, i32 -> vector<16x128xf32>
    %50 = vector.extract_strided_slice %19 {offsets = [5, 0, 0], sizes = [1, 16, 16], strides = [1, 1, 1]} : vector<7x16x16xbf16> to vector<1x16x16xbf16>
    %51 = vector.shape_cast %50 : vector<1x16x16xbf16> to vector<16x16xbf16>
    %52 = arith.truncf %49 : vector<16x128xf32> to vector<16x128xbf16>
    %cst_18 = arith.constant dense<0.000000e+00> : vector<16x128xf32>
    %53 = tpu.matmul %51, %52, %cst_18 {dimension_numbers = #tpu.dot_dimension_numbers<[1], [0], [0], [1], [0, 0, 1, 1], [], []>} : vector<16x16xbf16>, vector<16x128xbf16>, vector<16x128xf32> -> vector<16x128xf32>
    %54 = arith.addf %48, %53 : vector<16x128xf32>
    %c125_i32 = arith.constant 125 : i32
    %55 = tpu.dynamic_rotate %18 by %c125_i32 dim 1 : vector<16x128xf32>, i32 -> vector<16x128xf32>
    %56 = vector.extract_strided_slice %19 {offsets = [6, 0, 0], sizes = [1, 16, 16], strides = [1, 1, 1]} : vector<7x16x16xbf16> to vector<1x16x16xbf16>
    %57 = vector.shape_cast %56 : vector<1x16x16xbf16> to vector<16x16xbf16>
    %58 = arith.truncf %55 : vector<16x128xf32> to vector<16x128xbf16>
    %cst_19 = arith.constant dense<0.000000e+00> : vector<16x128xf32>
    %59 = tpu.matmul %57, %58, %cst_19 {dimension_numbers = #tpu.dot_dimension_numbers<[1], [0], [0], [1], [0, 0, 1, 1], [], []>} : vector<16x16xbf16>, vector<16x128xbf16>, vector<16x128xf32> -> vector<16x128xf32>
    %60 = arith.addf %54, %59 : vector<16x128xf32>
    %61 = vector.broadcast %20 : vector<16x1xf32> to vector<16x128xf32>
    %62 = arith.addf %60, %61 : vector<16x128xf32>
    %cst_20 = arith.constant 0.000000e+00 : f32
    %63 = vector.broadcast %cst_20 : f32 to vector<16x128xf32>
    %64 = arith.maximumf %62, %63 : vector<16x128xf32>
    %c12_i32_21 = arith.constant 12 : i32
    %65 = vector.broadcast %c12_i32_21 : i32 to vector<1x128xi32>
    %66 = arith.cmpi slt, %2, %65 : vector<1x128xi32>
    %cst_22 = arith.constant 0.000000e+00 : f32
    %67 = vector.shape_cast %66 : vector<1x128xi1> to vector<1x128xi1>
    %68 = vector.broadcast %67 : vector<1x128xi1> to vector<16x128xi1>
    %69 = vector.broadcast %cst_22 : f32 to vector<16x128xf32>
    %70 = arith.select %68, %64, %69 : vector<16x128xi1>, vector<16x128xf32>
    %c0_23 = arith.constant 0 : index
    %c0_24 = arith.constant 0 : index
    %c0_25 = arith.constant 0 : index
    %71 = vector.load %arg6[%c0_23, %c0_24, %c0_25] : memref<3x8x16xbf16, #tpu.memory_space<vmem>>, vector<3x8x16xbf16>
    %c0_26 = arith.constant 0 : index
    %c0_27 = arith.constant 0 : index
    %72 = vector.load %arg7[%c0_26, %c0_27] : memref<8x1xf32, #tpu.memory_space<vmem>>, vector<8x1xf32>
    %c1_i32_28 = arith.constant 1 : i32
    %73 = tpu.dynamic_rotate %18 by %c1_i32_28 dim 1 : vector<16x128xf32>, i32 -> vector<16x128xf32>
    %74 = vector.extract_strided_slice %71 {offsets = [0, 0, 0], sizes = [1, 8, 16], strides = [1, 1, 1]} : vector<3x8x16xbf16> to vector<1x8x16xbf16>
    %75 = vector.shape_cast %74 : vector<1x8x16xbf16> to vector<8x16xbf16>
    %76 = arith.truncf %73 : vector<16x128xf32> to vector<16x128xbf16>
    %cst_29 = arith.constant dense<0.000000e+00> : vector<8x128xf32>
    %77 = tpu.matmul %75, %76, %cst_29 {dimension_numbers = #tpu.dot_dimension_numbers<[1], [0], [0], [1], [0, 0, 1, 1], [], []>} : vector<8x16xbf16>, vector<16x128xbf16>, vector<8x128xf32> -> vector<8x128xf32>
    %78 = vector.extract_strided_slice %71 {offsets = [1, 0, 0], sizes = [1, 8, 16], strides = [1, 1, 1]} : vector<3x8x16xbf16> to vector<1x8x16xbf16>
    %79 = vector.shape_cast %78 : vector<1x8x16xbf16> to vector<8x16xbf16>
    %80 = arith.truncf %18 : vector<16x128xf32> to vector<16x128xbf16>
    %cst_30 = arith.constant dense<0.000000e+00> : vector<8x128xf32>
    %81 = tpu.matmul %79, %80, %cst_30 {dimension_numbers = #tpu.dot_dimension_numbers<[1], [0], [0], [1], [0, 0, 1, 1], [], []>} : vector<8x16xbf16>, vector<16x128xbf16>, vector<8x128xf32> -> vector<8x128xf32>
    %82 = arith.addf %77, %81 : vector<8x128xf32>
    %c127_i32_31 = arith.constant 127 : i32
    %83 = tpu.dynamic_rotate %18 by %c127_i32_31 dim 1 : vector<16x128xf32>, i32 -> vector<16x128xf32>
    %84 = vector.extract_strided_slice %71 {offsets = [2, 0, 0], sizes = [1, 8, 16], strides = [1, 1, 1]} : vector<3x8x16xbf16> to vector<1x8x16xbf16>
    %85 = vector.shape_cast %84 : vector<1x8x16xbf16> to vector<8x16xbf16>
    %86 = arith.truncf %83 : vector<16x128xf32> to vector<16x128xbf16>
    %cst_32 = arith.constant dense<0.000000e+00> : vector<8x128xf32>
    %87 = tpu.matmul %85, %86, %cst_32 {dimension_numbers = #tpu.dot_dimension_numbers<[1], [0], [0], [1], [0, 0, 1, 1], [], []>} : vector<8x16xbf16>, vector<16x128xbf16>, vector<8x128xf32> -> vector<8x128xf32>
    %88 = arith.addf %82, %87 : vector<8x128xf32>
    %89 = vector.broadcast %72 : vector<8x1xf32> to vector<8x128xf32>
    %90 = arith.addf %88, %89 : vector<8x128xf32>
    %cst_33 = arith.constant 0.000000e+00 : f32
    %91 = vector.broadcast %cst_33 : f32 to vector<8x128xf32>
    %92 = arith.maximumf %90, %91 : vector<8x128xf32>
    %c12_i32_34 = arith.constant 12 : i32
    %93 = vector.broadcast %c12_i32_34 : i32 to vector<1x128xi32>
    %94 = arith.cmpi slt, %2, %93 : vector<1x128xi32>
    %cst_35 = arith.constant 0.000000e+00 : f32
    %95 = vector.shape_cast %94 : vector<1x128xi1> to vector<1x128xi1>
    %96 = vector.broadcast %95 : vector<1x128xi1> to vector<8x128xi1>
    %97 = vector.broadcast %cst_35 : f32 to vector<8x128xf32>
    %98 = arith.select %96, %92, %97 : vector<8x128xi1>, vector<8x128xf32>
    %c0_36 = arith.constant 0 : index
    %c0_37 = arith.constant 0 : index
    %c0_38 = arith.constant 0 : index
    %99 = vector.load %arg8[%c0_36, %c0_37, %c0_38] : memref<3x16x8xbf16, #tpu.memory_space<vmem>>, vector<3x16x8xbf16>
    %c0_39 = arith.constant 0 : index
    %c0_40 = arith.constant 0 : index
    %100 = vector.load %arg9[%c0_39, %c0_40] : memref<16x1xf32, #tpu.memory_space<vmem>>, vector<16x1xf32>
    %c1_i32_41 = arith.constant 1 : i32
    %101 = tpu.dynamic_rotate %98 by %c1_i32_41 dim 1 : vector<8x128xf32>, i32 -> vector<8x128xf32>
    %102 = vector.extract_strided_slice %99 {offsets = [0, 0, 0], sizes = [1, 16, 8], strides = [1, 1, 1]} : vector<3x16x8xbf16> to vector<1x16x8xbf16>
    %103 = vector.shape_cast %102 : vector<1x16x8xbf16> to vector<16x8xbf16>
    %104 = arith.truncf %101 : vector<8x128xf32> to vector<8x128xbf16>
    %cst_42 = arith.constant dense<0.000000e+00> : vector<16x128xf32>
    %105 = tpu.matmul %103, %104, %cst_42 {dimension_numbers = #tpu.dot_dimension_numbers<[1], [0], [0], [1], [0, 0, 1, 1], [], []>} : vector<16x8xbf16>, vector<8x128xbf16>, vector<16x128xf32> -> vector<16x128xf32>
    %106 = vector.extract_strided_slice %99 {offsets = [1, 0, 0], sizes = [1, 16, 8], strides = [1, 1, 1]} : vector<3x16x8xbf16> to vector<1x16x8xbf16>
    %107 = vector.shape_cast %106 : vector<1x16x8xbf16> to vector<16x8xbf16>
    %108 = arith.truncf %98 : vector<8x128xf32> to vector<8x128xbf16>
    %cst_43 = arith.constant dense<0.000000e+00> : vector<16x128xf32>
    %109 = tpu.matmul %107, %108, %cst_43 {dimension_numbers = #tpu.dot_dimension_numbers<[1], [0], [0], [1], [0, 0, 1, 1], [], []>} : vector<16x8xbf16>, vector<8x128xbf16>, vector<16x128xf32> -> vector<16x128xf32>
    %110 = arith.addf %105, %109 : vector<16x128xf32>
    %c127_i32_44 = arith.constant 127 : i32
    %111 = tpu.dynamic_rotate %98 by %c127_i32_44 dim 1 : vector<8x128xf32>, i32 -> vector<8x128xf32>
    %112 = vector.extract_strided_slice %99 {offsets = [2, 0, 0], sizes = [1, 16, 8], strides = [1, 1, 1]} : vector<3x16x8xbf16> to vector<1x16x8xbf16>
    %113 = vector.shape_cast %112 : vector<1x16x8xbf16> to vector<16x8xbf16>
    %114 = arith.truncf %111 : vector<8x128xf32> to vector<8x128xbf16>
    %cst_45 = arith.constant dense<0.000000e+00> : vector<16x128xf32>
    %115 = tpu.matmul %113, %114, %cst_45 {dimension_numbers = #tpu.dot_dimension_numbers<[1], [0], [0], [1], [0, 0, 1, 1], [], []>} : vector<16x8xbf16>, vector<8x128xbf16>, vector<16x128xf32> -> vector<16x128xf32>
    %116 = arith.addf %110, %115 : vector<16x128xf32>
    %117 = vector.broadcast %100 : vector<16x1xf32> to vector<16x128xf32>
    %118 = arith.addf %116, %117 : vector<16x128xf32>
    %cst_46 = arith.constant 0.000000e+00 : f32
    %119 = vector.broadcast %cst_46 : f32 to vector<16x128xf32>
    %120 = arith.maximumf %118, %119 : vector<16x128xf32>
    %c12_i32_47 = arith.constant 12 : i32
    %121 = vector.broadcast %c12_i32_47 : i32 to vector<1x128xi32>
    %122 = arith.cmpi slt, %2, %121 : vector<1x128xi32>
    %cst_48 = arith.constant 0.000000e+00 : f32
    %123 = vector.shape_cast %122 : vector<1x128xi1> to vector<1x128xi1>
    %124 = vector.broadcast %123 : vector<1x128xi1> to vector<16x128xi1>
    %125 = vector.broadcast %cst_48 : f32 to vector<16x128xf32>
    %126 = arith.select %124, %120, %125 : vector<16x128xi1>, vector<16x128xf32>
    %c1_i32_49 = arith.constant 1 : i32
    %127 = tpu.dynamic_rotate %3 by %c1_i32_49 dim 1 : vector<16x128xf32>, i32 -> vector<16x128xf32>
    %128 = arith.maximumf %3, %127 : vector<16x128xf32>
    %c127_i32_50 = arith.constant 127 : i32
    %129 = tpu.dynamic_rotate %3 by %c127_i32_50 dim 1 : vector<16x128xf32>, i32 -> vector<16x128xf32>
    %130 = arith.maximumf %128, %129 : vector<16x128xf32>
    %c12_i32_51 = arith.constant 12 : i32
    %131 = vector.broadcast %c12_i32_51 : i32 to vector<1x128xi32>
    %132 = arith.cmpi slt, %2, %131 : vector<1x128xi32>
    %cst_52 = arith.constant 0.000000e+00 : f32
    %133 = vector.shape_cast %132 : vector<1x128xi1> to vector<1x128xi1>
    %134 = vector.broadcast %133 : vector<1x128xi1> to vector<16x128xi1>
    %135 = vector.broadcast %cst_52 : f32 to vector<16x128xf32>
    %136 = arith.select %134, %130, %135 : vector<16x128xi1>, vector<16x128xf32>
    %c0_53 = arith.constant 0 : index
    %c0_54 = arith.constant 0 : index
    %c0_55 = arith.constant 0 : index
    %137 = vector.load %arg10[%c0_53, %c0_54, %c0_55] : memref<1x16x16xbf16, #tpu.memory_space<vmem>>, vector<1x16x16xbf16>
    %c0_56 = arith.constant 0 : index
    %c0_57 = arith.constant 0 : index
    %138 = vector.load %arg11[%c0_56, %c0_57] : memref<16x1xf32, #tpu.memory_space<vmem>>, vector<16x1xf32>
    %139 = vector.shape_cast %137 : vector<1x16x16xbf16> to vector<16x16xbf16>
    %140 = arith.truncf %136 : vector<16x128xf32> to vector<16x128xbf16>
    %cst_58 = arith.constant dense<0.000000e+00> : vector<16x128xf32>
    %141 = tpu.matmul %139, %140, %cst_58 {dimension_numbers = #tpu.dot_dimension_numbers<[1], [0], [0], [1], [0, 0, 1, 1], [], []>} : vector<16x16xbf16>, vector<16x128xbf16>, vector<16x128xf32> -> vector<16x128xf32>
    %142 = vector.broadcast %138 : vector<16x1xf32> to vector<16x128xf32>
    %143 = arith.addf %141, %142 : vector<16x128xf32>
    %cst_59 = arith.constant 0.000000e+00 : f32
    %144 = vector.broadcast %cst_59 : f32 to vector<16x128xf32>
    %145 = arith.maximumf %143, %144 : vector<16x128xf32>
    %c12_i32_60 = arith.constant 12 : i32
    %146 = vector.broadcast %c12_i32_60 : i32 to vector<1x128xi32>
    %147 = arith.cmpi slt, %2, %146 : vector<1x128xi32>
    %cst_61 = arith.constant 0.000000e+00 : f32
    %148 = vector.shape_cast %147 : vector<1x128xi1> to vector<1x128xi1>
    %149 = vector.broadcast %148 : vector<1x128xi1> to vector<16x128xi1>
    %150 = vector.broadcast %cst_61 : f32 to vector<16x128xf32>
    %151 = arith.select %149, %145, %150 : vector<16x128xi1>, vector<16x128xf32>
    %152 = tpu.iota {dimensions = array<i32: 0>} : vector<16x1xi32>
    %c4_i32 = arith.constant 4 : i32
    %153 = vector.broadcast %c4_i32 : i32 to vector<16x1xi32>
    %154 = arith.cmpi slt, %152, %153 : vector<16x1xi32>
    %cst_62 = arith.constant 0.000000e+00 : f32
    %155 = vector.shape_cast %154 : vector<16x1xi1> to vector<16x1xi1>
    %156 = vector.broadcast %155 : vector<16x1xi1> to vector<16x128xi1>
    %157 = vector.broadcast %cst_62 : f32 to vector<16x128xf32>
    %158 = arith.select %156, %18, %157 : vector<16x128xi1>, vector<16x128xf32>
    %159 = arith.addf %158, %70 : vector<16x128xf32>
    %160 = arith.addf %159, %126 : vector<16x128xf32>
    %161 = arith.addf %160, %151 : vector<16x128xf32>
    %c0_63 = arith.constant 0 : index
    %c0_64 = arith.constant 0 : index
    %162 = vector.load %arg12[%c0_63, %c0_64] : memref<16x128xf32, #tpu.memory_space<vmem>>, vector<16x128xf32>
    tpu.vector_store %arg12[%c0_63, %c0_64], %161 {strides = array<i32>} : memref<16x128xf32, #tpu.memory_space<vmem>>, vector<16x128xf32>,
    return
  }
  func.func @transform_0(%arg0: i32) -> (i32, i32) {
    %c0_i32 = arith.constant 0 : i32
    %c0_i32_0 = arith.constant 0 : i32
    return %c0_i32, %arg0 : i32, i32
  }
  func.func @transform_1(%arg0: i32) -> (i32, i32, i32) {
    %c0_i32 = arith.constant 0 : i32
    %c0_i32_0 = arith.constant 0 : i32
    %c0_i32_1 = arith.constant 0 : i32
    %c0_i32_2 = arith.constant 0 : i32
    return %c0_i32, %c0_i32_0, %c0_i32_1 : i32, i32, i32
  }
  func.func @transform_2(%arg0: i32) -> (i32, i32) {
    %c0_i32 = arith.constant 0 : i32
    %c0_i32_0 = arith.constant 0 : i32
    %c0_i32_1 = arith.constant 0 : i32
    return %c0_i32, %c0_i32_0 : i32, i32
  }
  func.func @transform_3(%arg0: i32) -> (i32, i32, i32) {
    %c0_i32 = arith.constant 0 : i32
    %c0_i32_0 = arith.constant 0 : i32
    %c0_i32_1 = arith.constant 0 : i32
    %c0_i32_2 = arith.constant 0 : i32
    return %c0_i32, %c0_i32_0, %c0_i32_1 : i32, i32, i32
  }
  func.func @transform_4(%arg0: i32) -> (i32, i32) {
    %c0_i32 = arith.constant 0 : i32
    %c0_i32_0 = arith.constant 0 : i32
    %c0_i32_1 = arith.constant 0 : i32
    return %c0_i32, %c0_i32_0 : i32, i32
  }
  func.func @transform_5(%arg0: i32) -> (i32, i32, i32) {
    %c0_i32 = arith.constant 0 : i32
    %c0_i32_0 = arith.constant 0 : i32
    %c0_i32_1 = arith.constant 0 : i32
    %c0_i32_2 = arith.constant 0 : i32
    return %c0_i32, %c0_i32_0, %c0_i32_1 : i32, i32, i32
  }
  func.func @transform_6(%arg0: i32) -> (i32, i32) {
    %c0_i32 = arith.constant 0 : i32
    %c0_i32_0 = arith.constant 0 : i32
    %c0_i32_1 = arith.constant 0 : i32
    return %c0_i32, %c0_i32_0 : i32, i32
  }
  func.func @transform_7(%arg0: i32) -> (i32, i32, i32) {
    %c0_i32 = arith.constant 0 : i32
    %c0_i32_0 = arith.constant 0 : i32
    %c0_i32_1 = arith.constant 0 : i32
    %c0_i32_2 = arith.constant 0 : i32
    return %c0_i32, %c0_i32_0, %c0_i32_1 : i32, i32, i32
  }
  func.func @transform_8(%arg0: i32) -> (i32, i32) {
    %c0_i32 = arith.constant 0 : i32
    %c0_i32_0 = arith.constant 0 : i32
    %c0_i32_1 = arith.constant 0 : i32
    return %c0_i32, %c0_i32_0 : i32, i32
  }
  func.func @transform_9(%arg0: i32) -> (i32, i32, i32) {
    %c0_i32 = arith.constant 0 : i32
    %c0_i32_0 = arith.constant 0 : i32
    %c0_i32_1 = arith.constant 0 : i32
    %c0_i32_2 = arith.constant 0 : i32
    return %c0_i32, %c0_i32_0, %c0_i32_1 : i32, i32, i32
  }
  func.func @transform_10(%arg0: i32) -> (i32, i32) {
    %c0_i32 = arith.constant 0 : i32
    %c0_i32_0 = arith.constant 0 : i32
    %c0_i32_1 = arith.constant 0 : i32
    return %c0_i32, %c0_i32_0 : i32, i32
  }
  func.func @transform_11(%arg0: i32) -> (i32, i32) {
    %c0_i32 = arith.constant 0 : i32
    %c0_i32_0 = arith.constant 0 : i32
    return %c0_i32, %arg0 : i32, i32
  }
}

module attributes {stable_mosaic.version = 11 : i64} {
  func.func @_chain_kernel(%arg0: i32, %arg1: memref<16x128xf32, #tpu.memory_space<vmem>>, %arg2: memref<3x16x16xbf16, #tpu.memory_space<vmem>>, %arg3: memref<16x1xf32, #tpu.memory_space<vmem>>, %arg4: memref<3x16x16xbf16, #tpu.memory_space<vmem>>, %arg5: memref<16x1xf32, #tpu.memory_space<vmem>>, %arg6: memref<7x8x16xbf16, #tpu.memory_space<vmem>>, %arg7: memref<8x1xf32, #tpu.memory_space<vmem>>, %arg8: memref<1x8x8xbf16, #tpu.memory_space<vmem>>, %arg9: memref<8x1xf32, #tpu.memory_space<vmem>>, %arg10: memref<8x128xf32, #tpu.memory_space<vmem>>) attributes {dimension_semantics = [#tpu.dimension_semantics<parallel>], iteration_bounds = array<i64: 3>, scalar_prefetch = 0 : i64, scratch_operands = 0 : i64, tpu.core_type = #tpu.core_type<tc>, window_params = [{transform_indices = @transform_0, window_bounds = array<i64: 16, 128>}, {pipeline_mode = #tpu.pipeline_mode<synchronous>, transform_indices = @transform_1, window_bounds = array<i64: 3, 16, 16>}, {pipeline_mode = #tpu.pipeline_mode<synchronous>, transform_indices = @transform_2, window_bounds = array<i64: 16, 1>}, {pipeline_mode = #tpu.pipeline_mode<synchronous>, transform_indices = @transform_3, window_bounds = array<i64: 3, 16, 16>}, {pipeline_mode = #tpu.pipeline_mode<synchronous>, transform_indices = @transform_4, window_bounds = array<i64: 16, 1>}, {pipeline_mode = #tpu.pipeline_mode<synchronous>, transform_indices = @transform_5, window_bounds = array<i64: 7, 8, 16>}, {pipeline_mode = #tpu.pipeline_mode<synchronous>, transform_indices = @transform_6, window_bounds = array<i64: 8, 1>}, {pipeline_mode = #tpu.pipeline_mode<synchronous>, transform_indices = @transform_7, window_bounds = array<i64: 1, 8, 8>}, {pipeline_mode = #tpu.pipeline_mode<synchronous>, transform_indices = @transform_8, window_bounds = array<i64: 8, 1>}, {transform_indices = @transform_9, window_bounds = array<i64: 8, 128>}]} {
    %0 = tpu.iota {dimensions = array<i32: 1>} : vector<1x128xi32>
    %c63_i32 = arith.constant 63 : i32
    %1 = vector.broadcast %c63_i32 : i32 to vector<1x128xi32>
    %2 = arith.andi %0, %1 : vector<1x128xi32>
    %c0 = arith.constant 0 : index
    %c0_0 = arith.constant 0 : index
    %3 = vector.load %arg1[%c0, %c0_0] : memref<16x128xf32, #tpu.memory_space<vmem>>, vector<16x128xf32>
    %c0_1 = arith.constant 0 : index
    %c0_2 = arith.constant 0 : index
    %c0_3 = arith.constant 0 : index
    %4 = vector.load %arg2[%c0_1, %c0_2, %c0_3] : memref<3x16x16xbf16, #tpu.memory_space<vmem>>, vector<3x16x16xbf16>
    %c0_4 = arith.constant 0 : index
    %c0_5 = arith.constant 0 : index
    %5 = vector.load %arg3[%c0_4, %c0_5] : memref<16x1xf32, #tpu.memory_space<vmem>>, vector<16x1xf32>
    %c2_i32 = arith.constant 2 : i32
    %6 = tpu.dynamic_rotate %3 by %c2_i32 dim 1 : vector<16x128xf32>, i32 -> vector<16x128xf32>
    %7 = vector.extract_strided_slice %4 {offsets = [0, 0, 0], sizes = [1, 16, 16], strides = [1, 1, 1]} : vector<3x16x16xbf16> to vector<1x16x16xbf16>
    %8 = vector.shape_cast %7 : vector<1x16x16xbf16> to vector<16x16xbf16>
    %9 = arith.truncf %6 : vector<16x128xf32> to vector<16x128xbf16>
    %cst = arith.constant dense<0.000000e+00> : vector<16x128xf32>
    %10 = tpu.matmul %8, %9, %cst {dimension_numbers = #tpu.dot_dimension_numbers<[1], [0], [0], [1], [0, 0, 1, 1], [], []>} : vector<16x16xbf16>, vector<16x128xbf16>, vector<16x128xf32> -> vector<16x128xf32>
    %c1_i32 = arith.constant 1 : i32
    %11 = tpu.dynamic_rotate %3 by %c1_i32 dim 1 : vector<16x128xf32>, i32 -> vector<16x128xf32>
    %12 = vector.extract_strided_slice %4 {offsets = [1, 0, 0], sizes = [1, 16, 16], strides = [1, 1, 1]} : vector<3x16x16xbf16> to vector<1x16x16xbf16>
    %13 = vector.shape_cast %12 : vector<1x16x16xbf16> to vector<16x16xbf16>
    %14 = arith.truncf %11 : vector<16x128xf32> to vector<16x128xbf16>
    %cst_6 = arith.constant dense<0.000000e+00> : vector<16x128xf32>
    %15 = tpu.matmul %13, %14, %cst_6 {dimension_numbers = #tpu.dot_dimension_numbers<[1], [0], [0], [1], [0, 0, 1, 1], [], []>} : vector<16x16xbf16>, vector<16x128xbf16>, vector<16x128xf32> -> vector<16x128xf32>
    %16 = arith.addf %10, %15 : vector<16x128xf32>
    %17 = vector.extract_strided_slice %4 {offsets = [2, 0, 0], sizes = [1, 16, 16], strides = [1, 1, 1]} : vector<3x16x16xbf16> to vector<1x16x16xbf16>
    %18 = vector.shape_cast %17 : vector<1x16x16xbf16> to vector<16x16xbf16>
    %19 = arith.truncf %3 : vector<16x128xf32> to vector<16x128xbf16>
    %cst_7 = arith.constant dense<0.000000e+00> : vector<16x128xf32>
    %20 = tpu.matmul %18, %19, %cst_7 {dimension_numbers = #tpu.dot_dimension_numbers<[1], [0], [0], [1], [0, 0, 1, 1], [], []>} : vector<16x16xbf16>, vector<16x128xbf16>, vector<16x128xf32> -> vector<16x128xf32>
    %21 = arith.addf %16, %20 : vector<16x128xf32>
    %22 = vector.broadcast %5 : vector<16x1xf32> to vector<16x128xf32>
    %23 = arith.addf %21, %22 : vector<16x128xf32>
    %cst_8 = arith.constant 0.000000e+00 : f32
    %24 = vector.broadcast %cst_8 : f32 to vector<16x128xf32>
    %25 = arith.maximumf %23, %24 : vector<16x128xf32>
    %c38_i32 = arith.constant 38 : i32
    %26 = vector.broadcast %c38_i32 : i32 to vector<1x128xi32>
    %27 = arith.cmpi slt, %2, %26 : vector<1x128xi32>
    %cst_9 = arith.constant 0.000000e+00 : f32
    %28 = vector.shape_cast %27 : vector<1x128xi1> to vector<1x128xi1>
    %29 = vector.broadcast %28 : vector<1x128xi1> to vector<16x128xi1>
    %30 = vector.broadcast %cst_9 : f32 to vector<16x128xf32>
    %31 = arith.select %29, %25, %30 : vector<16x128xi1>, vector<16x128xf32>
    %c0_10 = arith.constant 0 : index
    %c0_11 = arith.constant 0 : index
    %c0_12 = arith.constant 0 : index
    %32 = vector.load %arg4[%c0_10, %c0_11, %c0_12] : memref<3x16x16xbf16, #tpu.memory_space<vmem>>, vector<3x16x16xbf16>
    %c0_13 = arith.constant 0 : index
    %c0_14 = arith.constant 0 : index
    %33 = vector.load %arg5[%c0_13, %c0_14] : memref<16x1xf32, #tpu.memory_space<vmem>>, vector<16x1xf32>
    %c2_i32_15 = arith.constant 2 : i32
    %34 = tpu.dynamic_rotate %31 by %c2_i32_15 dim 1 : vector<16x128xf32>, i32 -> vector<16x128xf32>
    %35 = vector.extract_strided_slice %32 {offsets = [0, 0, 0], sizes = [1, 16, 16], strides = [1, 1, 1]} : vector<3x16x16xbf16> to vector<1x16x16xbf16>
    %36 = vector.shape_cast %35 : vector<1x16x16xbf16> to vector<16x16xbf16>
    %37 = arith.truncf %34 : vector<16x128xf32> to vector<16x128xbf16>
    %cst_16 = arith.constant dense<0.000000e+00> : vector<16x128xf32>
    %38 = tpu.matmul %36, %37, %cst_16 {dimension_numbers = #tpu.dot_dimension_numbers<[1], [0], [0], [1], [0, 0, 1, 1], [], []>} : vector<16x16xbf16>, vector<16x128xbf16>, vector<16x128xf32> -> vector<16x128xf32>
    %c1_i32_17 = arith.constant 1 : i32
    %39 = tpu.dynamic_rotate %31 by %c1_i32_17 dim 1 : vector<16x128xf32>, i32 -> vector<16x128xf32>
    %40 = vector.extract_strided_slice %32 {offsets = [1, 0, 0], sizes = [1, 16, 16], strides = [1, 1, 1]} : vector<3x16x16xbf16> to vector<1x16x16xbf16>
    %41 = vector.shape_cast %40 : vector<1x16x16xbf16> to vector<16x16xbf16>
    %42 = arith.truncf %39 : vector<16x128xf32> to vector<16x128xbf16>
    %cst_18 = arith.constant dense<0.000000e+00> : vector<16x128xf32>
    %43 = tpu.matmul %41, %42, %cst_18 {dimension_numbers = #tpu.dot_dimension_numbers<[1], [0], [0], [1], [0, 0, 1, 1], [], []>} : vector<16x16xbf16>, vector<16x128xbf16>, vector<16x128xf32> -> vector<16x128xf32>
    %44 = arith.addf %38, %43 : vector<16x128xf32>
    %45 = vector.extract_strided_slice %32 {offsets = [2, 0, 0], sizes = [1, 16, 16], strides = [1, 1, 1]} : vector<3x16x16xbf16> to vector<1x16x16xbf16>
    %46 = vector.shape_cast %45 : vector<1x16x16xbf16> to vector<16x16xbf16>
    %47 = arith.truncf %31 : vector<16x128xf32> to vector<16x128xbf16>
    %cst_19 = arith.constant dense<0.000000e+00> : vector<16x128xf32>
    %48 = tpu.matmul %46, %47, %cst_19 {dimension_numbers = #tpu.dot_dimension_numbers<[1], [0], [0], [1], [0, 0, 1, 1], [], []>} : vector<16x16xbf16>, vector<16x128xbf16>, vector<16x128xf32> -> vector<16x128xf32>
    %49 = arith.addf %44, %48 : vector<16x128xf32>
    %50 = vector.broadcast %33 : vector<16x1xf32> to vector<16x128xf32>
    %51 = arith.addf %49, %50 : vector<16x128xf32>
    %cst_20 = arith.constant 0.000000e+00 : f32
    %52 = vector.broadcast %cst_20 : f32 to vector<16x128xf32>
    %53 = arith.maximumf %51, %52 : vector<16x128xf32>
    %c40_i32 = arith.constant 40 : i32
    %54 = vector.broadcast %c40_i32 : i32 to vector<1x128xi32>
    %55 = arith.cmpi slt, %2, %54 : vector<1x128xi32>
    %cst_21 = arith.constant 0.000000e+00 : f32
    %56 = vector.shape_cast %55 : vector<1x128xi1> to vector<1x128xi1>
    %57 = vector.broadcast %56 : vector<1x128xi1> to vector<16x128xi1>
    %58 = vector.broadcast %cst_21 : f32 to vector<16x128xf32>
    %59 = arith.select %57, %53, %58 : vector<16x128xi1>, vector<16x128xf32>
    %c0_22 = arith.constant 0 : index
    %c0_23 = arith.constant 0 : index
    %c0_24 = arith.constant 0 : index
    %60 = vector.load %arg6[%c0_22, %c0_23, %c0_24] : memref<7x8x16xbf16, #tpu.memory_space<vmem>>, vector<7x8x16xbf16>
    %c0_25 = arith.constant 0 : index
    %c0_26 = arith.constant 0 : index
    %61 = vector.load %arg7[%c0_25, %c0_26] : memref<8x1xf32, #tpu.memory_space<vmem>>, vector<8x1xf32>
    %c6_i32 = arith.constant 6 : i32
    %62 = tpu.dynamic_rotate %59 by %c6_i32 dim 1 : vector<16x128xf32>, i32 -> vector<16x128xf32>
    %63 = vector.extract_strided_slice %60 {offsets = [0, 0, 0], sizes = [1, 8, 16], strides = [1, 1, 1]} : vector<7x8x16xbf16> to vector<1x8x16xbf16>
    %64 = vector.shape_cast %63 : vector<1x8x16xbf16> to vector<8x16xbf16>
    %65 = arith.truncf %62 : vector<16x128xf32> to vector<16x128xbf16>
    %cst_27 = arith.constant dense<0.000000e+00> : vector<8x128xf32>
    %66 = tpu.matmul %64, %65, %cst_27 {dimension_numbers = #tpu.dot_dimension_numbers<[1], [0], [0], [1], [0, 0, 1, 1], [], []>} : vector<8x16xbf16>, vector<16x128xbf16>, vector<8x128xf32> -> vector<8x128xf32>
    %c5_i32 = arith.constant 5 : i32
    %67 = tpu.dynamic_rotate %59 by %c5_i32 dim 1 : vector<16x128xf32>, i32 -> vector<16x128xf32>
    %68 = vector.extract_strided_slice %60 {offsets = [1, 0, 0], sizes = [1, 8, 16], strides = [1, 1, 1]} : vector<7x8x16xbf16> to vector<1x8x16xbf16>
    %69 = vector.shape_cast %68 : vector<1x8x16xbf16> to vector<8x16xbf16>
    %70 = arith.truncf %67 : vector<16x128xf32> to vector<16x128xbf16>
    %cst_28 = arith.constant dense<0.000000e+00> : vector<8x128xf32>
    %71 = tpu.matmul %69, %70, %cst_28 {dimension_numbers = #tpu.dot_dimension_numbers<[1], [0], [0], [1], [0, 0, 1, 1], [], []>} : vector<8x16xbf16>, vector<16x128xbf16>, vector<8x128xf32> -> vector<8x128xf32>
    %72 = arith.addf %66, %71 : vector<8x128xf32>
    %c4_i32 = arith.constant 4 : i32
    %73 = tpu.dynamic_rotate %59 by %c4_i32 dim 1 : vector<16x128xf32>, i32 -> vector<16x128xf32>
    %74 = vector.extract_strided_slice %60 {offsets = [2, 0, 0], sizes = [1, 8, 16], strides = [1, 1, 1]} : vector<7x8x16xbf16> to vector<1x8x16xbf16>
    %75 = vector.shape_cast %74 : vector<1x8x16xbf16> to vector<8x16xbf16>
    %76 = arith.truncf %73 : vector<16x128xf32> to vector<16x128xbf16>
    %cst_29 = arith.constant dense<0.000000e+00> : vector<8x128xf32>
    %77 = tpu.matmul %75, %76, %cst_29 {dimension_numbers = #tpu.dot_dimension_numbers<[1], [0], [0], [1], [0, 0, 1, 1], [], []>} : vector<8x16xbf16>, vector<16x128xbf16>, vector<8x128xf32> -> vector<8x128xf32>
    %78 = arith.addf %72, %77 : vector<8x128xf32>
    %c3_i32 = arith.constant 3 : i32
    %79 = tpu.dynamic_rotate %59 by %c3_i32 dim 1 : vector<16x128xf32>, i32 -> vector<16x128xf32>
    %80 = vector.extract_strided_slice %60 {offsets = [3, 0, 0], sizes = [1, 8, 16], strides = [1, 1, 1]} : vector<7x8x16xbf16> to vector<1x8x16xbf16>
    %81 = vector.shape_cast %80 : vector<1x8x16xbf16> to vector<8x16xbf16>
    %82 = arith.truncf %79 : vector<16x128xf32> to vector<16x128xbf16>
    %cst_30 = arith.constant dense<0.000000e+00> : vector<8x128xf32>
    %83 = tpu.matmul %81, %82, %cst_30 {dimension_numbers = #tpu.dot_dimension_numbers<[1], [0], [0], [1], [0, 0, 1, 1], [], []>} : vector<8x16xbf16>, vector<16x128xbf16>, vector<8x128xf32> -> vector<8x128xf32>
    %84 = arith.addf %78, %83 : vector<8x128xf32>
    %c2_i32_31 = arith.constant 2 : i32
    %85 = tpu.dynamic_rotate %59 by %c2_i32_31 dim 1 : vector<16x128xf32>, i32 -> vector<16x128xf32>
    %86 = vector.extract_strided_slice %60 {offsets = [4, 0, 0], sizes = [1, 8, 16], strides = [1, 1, 1]} : vector<7x8x16xbf16> to vector<1x8x16xbf16>
    %87 = vector.shape_cast %86 : vector<1x8x16xbf16> to vector<8x16xbf16>
    %88 = arith.truncf %85 : vector<16x128xf32> to vector<16x128xbf16>
    %cst_32 = arith.constant dense<0.000000e+00> : vector<8x128xf32>
    %89 = tpu.matmul %87, %88, %cst_32 {dimension_numbers = #tpu.dot_dimension_numbers<[1], [0], [0], [1], [0, 0, 1, 1], [], []>} : vector<8x16xbf16>, vector<16x128xbf16>, vector<8x128xf32> -> vector<8x128xf32>
    %90 = arith.addf %84, %89 : vector<8x128xf32>
    %c1_i32_33 = arith.constant 1 : i32
    %91 = tpu.dynamic_rotate %59 by %c1_i32_33 dim 1 : vector<16x128xf32>, i32 -> vector<16x128xf32>
    %92 = vector.extract_strided_slice %60 {offsets = [5, 0, 0], sizes = [1, 8, 16], strides = [1, 1, 1]} : vector<7x8x16xbf16> to vector<1x8x16xbf16>
    %93 = vector.shape_cast %92 : vector<1x8x16xbf16> to vector<8x16xbf16>
    %94 = arith.truncf %91 : vector<16x128xf32> to vector<16x128xbf16>
    %cst_34 = arith.constant dense<0.000000e+00> : vector<8x128xf32>
    %95 = tpu.matmul %93, %94, %cst_34 {dimension_numbers = #tpu.dot_dimension_numbers<[1], [0], [0], [1], [0, 0, 1, 1], [], []>} : vector<8x16xbf16>, vector<16x128xbf16>, vector<8x128xf32> -> vector<8x128xf32>
    %96 = arith.addf %90, %95 : vector<8x128xf32>
    %97 = vector.extract_strided_slice %60 {offsets = [6, 0, 0], sizes = [1, 8, 16], strides = [1, 1, 1]} : vector<7x8x16xbf16> to vector<1x8x16xbf16>
    %98 = vector.shape_cast %97 : vector<1x8x16xbf16> to vector<8x16xbf16>
    %99 = arith.truncf %59 : vector<16x128xf32> to vector<16x128xbf16>
    %cst_35 = arith.constant dense<0.000000e+00> : vector<8x128xf32>
    %100 = tpu.matmul %98, %99, %cst_35 {dimension_numbers = #tpu.dot_dimension_numbers<[1], [0], [0], [1], [0, 0, 1, 1], [], []>} : vector<8x16xbf16>, vector<16x128xbf16>, vector<8x128xf32> -> vector<8x128xf32>
    %101 = arith.addf %96, %100 : vector<8x128xf32>
    %102 = vector.broadcast %61 : vector<8x1xf32> to vector<8x128xf32>
    %103 = arith.addf %101, %102 : vector<8x128xf32>
    %cst_36 = arith.constant 0.000000e+00 : f32
    %104 = vector.broadcast %cst_36 : f32 to vector<8x128xf32>
    %105 = arith.maximumf %103, %104 : vector<8x128xf32>
    %c46_i32 = arith.constant 46 : i32
    %106 = vector.broadcast %c46_i32 : i32 to vector<1x128xi32>
    %107 = arith.cmpi slt, %2, %106 : vector<1x128xi32>
    %cst_37 = arith.constant 0.000000e+00 : f32
    %108 = vector.shape_cast %107 : vector<1x128xi1> to vector<1x128xi1>
    %109 = vector.broadcast %108 : vector<1x128xi1> to vector<8x128xi1>
    %110 = vector.broadcast %cst_37 : f32 to vector<8x128xf32>
    %111 = arith.select %109, %105, %110 : vector<8x128xi1>, vector<8x128xf32>
    %c0_38 = arith.constant 0 : index
    %c0_39 = arith.constant 0 : index
    %c0_40 = arith.constant 0 : index
    %112 = vector.load %arg8[%c0_38, %c0_39, %c0_40] : memref<1x8x8xbf16, #tpu.memory_space<vmem>>, vector<1x8x8xbf16>
    %c0_41 = arith.constant 0 : index
    %c0_42 = arith.constant 0 : index
    %113 = vector.load %arg9[%c0_41, %c0_42] : memref<8x1xf32, #tpu.memory_space<vmem>>, vector<8x1xf32>
    %114 = vector.shape_cast %112 : vector<1x8x8xbf16> to vector<8x8xbf16>
    %115 = arith.truncf %111 : vector<8x128xf32> to vector<8x128xbf16>
    %cst_43 = arith.constant dense<0.000000e+00> : vector<8x128xf32>
    %116 = tpu.matmul %114, %115, %cst_43 {dimension_numbers = #tpu.dot_dimension_numbers<[1], [0], [0], [1], [0, 0, 1, 1], [], []>} : vector<8x8xbf16>, vector<8x128xbf16>, vector<8x128xf32> -> vector<8x128xf32>
    %117 = vector.broadcast %113 : vector<8x1xf32> to vector<8x128xf32>
    %118 = arith.addf %116, %117 : vector<8x128xf32>
    %cst_44 = arith.constant 0.000000e+00 : f32
    %119 = vector.broadcast %cst_44 : f32 to vector<8x128xf32>
    %120 = arith.maximumf %118, %119 : vector<8x128xf32>
    %c46_i32_45 = arith.constant 46 : i32
    %121 = vector.broadcast %c46_i32_45 : i32 to vector<1x128xi32>
    %122 = arith.cmpi slt, %2, %121 : vector<1x128xi32>
    %cst_46 = arith.constant 0.000000e+00 : f32
    %123 = vector.shape_cast %122 : vector<1x128xi1> to vector<1x128xi1>
    %124 = vector.broadcast %123 : vector<1x128xi1> to vector<8x128xi1>
    %125 = vector.broadcast %cst_46 : f32 to vector<8x128xf32>
    %126 = arith.select %124, %120, %125 : vector<8x128xi1>, vector<8x128xf32>
    %c0_47 = arith.constant 0 : index
    %c0_48 = arith.constant 0 : index
    %127 = vector.load %arg10[%c0_47, %c0_48] : memref<8x128xf32, #tpu.memory_space<vmem>>, vector<8x128xf32>
    tpu.vector_store %arg10[%c0_47, %c0_48], %126 {strides = array<i32>} : memref<8x128xf32, #tpu.memory_space<vmem>>, vector<8x128xf32>,
    return
  }
  func.func @transform_0(%arg0: i32) -> (i32, i32) {
    %c0_i32 = arith.constant 0 : i32
    %c0_i32_0 = arith.constant 0 : i32
    return %c0_i32, %arg0 : i32, i32
  }
  func.func @transform_1(%arg0: i32) -> (i32, i32, i32) {
    %c0_i32 = arith.constant 0 : i32
    %c0_i32_0 = arith.constant 0 : i32
    %c0_i32_1 = arith.constant 0 : i32
    %c0_i32_2 = arith.constant 0 : i32
    return %c0_i32, %c0_i32_0, %c0_i32_1 : i32, i32, i32
  }
  func.func @transform_2(%arg0: i32) -> (i32, i32) {
    %c0_i32 = arith.constant 0 : i32
    %c0_i32_0 = arith.constant 0 : i32
    %c0_i32_1 = arith.constant 0 : i32
    return %c0_i32, %c0_i32_0 : i32, i32
  }
  func.func @transform_3(%arg0: i32) -> (i32, i32, i32) {
    %c0_i32 = arith.constant 0 : i32
    %c0_i32_0 = arith.constant 0 : i32
    %c0_i32_1 = arith.constant 0 : i32
    %c0_i32_2 = arith.constant 0 : i32
    return %c0_i32, %c0_i32_0, %c0_i32_1 : i32, i32, i32
  }
  func.func @transform_4(%arg0: i32) -> (i32, i32) {
    %c0_i32 = arith.constant 0 : i32
    %c0_i32_0 = arith.constant 0 : i32
    %c0_i32_1 = arith.constant 0 : i32
    return %c0_i32, %c0_i32_0 : i32, i32
  }
  func.func @transform_5(%arg0: i32) -> (i32, i32, i32) {
    %c0_i32 = arith.constant 0 : i32
    %c0_i32_0 = arith.constant 0 : i32
    %c0_i32_1 = arith.constant 0 : i32
    %c0_i32_2 = arith.constant 0 : i32
    return %c0_i32, %c0_i32_0, %c0_i32_1 : i32, i32, i32
  }
  func.func @transform_6(%arg0: i32) -> (i32, i32) {
    %c0_i32 = arith.constant 0 : i32
    %c0_i32_0 = arith.constant 0 : i32
    %c0_i32_1 = arith.constant 0 : i32
    return %c0_i32, %c0_i32_0 : i32, i32
  }
  func.func @transform_7(%arg0: i32) -> (i32, i32, i32) {
    %c0_i32 = arith.constant 0 : i32
    %c0_i32_0 = arith.constant 0 : i32
    %c0_i32_1 = arith.constant 0 : i32
    %c0_i32_2 = arith.constant 0 : i32
    return %c0_i32, %c0_i32_0, %c0_i32_1 : i32, i32, i32
  }
  func.func @transform_8(%arg0: i32) -> (i32, i32) {
    %c0_i32 = arith.constant 0 : i32
    %c0_i32_0 = arith.constant 0 : i32
    %c0_i32_1 = arith.constant 0 : i32
    return %c0_i32, %c0_i32_0 : i32, i32
  }
  func.func @transform_9(%arg0: i32) -> (i32, i32) {
    %c0_i32 = arith.constant 0 : i32
    %c0_i32_0 = arith.constant 0 : i32
    return %c0_i32, %arg0 : i32, i32
  }
}

</mosaic_0001>

<bundles_post_ra>
// kernel: forward.5
= control target key start
LH: loop header
LB: loop body
LE: loop exit
PB: predicated region body
PF: predicated region fallthrough
CT: control target
= control target key end

     0   :  { %s1556_s30 = smov 0   ;;  %s1558_s10 = smov 0   ;;  %s1793_s0 = inlined_call_operand.vmem [shape: f32[8,512], index: 0, kind: input, shape index: {}]   ;;  %s1794_s1 = inlined_call_operand.vmem [shape: bf16[1,8,8], index: 1, kind: input, shape index: {}]   ;;  %s1795_s2 = inlined_call_operand.vmem [shape: f32[8,1], index: 2, kind: input, shape index: {}]   ;;  %s1796_s3 = inlined_call_operand.vmem [shape: bf16[7,16,8], index: 3, kind: input, shape index: {}]   ;;  %s1797_s4 = inlined_call_operand.vmem [shape: f32[16,1], index: 4, kind: input, shape index: {}]   ;;  %s1798_s5 = inlined_call_operand.vmem [shape: bf16[3,16,16], index: 5, kind: input, shape index: {}]   ;;  %s1799_s6 = inlined_call_operand.vmem [shape: f32[16,1], index: 6, kind: input, shape index: {}]   ;;  %s1800_s7 = inlined_call_operand.vmem [shape: bf16[3,16,16], index: 7, kind: input, shape index: {}]   ;;  %s1801_s8 = inlined_call_operand.vmem [shape: f32[16,1], index: 8, kind: input, shape index: {}]   ;;  %s1802_s9 = inlined_call_operand.vmem [shape: f32[16,512], index: 9, kind: output, shape index: {}]  }
   0x1   :  { %s1560_s11 = smov 0  }
   0x2 LB: > { %s1569_s12 = sadd.s32 4294967295, %s1497_s11   ;;  %s1571_s13 = sadd.s32 1, %s1497_s11   ;;  %s1497_s11 = sphi %s1560_s11, %s1806_s11   ;;  %s1493_s10 = sphi %s1558_s10, %s1805_s10   ;;  %s1489_s30 = sphi %s1556_s30, %s1804_s30  }
   0x3   : > { %s217_s14 = ssub.s32 %s1497_s11, %s1571_s13  ;;  %s220_s15 = sadd.s32 1, %s1493_s10 }
   0x4   : > { %p218_p0 = scmp.eq.s32.totalorder %s217_s14, 0  ;;  %p230_p1 = scmp.ne.s32.totalorder %s1493_s10, %s1489_s30 }
   0x5   : > { %p231_p2 = scmp.eq.s32.totalorder %s1569_s12, 1  ;;  %p1256_p3 = scmp.ge.s32.totalorder %s1497_s11, 1 }
   0x6   : > { %s1579_s16 = scalar_select %p218_p0, %s1493_s10, %s220_s15  }
   0x7   : > { %p1581_p4 = por %p231_p2, %p230_p1  ;;  %p288_p5 = scmp.lt.s32.totalorder %s1497_s11, 3 }
   0x9   : > { %p289_p6 = pnand %p1256_p3, %p288_p5 }
   0xa   : > { %s1258_s18 = sshll.u32 (!%p289_p6), %s1569_s12, 1  ;;  %s1500_s27 = smov (!%p289_p6), 125  }
   0xb   : > { %292 = sbr.rel (%p289_p6) target bundleno = 1061 (0x425), region = 56  ;;  %p324_p7 = scmp.lt.s32.totalorder (!%p289_p6), %s1258_s18, 3 }
   0xc   : > { %s1501_s28 = smov (!%p289_p6), 126   ;;  %s1502_s29 = smov (!%p289_p6), 127  }
   0xd   : > { %s1503_s11 = smov (!%p289_p6), 122   ;;  %s1504_s14 = smov (!%p289_p6), 124  }
   0xe   : > { %s1505_s15 = smov (!%p289_p6), 123  }
  0x10   : > { %v1499_v0 = vmov 0   ;;  %v339_v1 = vld [vmem:[%s1795_s2] sm:$0xff]  ;;  %s1808_s18 = smov (!%p324_p7, %s1258_s18), 3  ;;  %vm351_vm0 = vcmask 1043456   ;;  %vm347_vm1 = vcmask 64512   ;;  %v331_v9 = vlaneseq  ;;  %v1360_v40 = vld [vmem:[%s1796_s3 + $0x18] sm:$0xff] }
  0x11   : > { %1402 = vset.pattern.permute.xlu0 %v1499_v0  ;;  %1433 = vset.pattern.permute.xlu1 %v1499_v0  ;;  %s1259_s21 = sshll.u32 %s1808_s18, 3  ;;  %v338_v8 = vld [vmem:[%s1794_s1] sm:$0xf]  ;;  %v1358_v59 = vld [vmem:[%s1796_s3 + $0x8] sm:$0xff]  ;;  %vm837_vm14 = vcmask 130048  }
  0x12   : > { %344 = vperm.xlu0 %1402, %v339_v1   ;;  %1434 = vset.pattern.permute.xlu2 %v1499_v0  ;;  %s327_s24 = scalar_lea.vmem %s1793_s0, %s1259_s21  ;;  %v1599_v10 = vand.u32 127, %v331_v9  ;;  %v1357_v35 = vld [vmem:[%s1796_s3] sm:$0xff] }
  0x13   : > { %v336_v2 = vld [vmem:[%s327_s24] sm:$0xff]  ;;  %v337_v3 = vld [vmem:[%s327_s24 + $0x8] sm:$0xff] }
  0x14   : > { %v340_v4 = vpack.c.bf16 %v336_v2, %v336_v2  ;;  %v341_v5 = vpack.c.bf16 %v337_v3, %v337_v3  ;;  %v333_v11 = vadd.s32 128, %v1599_v10  ;;  %v1603_v13 = vand.u32 63, %v1599_v10 }
  0x15   : > { %vm564_vm4 = vcmp.lt.s32.totalorder %v1599_v10, 125  ;;  %vm509_vm5 = vcmp.lt.s32.totalorder %v1599_v10, 126  ;;  %vm416_vm6 = vcmp.lt.s32.totalorder %v1599_v10, 127  ;;  %vm619_vm7 = vcmp.lt.s32.totalorder %v1599_v10, 124 }
  0x16   : > { %v353_v6 = vsel %vm351_vm0, %v340_v4, 0  ;;  %v356_v7 = vsel %vm351_vm0, %v341_v5, 0  ;;  %v1605_v14 = vand.u32 63, %v333_v11  ;;  %vm386_vm2 = vcmp.lt.s32.totalorder %v1603_v13, 46 }
  0x17   : > { %365 = vmatpush.bf16.msra.mxu0 %v353_v6  ;;  %378 = vmatpush.bf16.msra.mxu1 %v356_v7  ;;  %vm674_vm8 = vcmp.lt.s32.totalorder %v1599_v10, 123  ;;  %vm729_vm9 = vcmp.lt.s32.totalorder %v1599_v10, 122  ;;  %vm798_vm10 = vcmp.lt.s32.totalorder %v1603_v13, 40  ;;  %vm977_vm15 = vcmp.lt.s32.totalorder %v1603_v13, 38 }
  0x18   : > { %vm387_vm3 = vcmp.lt.s32.totalorder %v1605_v14, 46  ;;  %vm799_vm11 = vcmp.lt.s32.totalorder %v1605_v14, 40  ;;  %vm1314_vm12 = vmpackc.low %vm798_vm10, %vm798_vm10 }
  0x19   : > { %vm1318_vm13 = vmpackc.low %vm799_vm11, %vm799_vm11 }
  0x1a   : > { %1260 = vmatmul.msk.bf16.vlgmr.msra.gmra.mxu0 %vm347_vm1, %v338_v8  ;;  %1261 = vmatmul.msk.bf16.vlgmr.msra.gmra.mxu1 %vm347_vm1, %v338_v8 }
  0x84   : > { %v345_v12 = vpop.permute.xlu0 %344 }
  0x97   : > { %v367_v15 = vpop.f32.mrf.mxu0  ;;  %v380_v16 = vpop.f32.mrf.mxu1 }
  0x98   : > { %v368_v17 = vadd.f32 %v367_v15, %v345_v12  ;;  %v381_v18 = vadd.f32 %v380_v16, %v345_v12 }
  0x9a   : > { %v384_v19 = vmax.f32 %v368_v17, 0.0  ;;  %v385_v20 = vmax.f32 %v381_v18, 0.0  ;;  %v1362_v18 = vld [vmem:[%s1796_s3 + $0x28] sm:$0xff] }
  0x9c   : > { %v392_v21 = vsel %vm386_vm2, %v384_v19, 0.0  ;;  %v393_v22 = vsel %vm387_vm3, %v385_v20, 0.0  ;;  %vm1155_vm3 = vcmp.lt.s32.totalorder %v1603_v13, 36 }
  0x9d   : > { %v1418_v23 = vpack.i.bf16 %v393_v22, %v392_v21  ;;  %v410_v24 = vpack.c.bf16 %v392_v21, %v392_v21  ;;  %v411_v25 = vpack.c.bf16 %v393_v22, %v393_v22 }
  0x9f   : > { %v369_v26 = vpop.f32.mrf.mxu0  ;;  %v382_v27 = vpop.f32.mrf.mxu1  ;;  %1419 = vrot.lane.b32.xlu2 %v1418_v23, %s1500_s27  ;;  %1409 = vrot.lane.b32.xlu1 %v1418_v23, %s1501_s28  ;;  %v472_v28 = vsel %vm351_vm0, %v410_v24, 0  ;;  %v475_v29 = vsel %vm351_vm0, %v411_v25, 0 }
  0xa0   : > { %1404 = vrot.lane.b32.xlu0 %v1418_v23, %s1502_s29  ;;  %484 = vmatpush.bf16.msrb.mxu0 %v472_v28  ;;  %v408_v28 = vld [vmem:[%s1797_s4] sm:$0xff] }
  0xa1   : > { %498 = vmatpush.bf16.msrb.mxu1 %v475_v29  ;;  %v409_v29 = vld [vmem:[%s1797_s4 + $0x8] sm:$0xff] }
  0xa3   : > { %1272 = vmatmul.msk.bf16.vlgmr.msrb.gmra.mxu0 %vm347_vm1, %v1357_v35 }
  0xa4   : > { %1273 = vmatmul.msk.bf16.vlgmr.msrb.gmra.mxu1 %vm347_vm1, %v1357_v35 }
  0xa7   : > { %1424 = vrot.lane.b32.xlu2 %v1418_v23, %s1503_s11  ;;  %1414 = vrot.lane.b32.xlu1 %v1418_v23, %s1504_s14  ;;  %s320_s11 = sand.u32 1, %s1489_s30  }
  0xa8   : > { %1429 = vrot.lane.b32.xlu0 %v1418_v23, %s1505_s15  ;;  %v1359_v23 = vld [vmem:[%s1796_s3 + $0x10] sm:$0xff]  ;;  %s1257_s14 = sshll.u32 %s320_s11, 5  ;;  %s1370_s15 = sshll.u32 (%p1581_p4), %s1569_s12, 4 }
  0xa9   : > { %s322_s30 = scalar_lea.vmem [#allocation2], %s1257_s14  ;;  %s1178_s20 = scalar_lea.vmem (%p1581_p4), %s1802_s9, %s1370_s15 }
  0xaf   : > { %782 = vperm.xlu1 %1433, %v408_v28   ;;  %787 = vperm.xlu2 %1434, %v409_v29  }
  0xf9   : > { %v1420_v30 = vpop.permute.xlu2 %1419 }
  0xfa   : > { %v1422_v31 = vunpack.i.h.bf16 %v1420_v30  ;;  %v1421_v32 = vunpack.i.l.bf16 %v1420_v30  ;;  %v1361_v30 = vld [vmem:[%s1796_s3 + $0x20] sm:$0xff] }
  0xfc   : > { %v565_v33 = vsel %vm564_vm4, %v1421_v32, %v1422_v31  ;;  %v566_v34 = vsel %vm564_vm4, %v1422_v31, %v1421_v32  ;;  %v1363_v31 = vld [vmem:[%s1796_s3 + $0x30] sm:$0xff]  ;;  %vm1156_vm4 = vcmp.lt.s32.totalorder %v1605_v14, 36 }
  0xfd   : > { %v567_v36 = vpack.c.bf16 %v565_v33, %v565_v33  ;;  %v568_v37 = vpack.c.bf16 %v566_v34, %v566_v34 }
  0xff   : > { %v578_v38 = vsel %vm351_vm0, %v567_v36, 0  ;;  %v581_v39 = vsel %vm351_vm0, %v568_v37, 0 }
 0x100   : > { %590 = vmatpush.bf16.msra.mxu0 %v578_v38  ;;  %604 = vmatpush.bf16.msra.mxu1 %v581_v39 }
 0x101   : > { %v1425_v8 = vpop.permute.xlu2 %1424 }
 0x102   : > { %v1427_v19 = vunpack.i.h.bf16 %v1425_v8  ;;  %v1426_v20 = vunpack.i.l.bf16 %v1425_v8 }
 0x103   : > { %1284 = vmatmul.msk.bf16.vlgmr.msra.gmra.mxu0 %vm347_vm1, %v1360_v40  ;;  %1285 = vmatmul.msk.bf16.vlgmr.msra.gmra.mxu1 %vm347_vm1, %v1360_v40 }
 0x104   : > { %v730_v21 = vsel %vm729_vm9, %v1426_v20, %v1427_v19  ;;  %v731_v22 = vsel %vm729_vm9, %v1427_v19, %v1426_v20 }
 0x105   : > { %v732_v24 = vpack.c.bf16 %v730_v21, %v730_v21  ;;  %v733_v25 = vpack.c.bf16 %v731_v22, %v731_v22 }
 0x107   : > { %v743_v26 = vsel %vm351_vm0, %v732_v24, 0  ;;  %v746_v27 = vsel %vm351_vm0, %v733_v25, 0 }
 0x109   : > { %v788_v22 = vpop.permute.xlu2 %787 }
 0x111   : > { %v1410_v41 = vpop.permute.xlu1 %1409 }
 0x112   : > { %v1412_v42 = vunpack.i.h.bf16 %v1410_v41  ;;  %v1411_v43 = vunpack.i.l.bf16 %v1410_v41  ;;  %v1405_v44 = vpop.permute.xlu0 %1404 }
 0x113   : > { %v1407_v45 = vunpack.i.h.bf16 %v1405_v44  ;;  %v1406_v46 = vunpack.i.l.bf16 %v1405_v44 }
 0x114   : > { %v510_v47 = vsel %vm509_vm5, %v1411_v43, %v1412_v42  ;;  %v511_v48 = vsel %vm509_vm5, %v1412_v42, %v1411_v43 }
 0x115   : > { %v417_v49 = vsel %vm416_vm6, %v1406_v46, %v1407_v45  ;;  %v418_v50 = vsel %vm416_vm6, %v1407_v45, %v1406_v46  ;;  %v512_v51 = vpack.c.bf16 %v510_v47, %v510_v47  ;;  %v513_v52 = vpack.c.bf16 %v511_v48, %v511_v48 }
 0x116   : > { %v419_v53 = vpack.c.bf16 %v417_v49, %v417_v49  ;;  %v420_v54 = vpack.c.bf16 %v418_v50, %v418_v50 }
 0x117   : > { %v523_v55 = vsel %vm351_vm0, %v512_v51, 0  ;;  %v526_v56 = vsel %vm351_vm0, %v513_v52, 0 }
 0x118   : > { %v430_v57 = vsel %vm351_vm0, %v419_v53, 0  ;;  %v433_v58 = vsel %vm351_vm0, %v420_v54, 0 }
 0x119   : > { %442 = vmatpush.bf16.msra.mxu2 %v430_v57  ;;  %456 = vmatpush.bf16.msra.mxu3 %v433_v58  ;;  %v1415_v60 = vpop.permute.xlu1 %1414 }
 0x11a   : > { %v1417_v61 = vunpack.i.h.bf16 %v1415_v60  ;;  %v1416_v62 = vunpack.i.l.bf16 %v1415_v60  ;;  %v1430_v63 = vpop.permute.xlu0 %1429 }
 0x11b   : > { %v1432_v0 = vunpack.i.h.bf16 %v1430_v63  ;;  %v1431_v1 = vunpack.i.l.bf16 %v1430_v63 }
 0x11c   : > { %1266 = vmatmul.msk.bf16.vlgmr.msra.gmra.mxu2 %vm347_vm1, %v1358_v59  ;;  %1267 = vmatmul.msk.bf16.vlgmr.msra.gmra.mxu3 %vm347_vm1, %v1358_v59  ;;  %v620_v2 = vsel %vm619_vm7, %v1416_v62, %v1417_v61  ;;  %v621_v3 = vsel %vm619_vm7, %v1417_v61, %v1416_v62 }
 0x11d   : > { %535 = vmatpush.bf16.msrb.mxu2 %v523_v55  ;;  %549 = vmatpush.bf16.msrb.mxu3 %v526_v56  ;;  %v622_v4 = vpack.c.bf16 %v620_v2, %v620_v2  ;;  %v623_v5 = vpack.c.bf16 %v621_v3, %v621_v3  ;;  %v675_v6 = vsel %vm674_vm8, %v1431_v1, %v1432_v0 }
 0x11e   : > { %v676_v7 = vsel %vm674_vm8, %v1432_v0, %v1431_v1  ;;  %v677_v9 = vpack.c.bf16 %v675_v6, %v675_v6 }
 0x11f   : > { %v678_v11 = vpack.c.bf16 %v676_v7, %v676_v7  ;;  %v633_v12 = vsel %vm351_vm0, %v622_v4, 0  ;;  %v636_v15 = vsel %vm351_vm0, %v623_v5, 0 }
 0x120   : > { %v688_v16 = vsel %vm351_vm0, %v677_v9, 0  ;;  %v486_v34 = vpop.f32.mrf.mxu0 }
 0x121   : > { %645 = vmatpush.bf16.msra.mxu2 %v633_v12  ;;  %659 = vmatpush.bf16.msra.mxu3 %v636_v15  ;;  %v691_v17 = vsel %vm351_vm0, %v678_v11, 0  ;;  %v500_v35 = vpop.f32.mrf.mxu1  ;;  %v783_v15 = vpop.permute.xlu1 %782  ;;  %vm978_vm0 = vcmp.lt.s32.totalorder %v1605_v14, 38 }
 0x122   : > { %700 = vmatpush.bf16.msrb.mxu0 %v688_v16  ;;  %714 = vmatpush.bf16.msrb.mxu1 %v691_v17  ;;  %vm1342_vm2 = vmpackc.low %vm978_vm0, %vm978_vm0 }
 0x125   : > { %1296 = vmatmul.msk.bf16.vlgmr.msrb.gmra.mxu0 %vm347_vm1, %v1362_v18  ;;  %1297 = vmatmul.msk.bf16.vlgmr.msrb.gmra.mxu1 %vm347_vm1, %v1362_v18 }
 0x128   : > { %v488_v38 = vpop.f32.mrf.mxu0 }
 0x129   : > { %v502_v39 = vpop.f32.mrf.mxu1 }
 0x12c   : > { %1278 = vmatmul.msk.bf16.vlgmr.msrb.gmra.mxu2 %vm347_vm1, %v1359_v23  ;;  %1279 = vmatmul.msk.bf16.vlgmr.msrb.gmra.mxu3 %vm347_vm1, %v1359_v23 }
 0x12d   : > { %755 = vmatpush.bf16.msrb.mxu2 %v743_v26  ;;  %769 = vmatpush.bf16.msrb.mxu3 %v746_v27 }
 0x13c   : > { %1290 = vmatmul.msk.bf16.vlgmr.msra.gmra.mxu2 %vm347_vm1, %v1361_v30  ;;  %1291 = vmatmul.msk.bf16.vlgmr.msra.gmra.mxu3 %vm347_vm1, %v1361_v30 }
 0x14c   : > { %1302 = vmatmul.msk.bf16.vlgmr.msrb.gmra.mxu2 %vm347_vm1, %v1363_v31  ;;  %1303 = vmatmul.msk.bf16.vlgmr.msrb.gmra.mxu3 %vm347_vm1, %v1363_v31  ;;  %vm1338_vm1 = vmpackc.low %vm977_vm15, %vm977_vm15 }
 0x180   : > { %v592_v42 = vpop.f32.mrf.mxu0  ;;  %v606_v43 = vpop.f32.mrf.mxu1 }
 0x188   : > { %v594_v46 = vpop.f32.mrf.mxu0  ;;  %v608_v47 = vpop.f32.mrf.mxu1 }
 0x19f   : > { %v444_v32 = vpop.f32.mrf.mxu2  ;;  %v458_v33 = vpop.f32.mrf.mxu3 }
 0x1a0   : > { %v487_v50 = vadd.f32 %v486_v34, %v444_v32  ;;  %v501_v51 = vadd.f32 %v500_v35, %v458_v33 }
 0x1a2   : > { %v702_v58 = vpop.f32.mrf.mxu0  ;;  %v716_v59 = vpop.f32.mrf.mxu1 }
 0x1a7   : > { %v446_v36 = vpop.f32.mrf.mxu2  ;;  %v460_v37 = vpop.f32.mrf.mxu3 }
 0x1a8   : > { %v489_v60 = vadd.f32 %v488_v38, %v446_v36  ;;  %v503_v61 = vadd.f32 %v502_v39, %v460_v37 }
 0x1aa   : > { %v704_v16 = vpop.f32.mrf.mxu0  ;;  %v718_v17 = vpop.f32.mrf.mxu1 }
 0x1af   : > { %v537_v40 = vpop.f32.mrf.mxu2  ;;  %v551_v41 = vpop.f32.mrf.mxu3 }
 0x1b0   : > { %v556_v52 = vadd.f32 %v537_v40, %v487_v50  ;;  %v557_v53 = vadd.f32 %v551_v41, %v501_v51  ;;  %v814_v41 = vld [vmem:[%s1799_s6] sm:$0xff] }
 0x1b2   : > { %v611_v56 = vadd.f32 %v592_v42, %v556_v52  ;;  %v612_v57 = vadd.f32 %v606_v43, %v557_v53  ;;  %v815_v42 = vld [vmem:[%s1799_s6 + $0x8] sm:$0xff]  ;;  %v1364_v43 = vld [vmem:[%s1798_s5] sm:$0xff] }
 0x1b7   : > { %v539_v44 = vpop.f32.mrf.mxu2  ;;  %v553_v45 = vpop.f32.mrf.mxu3 }
 0x1b8   : > { %v558_v0 = vadd.f32 %v539_v44, %v489_v60  ;;  %v559_v1 = vadd.f32 %v553_v45, %v503_v61 }
 0x1ba   : > { %v613_v6 = vadd.f32 %v594_v46, %v558_v0  ;;  %v614_v7 = vadd.f32 %v608_v47, %v559_v1 }
 0x1bf   : > { %v647_v48 = vpop.f32.mrf.mxu2  ;;  %v661_v49 = vpop.f32.mrf.mxu3 }
 0x1c0   : > { %v666_v62 = vadd.f32 %v647_v48, %v611_v56  ;;  %v667_v63 = vadd.f32 %v661_v49, %v612_v57  ;;  %v1365_v56 = vld [vmem:[%s1798_s5 + $0x8] sm:$0xff] }
 0x1c2   : > { %v721_v2 = vadd.f32 %v702_v58, %v666_v62  ;;  %v722_v3 = vadd.f32 %v716_v59, %v667_v63 }
 0x1c7   : > { %v649_v54 = vpop.f32.mrf.mxu2  ;;  %v663_v55 = vpop.f32.mrf.mxu3 }
 0x1c8   : > { %v668_v11 = vadd.f32 %v649_v54, %v613_v6  ;;  %v669_v12 = vadd.f32 %v663_v55, %v614_v7 }
 0x1ca   : > { %v723_v20 = vadd.f32 %v704_v16, %v668_v11  ;;  %v724_v21 = vadd.f32 %v718_v17, %v669_v12 }
 0x1cf   : > { %v757_v4 = vpop.f32.mrf.mxu2  ;;  %v771_v5 = vpop.f32.mrf.mxu3 }
 0x1d0   : > { %v776_v8 = vadd.f32 %v757_v4, %v721_v2  ;;  %v777_v9 = vadd.f32 %v771_v5, %v722_v3  ;;  %v1366_v5 = vld [vmem:[%s1798_s5 + $0x10] sm:$0xff] }
 0x1d2   : > { %v790_v18 = vadd.f32 %v783_v15, %v776_v8  ;;  %v791_v19 = vadd.f32 %v783_v15, %v777_v9 }
 0x1d4   : > { %v794_v27 = vmax.f32 %v790_v18, 0.0  ;;  %v795_v28 = vmax.f32 %v791_v19, 0.0 }
 0x1d6   : > { %v804_v33 = vsel %vm798_vm10, %v794_v27, 0.0  ;;  %v805_v34 = vsel %vm799_vm11, %v795_v28, 0.0 }
 0x1d7   : > { %v759_v23 = vpop.f32.mrf.mxu2  ;;  %v773_v24 = vpop.f32.mrf.mxu3 }
 0x1d8   : > { %v778_v25 = vadd.f32 %v759_v23, %v723_v20  ;;  %v779_v26 = vadd.f32 %v773_v24, %v724_v21 }
 0x1da   : > { %v792_v29 = vadd.f32 %v788_v22, %v778_v25  ;;  %v793_v30 = vadd.f32 %v788_v22, %v779_v26 }
 0x1dc   : > { %v796_v31 = vmax.f32 %v792_v29, 0.0  ;;  %v797_v32 = vmax.f32 %v793_v30, 0.0 }
 0x1de   : > { %v806_v35 = vsel %vm798_vm10, %v796_v31, 0.0  ;;  %v807_v36 = vsel %vm799_vm11, %v797_v32, 0.0  ;;  %v1315_v37 = vpack.c.bf16 %v796_v31, %v794_v27  ;;  %v1319_v38 = vpack.c.bf16 %v797_v32, %v795_v28 }
 0x1df   : > { %v1440_v39 = vpack.i.bf16 %v807_v36, %v805_v34  ;;  %v1445_v40 = vpack.i.bf16 %v806_v35, %v804_v33 }
 0x1e0   : > { %1316 = vmatpush.bf16.msk.msra.mxu2 %vm1314_vm12, %v1315_v37  ;;  %1320 = vmatpush.bf16.msk.msra.mxu3 %vm1318_vm13, %v1319_v38 }
 0x1e1   : > { %1441 = vrot.lane.b32.xlu1 %v1440_v39, %s1502_s29  ;;  %1446 = vrot.lane.b32.xlu2 %v1445_v40, %s1501_s28 }
 0x1e2   : > { %1436 = vrot.lane.b32.xlu0 %v1445_v40, %s1502_s29 }
 0x1e3   : > { %1317 = vmatmul.msk.bf16.vlgmr.msra.gmra.mxu2 %vm837_vm14, %v1364_v43  ;;  %1321 = vmatmul.msk.bf16.vlgmr.msra.gmra.mxu3 %vm837_vm14, %v1364_v43 }
 0x1e9   : > { %961 = vperm.xlu1 %1433, %v814_v41   ;;  %966 = vperm.xlu2 %1434, %v815_v42  }
 0x1ea   : > { %1451 = vrot.lane.b32.xlu0 %v1440_v39, %s1501_s28 }
 0x23b   : > { %v1447_v57 = vpop.permute.xlu2 %1446 }
 0x23c   : > { %v1449_v59 = vunpack.i.h.bf16 %v1447_v57  ;;  %v1448_v60 = vunpack.i.l.bf16 %v1447_v57 }
 0x243   : > { %v967_v32 = vpop.permute.xlu2 %966 }
 0x253   : > { %v1442_v44 = vpop.permute.xlu1 %1441 }
 0x254   : > { %v1444_v45 = vunpack.i.h.bf16 %v1442_v44  ;;  %v1443_v46 = vunpack.i.l.bf16 %v1442_v44  ;;  %v1437_v47 = vpop.permute.xlu0 %1436 }
 0x255   : > { %v1439_v48 = vunpack.i.h.bf16 %v1437_v47  ;;  %v1438_v49 = vunpack.i.l.bf16 %v1437_v47  ;;  %v993_v47 = vld [vmem:[%s1801_s8] sm:$0xff] }
 0x257   : > { %v827_v50 = vsel %vm416_vm6, %v1439_v48, %v1444_v45  ;;  %v829_v51 = vsel %vm416_vm6, %v1444_v45, %v1439_v48  ;;  %v826_v52 = vsel %vm416_vm6, %v1438_v49, %v1443_v46  ;;  %v828_v53 = vsel %vm416_vm6, %v1443_v46, %v1438_v49  ;;  %v994_v48 = vld [vmem:[%s1801_s8 + $0x8] sm:$0xff]  ;;  %v1367_v49 = vld [vmem:[%s1800_s7] sm:$0xff] }
 0x258   : > { %v830_v54 = vpack.c.bf16 %v827_v50, %v826_v52  ;;  %v831_v55 = vpack.c.bf16 %v829_v51, %v828_v53 }
 0x25a   : > { %848 = vmatpush.bf16.msra.mxu0 %v830_v54  ;;  %862 = vmatpush.bf16.msra.mxu1 %v831_v55 }
 0x25b   : > { %v962_v23 = vpop.permute.xlu1 %961 }
 0x25c   : > { %v1452_v58 = vpop.permute.xlu0 %1451 }
 0x25d   : > { %v1454_v61 = vunpack.i.h.bf16 %v1452_v58  ;;  %v1453_v62 = vunpack.i.l.bf16 %v1452_v58  ;;  %1308 = vmatmul.msk.bf16.vlgmr.msra.gmra.mxu0 %vm837_vm14, %v1365_v56  ;;  %1309 = vmatmul.msk.bf16.vlgmr.msra.gmra.mxu1 %vm837_vm14, %v1365_v56 }
 0x25f   : > { %v914_v63 = vsel %vm509_vm5, %v1449_v59, %v1454_v61  ;;  %v916_v0 = vsel %vm509_vm5, %v1454_v61, %v1449_v59  ;;  %v913_v1 = vsel %vm509_vm5, %v1448_v60, %v1453_v62  ;;  %v915_v2 = vsel %vm509_vm5, %v1453_v62, %v1448_v60  ;;  %v1368_v62 = vld [vmem:[%s1800_s7 + $0x8] sm:$0xff] }
 0x260   : > { %v917_v3 = vpack.c.bf16 %v914_v63, %v913_v1  ;;  %v918_v4 = vpack.c.bf16 %v916_v0, %v915_v2 }
 0x262   : > { %934 = vmatpush.bf16.msrb.mxu0 %v917_v3  ;;  %948 = vmatpush.bf16.msrb.mxu1 %v918_v4 }
 0x266   : > { %v886_v11 = vpop.f32.mrf.mxu2  ;;  %v900_v12 = vpop.f32.mrf.mxu3 }
 0x26d   : > { %1326 = vmatmul.msk.bf16.vlgmr.msrb.gmra.mxu0 %vm837_vm14, %v1366_v5  ;;  %1327 = vmatmul.msk.bf16.vlgmr.msrb.gmra.mxu1 %vm837_vm14, %v1366_v5 }
 0x26e   : > { %v888_v21 = vpop.f32.mrf.mxu2  ;;  %v902_v22 = vpop.f32.mrf.mxu3 }
 0x2da   : > { %v850_v6 = vpop.f32.mrf.mxu0  ;;  %v864_v7 = vpop.f32.mrf.mxu1 }
 0x2db   : > { %v887_v15 = vadd.f32 %v886_v11, %v850_v6  ;;  %v901_v16 = vadd.f32 %v900_v12, %v864_v7  ;;  %v1369_v12 = vld [vmem:[%s1800_s7 + $0x10] sm:$0xff] }
 0x2e2   : > { %v852_v8 = vpop.f32.mrf.mxu0  ;;  %v866_v9 = vpop.f32.mrf.mxu1 }
 0x2e3   : > { %v889_v26 = vadd.f32 %v888_v21, %v852_v8  ;;  %v903_v27 = vadd.f32 %v902_v22, %v866_v9 }
 0x2ea   : > { %v936_v17 = vpop.f32.mrf.mxu0  ;;  %v950_v18 = vpop.f32.mrf.mxu1 }
 0x2eb   : > { %v955_v19 = vadd.f32 %v936_v17, %v887_v15  ;;  %v956_v20 = vadd.f32 %v950_v18, %v901_v16 }
 0x2ed   : > { %v969_v24 = vadd.f32 %v962_v23, %v955_v19  ;;  %v970_v25 = vadd.f32 %v962_v23, %v956_v20 }
 0x2ef   : > { %v973_v33 = vmax.f32 %v969_v24, 0.0  ;;  %v974_v34 = vmax.f32 %v970_v25, 0.0 }
 0x2f1   : > { %v984_v39 = vsel %vm978_vm0, %v974_v34, 0.0  ;;  %v983_v40 = vsel %vm977_vm15, %v973_v33, 0.0 }
 0x2f2   : > { %v938_v28 = vpop.f32.mrf.mxu0  ;;  %v952_v29 = vpop.f32.mrf.mxu1 }
 0x2f3   : > { %v957_v30 = vadd.f32 %v938_v28, %v889_v26  ;;  %v958_v31 = vadd.f32 %v952_v29, %v903_v27 }
 0x2f5   : > { %v971_v35 = vadd.f32 %v967_v32, %v957_v30  ;;  %v972_v36 = vadd.f32 %v967_v32, %v958_v31 }
 0x2f7   : > { %v975_v37 = vmax.f32 %v971_v35, 0.0  ;;  %v976_v38 = vmax.f32 %v972_v36, 0.0 }
 0x2f9   : > { %v1339_v41 = vpack.c.bf16 %v975_v37, %v973_v33  ;;  %v1343_v42 = vpack.c.bf16 %v976_v38, %v974_v34  ;;  %v986_v43 = vsel %vm978_vm0, %v976_v38, 0.0  ;;  %v985_v44 = vsel %vm977_vm15, %v975_v37, 0.0 }
 0x2fa   : > { %v1460_v45 = vpack.i.bf16 %v986_v43, %v984_v39  ;;  %v1465_v46 = vpack.i.bf16 %v985_v44, %v983_v40 }
 0x2fb   : > { %1340 = vmatpush.bf16.msk.msra.mxu0 %vm1338_vm1, %v1339_v41  ;;  %1344 = vmatpush.bf16.msk.msra.mxu1 %vm1342_vm2, %v1343_v42 }
 0x2fc   : > { %1461 = vrot.lane.b32.xlu1 %v1460_v45, %s1502_s29  ;;  %1466 = vrot.lane.b32.xlu2 %v1465_v46, %s1501_s28 }
 0x2fd   : > { %1456 = vrot.lane.b32.xlu0 %v1465_v46, %s1502_s29 }
 0x2fe   : > { %1341 = vmatmul.msk.bf16.vlgmr.msra.gmra.mxu0 %vm837_vm14, %v1367_v49  ;;  %1345 = vmatmul.msk.bf16.vlgmr.msra.gmra.mxu1 %vm837_vm14, %v1367_v49 }
 0x304   : > { %1139 = vperm.xlu1 %1433, %v993_v47   ;;  %1144 = vperm.xlu2 %1434, %v994_v48  }
 0x305   : > { %1471 = vrot.lane.b32.xlu0 %v1460_v45, %s1501_s28 }
 0x356   : > { %v1467_v63 = vpop.permute.xlu2 %1466 }
 0x357   : > { %v1469_v1 = vunpack.i.h.bf16 %v1467_v63  ;;  %v1468_v2 = vunpack.i.l.bf16 %v1467_v63 }
 0x35e   : > { %v1145_v41 = vpop.permute.xlu2 %1144 }
 0x36e   : > { %v1462_v50 = vpop.permute.xlu1 %1461 }
 0x36f   : > { %v1464_v51 = vunpack.i.h.bf16 %v1462_v50  ;;  %v1463_v52 = vunpack.i.l.bf16 %v1462_v50  ;;  %v1457_v53 = vpop.permute.xlu0 %1456 }
 0x370   : > { %v1459_v54 = vunpack.i.h.bf16 %v1457_v53  ;;  %v1458_v55 = vunpack.i.l.bf16 %v1457_v53 }
 0x372   : > { %v1006_v56 = vsel %vm416_vm6, %v1459_v54, %v1464_v51  ;;  %v1008_v57 = vsel %vm416_vm6, %v1464_v51, %v1459_v54  ;;  %v1005_v58 = vsel %vm416_vm6, %v1458_v55, %v1463_v52  ;;  %v1007_v59 = vsel %vm416_vm6, %v1463_v52, %v1458_v55 }
 0x373   : > { %v1009_v60 = vpack.c.bf16 %v1006_v56, %v1005_v58  ;;  %v1010_v61 = vpack.c.bf16 %v1008_v57, %v1007_v59 }
 0x375   : > { %1026 = vmatpush.bf16.msrb.mxu2 %v1009_v60  ;;  %1040 = vmatpush.bf16.msrb.mxu3 %v1010_v61 }
 0x376   : > { %v1140_v26 = vpop.permute.xlu1 %1139 }
 0x377   : > { %v1472_v0 = vpop.permute.xlu0 %1471 }
 0x378   : > { %v1474_v3 = vunpack.i.h.bf16 %v1472_v0  ;;  %v1473_v4 = vunpack.i.l.bf16 %v1472_v0  ;;  %1332 = vmatmul.msk.bf16.vlgmr.msrb.gmra.mxu2 %vm837_vm14, %v1368_v62  ;;  %1333 = vmatmul.msk.bf16.vlgmr.msrb.gmra.mxu3 %vm837_vm14, %v1368_v62 }
 0x37a   : > { %v1092_v5 = vsel %vm509_vm5, %v1469_v1, %v1474_v3  ;;  %v1094_v6 = vsel %vm509_vm5, %v1474_v3, %v1469_v1  ;;  %v1091_v7 = vsel %vm509_vm5, %v1468_v2, %v1473_v4  ;;  %v1093_v8 = vsel %vm509_vm5, %v1473_v4, %v1468_v2 }
 0x37b   : > { %v1095_v9 = vpack.c.bf16 %v1092_v5, %v1091_v7  ;;  %v1096_v11 = vpack.c.bf16 %v1094_v6, %v1093_v8  ;;  %v1064_v19 = vpop.f32.mrf.mxu0  ;;  %v1078_v10 = vpop.f32.mrf.mxu1 }
 0x37d   : > { %1112 = vmatpush.bf16.msra.mxu2 %v1095_v9  ;;  %1126 = vmatpush.bf16.msra.mxu3 %v1096_v11 }
 0x383   : > { %v1066_v29 = vpop.f32.mrf.mxu0  ;;  %v1080_v30 = vpop.f32.mrf.mxu1 }
 0x388   : > { %1350 = vmatmul.msk.bf16.vlgmr.msra.gmra.mxu2 %vm837_vm14, %v1369_v12  ;;  %1351 = vmatmul.msk.bf16.vlgmr.msra.gmra.mxu3 %vm837_vm14, %v1369_v12 }
 0x3fb   : > { %v1028_v15 = vpop.f32.mrf.mxu2  ;;  %v1042_v16 = vpop.f32.mrf.mxu3 }
 0x3fc   : > { %v1065_v20 = vadd.f32 %v1064_v19, %v1028_v15  ;;  %v1079_v21 = vadd.f32 %v1078_v10, %v1042_v16 }
 0x403   : > { %v1030_v17 = vpop.f32.mrf.mxu2  ;;  %v1044_v18 = vpop.f32.mrf.mxu3 }
 0x404   : > { %v1067_v33 = vadd.f32 %v1066_v29, %v1030_v17  ;;  %v1081_v34 = vadd.f32 %v1080_v30, %v1044_v18 }
 0x40b   : > { %v1114_v22 = vpop.f32.mrf.mxu2  ;;  %v1128_v23 = vpop.f32.mrf.mxu3 }
 0x40c   : > { %v1133_v24 = vadd.f32 %v1114_v22, %v1065_v20  ;;  %v1134_v25 = vadd.f32 %v1128_v23, %v1079_v21 }
 0x40e   : > { %v1147_v27 = vadd.f32 %v1140_v26, %v1133_v24  ;;  %v1148_v28 = vadd.f32 %v1140_v26, %v1134_v25 }
 0x410   : > { %v1151_v31 = vmax.f32 %v1147_v27, 0.0  ;;  %v1152_v32 = vmax.f32 %v1148_v28, 0.0 }
 0x412   : > { %v1161_v35 = vsel %vm1155_vm3, %v1151_v31, 0.0  ;;  %v1162_v36 = vsel %vm1156_vm4, %v1152_v32, 0.0 }
 0x413   : > { %1165 = vst [vmem:[%s322_s30] sm:$0xff] %v1161_v35  ;;  %v1116_v37 = vpop.f32.mrf.mxu2  ;;  %v1130_v38 = vpop.f32.mrf.mxu3 }
 0x414   : > { %1166 = vst [vmem:[%s322_s30 + $0x8] sm:$0xff] %v1162_v36  ;;  %v1135_v39 = vadd.f32 %v1116_v37, %v1067_v33  ;;  %v1136_v40 = vadd.f32 %v1130_v38, %v1081_v34 }
 0x416   : > { %v1149_v42 = vadd.f32 %v1145_v41, %v1135_v39  ;;  %v1150_v43 = vadd.f32 %v1145_v41, %v1136_v40 }
 0x418   : > { %v1153_v44 = vmax.f32 %v1149_v42, 0.0  ;;  %v1154_v45 = vmax.f32 %v1150_v43, 0.0  ;;  %1175 = sbr.rel (!%p1581_p4) target bundleno = 1061 (0x425), region = 60 }
 0x41a   : > { %v1163_v46 = vsel %vm1155_vm3, %v1153_v44, 0.0  ;;  %v1164_v47 = vsel %vm1156_vm4, %v1154_v45, 0.0  ;;  %v1191_v48 = vld [vmem:[%s322_s30] sm:$0xff] (%p1581_p4) }
 0x41b   : > { %1167 = vst [vmem:[%s322_s30 + $0x10] sm:$0xff] %v1163_v46  ;;  %v1193_v49 = vld [vmem:[%s322_s30 + $0x8] sm:$0xff] (%p1581_p4) }
 0x41c   : > { %1168 = vst [vmem:[%s322_s30 + $0x18] sm:$0xff] %v1164_v47 }
 0x41d   : > { %1192 = vst [vmem:[%s1178_s20] sm:$0xff] %v1191_v48 }
 0x41e   : > { %1194 = vst [vmem:[%s1178_s20 + $0x8] sm:$0xff] %v1193_v49 }
 0x422   : > { %v1195_v50 = vld [vmem:[%s322_s30 + $0x10] sm:$0xff] }
 0x423   : > { %v1197_v13 = vld [vmem:[%s322_s30 + $0x18] sm:$0xff]  ;;  %1196 = vst [vmem:[%s1178_s20 + $0x20] sm:$0xff] %v1195_v50 }
 0x424   : > { %1198 = vst [vmem:[%s1178_s20 + $0x28] sm:$0xff] %v1197_v13 }
 0x425 PF: > { %p16_p8 = scmp.ge.s32.totalorder %s1571_s13, 4   ;;  %s1804_s30 = smov %s1493_s10 }
 0x426   : > { %s1805_s10 = smov %s1579_s16  ;;  %s1806_s11 = smov %s1571_s13 }
 0x427   :  { %18 = sbr.rel (!%p16_p8) target bundleno = 2 (0x2), region = 109 }

// kernel: forward.6
= control target key start
LH: loop header
LB: loop body
LE: loop exit
PB: predicated region body
PF: predicated region fallthrough
CT: control target
= control target key end

     0   :  { %s1726_s17 = smov 0   ;;  %s1728_s18 = smov 0   ;;  %s2082_s0 = inlined_call_operand.vmem [shape: f32[16,512], index: 0, kind: input, shape index: {}]   ;;  %s2083_s1 = inlined_call_operand.vmem [shape: bf16[1,16,16], index: 1, kind: input, shape index: {}]   ;;  %s2084_s2 = inlined_call_operand.vmem [shape: f32[16,1], index: 2, kind: input, shape index: {}]   ;;  %s2085_s3 = inlined_call_operand.vmem [shape: bf16[7,16,16], index: 3, kind: input, shape index: {}]   ;;  %s2086_s4 = inlined_call_operand.vmem [shape: f32[16,1], index: 4, kind: input, shape index: {}]   ;;  %s2087_s5 = inlined_call_operand.vmem [shape: bf16[3,8,16], index: 5, kind: input, shape index: {}]   ;;  %s2088_s6 = inlined_call_operand.vmem [shape: f32[8,1], index: 6, kind: input, shape index: {}]   ;;  %s2089_s7 = inlined_call_operand.vmem [shape: bf16[3,16,8], index: 7, kind: input, shape index: {}]   ;;  %s2090_s8 = inlined_call_operand.vmem [shape: f32[16,1], index: 8, kind: input, shape index: {}]   ;;  %s2091_s9 = inlined_call_operand.vmem [shape: bf16[1,16,16], index: 9, kind: input, shape index: {}]   ;;  %s2092_s10 = inlined_call_operand.vmem [shape: f32[16,1], index: 10, kind: input, shape index: {}]   ;;  %s2093_s11 = inlined_call_operand.vmem [shape: f32[16,512], index: 11, kind: output, shape index: {}]  }
   0x1   :  { %s1730_s19 = smov 0  }
   0x2 LB: > { %s1386_s20 = sadd.s32 4294967295, %s1657_s19   ;;  %s1743_s21 = sadd.s32 1, %s1657_s19   ;;  %s1657_s19 = sphi %s1730_s19, %s2105_s19   ;;  %s1653_s18 = sphi %s1728_s18, %s2104_s18   ;;  %s1649_s17 = sphi %s1726_s17, %s2103_s17  }
   0x3   : > { %s25_s22 = ssub.s32 %s1657_s19, %s1743_s21  ;;  %s28_s23 = sadd.s32 1, %s1653_s18 }
   0x4   : > { %p26_p0 = scmp.eq.s32.totalorder %s25_s22, 0  ;;  %p35_p1 = scmp.ne.s32.totalorder %s1653_s18, %s1649_s17 }
   0x5   : > { %p36_p2 = scmp.eq.s32.totalorder %s1657_s19, 0  ;;  %p275_p3 = scmp.eq.s32.totalorder %s1386_s20, 1 }
   0x6   : > { %s1754_s24 = scalar_select %p26_p0, %s1653_s18, %s28_s23  }
   0x7   : > { %p37_p4 = por %p36_p2, %p35_p1  ;;  %p1756_p5 = por %p275_p3, %p35_p1 }
   0x8   : > { %p1389_p6 = scmp.ge.s32.totalorder %s1657_s19, 2 }
   0xa   : > { %327 = sbr.rel (%p1389_p6) target bundleno = 23 (0x17), region = 56 }
   0xf   : > { %330 = sbr.rel (!%p37_p4) target bundleno = 23 (0x17), region = 60  ;;  %s332_s26 = sand.u32 (%p37_p4), 1, %s1653_s18  }
  0x10   : > { %s1497_s27 = sshll.u32 (%p37_p4), %s1657_s19, 4  ;;  %s1390_s28 = sshll.u32 (%p37_p4), %s332_s26, 5 }
  0x11   : > { %s337_s12 = scalar_lea.vmem (%p37_p4), %s2082_s0, %s1497_s27  ;;  %s334_s13 = scalar_lea.vmem (%p37_p4), [#allocation2], %s1390_s28 }
  0x12   : > { %v350_v0 = vld [vmem:[%s337_s12] sm:$0xff] (%p37_p4)  ;;  %v352_v1 = vld [vmem:[%s337_s12 + $0x8] sm:$0xff] (%p37_p4) }
  0x13   : > { %v354_v2 = vld [vmem:[%s337_s12 + $0x20] sm:$0xff] (%p37_p4)  ;;  %351 = vst [vmem:[%s334_s13] sm:$0xff] (%p37_p4), %v350_v0  ;;  %v356_v3 = vld [vmem:[%s337_s12 + $0x28] sm:$0xff] (%p37_p4) }
  0x14   : > { %353 = vst [vmem:[%s334_s13 + $0x8] sm:$0xff] %v352_v1 }
  0x15   : > { %355 = vst [vmem:[%s334_s13 + $0x10] sm:$0xff] %v354_v2 }
  0x16   : > { %357 = vst [vmem:[%s334_s13 + $0x18] sm:$0xff] %v356_v3 }
  0x17 PF: > { %p1393_p7 = scmp.ge.s32.totalorder %s1657_s19, 1  ;;  %p362_p8 = scmp.lt.s32.totalorder %s1657_s19, 3 }
  0x19   : > { %p363_p9 = pnand %p1393_p7, %p362_p8 }
  0x1a   : > { %s369_s14 = sand.u32 (!%p363_p9), 1, %s1649_s17   ;;  %s1660_s29 = smov (!%p363_p9), 1  }
  0x1b   : > { %366 = sbr.rel (%p363_p9) target bundleno = 812 (0x32c), region = 83  ;;  %s1772_s22 = sshll.u32 (!%p363_p9), %s369_s14, 5 }
  0x1c   : > { %s371_s23 = scalar_lea.vmem (!%p363_p9), [#allocation2], %s1772_s22  ;;  %s1661_s30 = smov (!%p363_p9), 3  }
  0x1d   : > { %s1662_s12 = smov (!%p363_p9), 2   ;;  %s1663_s13 = smov (!%p363_p9), 127  }
  0x1e   : > { %s1664_s14 = smov (!%p363_p9), 125   ;;  %s1665_s15 = smov (!%p363_p9), 126  }
  0x1f   : > { %s406_s16 = scalar_lea.vmem (!%p363_p9), [#allocation3], %s1772_s22 }
  0x20   : > { %v421_v4 = vld [vmem:[%s2084_s2] sm:$0xff]  ;;  %v1659_v5 = vmov 0   ;;  %v1777_v7 = vld [vmem:[%s371_s23 + $0x10] sm:$0xff]  ;;  %v1779_v8 = vld [vmem:[%s371_s23 + $0x8] sm:$0xff]  ;;  %vm440_vm0 = vcmask 130048   ;;  %v410_v14 = vlaneseq  ;;  %vm1019_vm12 = vcmask 1043456  }
  0x21   : > { %1542 = vset.pattern.permute.xlu0 %v1659_v5  ;;  %1603 = vset.pattern.permute.xlu2 %v1659_v5  ;;  %v1775_v6 = vld [vmem:[%s371_s23] sm:$0xff]  ;;  %v1783_v10 = vld [vmem:[%s371_s23 + $0x18] sm:$0xff]  ;;  %v422_v13 = vld [vmem:[%s2084_s2 + $0x8] sm:$0xff]  ;;  %vm1015_vm13 = vcmask 64512   ;;  %s1510_s22 = sshll.u32 (%p1756_p5), %s1386_s20, 4 }
  0x22   : > { %427 = vperm.xlu0 %1542, %v421_v4   ;;  %1634 = vset.pattern.permute.xlu1 %v1659_v5  ;;  %v423_v9 = vpack.c.bf16 %v1777_v7, %v1775_v6  ;;  %v424_v11 = vpack.c.bf16 %v1783_v10, %v1779_v8  ;;  %v1498_v12 = vld [vmem:[%s2083_s1] sm:$0xff]  ;;  %v1795_v15 = vand.u32 127, %v410_v14  ;;  %v1269_v20 = vshrl.u32 %v410_v14, 7  ;;  %v1502_v63 = vld [vmem:[%s2085_s3 + $0x18] sm:$0xff]  ;;  %s1306_s26 = scalar_lea.vmem (%p1756_p5), %s2093_s11, %s1510_s22 }
  0x23   : > { %v1499_v60 = vld [vmem:[%s2085_s3] sm:$0xff] }
  0x24   : > { %451 = vmatpush.bf16.msra.mxu0 %v423_v9  ;;  %465 = vmatpush.bf16.msra.mxu1 %v424_v11  ;;  %v412_v16 = vadd.s32 128, %v1795_v15  ;;  %v413_v18 = vand.u32 63, %v1795_v15  ;;  %vm1271_vm3 = vcmp.lt.s32.totalorder %v1269_v20, 4  ;;  %vm510_vm4 = vcmp.lt.s32.totalorder %v1795_v15, 3 }
  0x25   : > { %vm525_vm7 = vcmp.lt.s32.totalorder %v1795_v15, 2  ;;  %vm709_vm8 = vcmp.lt.s32.totalorder %v1795_v15, 127  ;;  %vm612_vm9 = vcmp.lt.s32.totalorder %v1795_v15, 1  ;;  %vm764_vm10 = vcmp.lt.s32.totalorder %v1795_v15, 126 }
  0x26   : > { %v414_v19 = vand.u32 63, %v412_v16  ;;  %vm1799_vm1 = vcmp.lt.s32.totalorder %v413_v18, 12  ;;  %v1500_v18 = vld [vmem:[%s2085_s3 + $0x8] sm:$0xff]  ;;  %vm819_vm11 = vcmp.lt.s32.totalorder %v1795_v15, 125 }
  0x27   : > { %1400 = vmatmul.msk.bf16.vlgmr.msra.gmra.mxu0 %vm440_vm0, %v1498_v12  ;;  %1401 = vmatmul.msk.bf16.vlgmr.msra.gmra.mxu1 %vm440_vm0, %v1498_v12  ;;  %vm1831_vm5 = vmpackc.low %vm1799_vm1, %vm1799_vm1 }
  0x28   : > { %vm1803_vm2 = vcmp.lt.s32.totalorder %v414_v19, 12 }
  0x29   : > { %vm1838_vm6 = vmpackc.low %vm1803_vm2, %vm1803_vm2 }
  0x2a   : > { %432 = vperm.xlu0 %1542, %v422_v13  }
  0x94   : > { %v428_v17 = vpop.permute.xlu0 %427 }
  0x9c   : > { %v433_v33 = vpop.permute.xlu0 %432 }
  0xa4   : > { %v453_v21 = vpop.f32.mrf.mxu0  ;;  %v467_v23 = vpop.f32.mrf.mxu1 }
  0xa5   : > { %v454_v22 = vadd.f32 %v453_v21, %v428_v17  ;;  %v468_v25 = vadd.f32 %v467_v23, %v428_v17 }
  0xa7   : > { %v472_v26 = vmax.f32 %v454_v22, 0.0  ;;  %v473_v28 = vmax.f32 %v468_v25, 0.0 }
  0xa9   : > { %v482_v29 = vsel %vm1799_vm1, %v472_v26, 0.0  ;;  %v483_v30 = vsel %vm1803_vm2, %v473_v28, 0.0 }
  0xaa   : > { %v1811_v31 = vsel %vm1271_vm3, %v482_v29, 0.0  ;;  %v1813_v32 = vsel %vm1271_vm3, %v483_v30, 0.0 }
  0xac   : > { %v455_v34 = vpop.f32.mrf.mxu0  ;;  %v469_v36 = vpop.f32.mrf.mxu1 }
  0xad   : > { %v456_v35 = vadd.f32 %v455_v34, %v433_v33  ;;  %v470_v37 = vadd.f32 %v469_v36, %v433_v33 }
  0xaf   : > { %v474_v38 = vmax.f32 %v456_v35, 0.0  ;;  %v475_v39 = vmax.f32 %v470_v37, 0.0 }
  0xb1   : > { %v484_v40 = vsel %vm1799_vm1, %v474_v38, 0.0  ;;  %v1817_v41 = vpack.c.bf16 %v474_v38, %v472_v26  ;;  %v1819_v42 = vpack.c.bf16 %v475_v39, %v473_v28  ;;  %v485_v44 = vsel %vm1803_vm2, %v475_v39, 0.0 }
  0xb2   : > { %v1563_v43 = vpack.i.bf16 %v484_v40, %v482_v29  ;;  %v1578_v45 = vpack.i.bf16 %v485_v44, %v483_v30 }
  0xb4   : > { %1564 = vrot.lane.b32.xlu0 %v1563_v43, %s1660_s29  ;;  %1554 = vrot.lane.b32.xlu2 %v1563_v43, %s1661_s30 }
  0xb5   : > { %1544 = vrot.lane.b32.xlu1 %v1563_v43, %s1662_s12 }
  0xbc   : > { %1579 = vrot.lane.b32.xlu0 %v1578_v45, %s1663_s13  ;;  %1559 = vrot.lane.b32.xlu2 %v1578_v45, %s1661_s30 }
  0xbd   : > { %1549 = vrot.lane.b32.xlu1 %v1578_v45, %s1662_s12 }
  0xc4   : > { %1594 = vrot.lane.b32.xlu0 %v1563_v43, %s1664_s14  ;;  %1574 = vrot.lane.b32.xlu2 %v1563_v43, %s1663_s13 }
  0xc5   : > { %1569 = vrot.lane.b32.xlu1 %v1578_v45, %s1660_s29 }
  0xcc   : > { %1589 = vrot.lane.b32.xlu2 %v1578_v45, %s1665_s15 }
  0xcd   : > { %1584 = vrot.lane.b32.xlu1 %v1563_v43, %s1665_s15 }
  0xd5   : > { %1599 = vrot.lane.b32.xlu1 %v1578_v45, %s1664_s14 }
 0x10e   : > { %v1555_v46 = vpop.permute.xlu2 %1554 }
 0x10f   : > { %v1557_v48 = vunpack.i.h.bf16 %v1555_v46  ;;  %v1556_v49 = vunpack.i.l.bf16 %v1555_v46 }
 0x116   : > { %v1560_v47 = vpop.permute.xlu2 %1559 }
 0x117   : > { %v1562_v50 = vunpack.i.h.bf16 %v1560_v47  ;;  %v1561_v51 = vunpack.i.l.bf16 %v1560_v47 }
 0x119   : > { %v513_v52 = vsel %vm510_vm4, %v1561_v51, %v1556_v49  ;;  %v514_v53 = vsel %vm510_vm4, %v1562_v50, %v1557_v48  ;;  %v511_v54 = vsel %vm510_vm4, %v1556_v49, %v1561_v51  ;;  %v512_v55 = vsel %vm510_vm4, %v1557_v48, %v1562_v50 }
 0x11a   : > { %v515_v57 = vpack.c.bf16 %v514_v53, %v513_v52  ;;  %v516_v58 = vpack.c.bf16 %v512_v55, %v511_v54 }
 0x11c   : > { %583 = vmatpush.bf16.msrb.mxu0 %v515_v57  ;;  %597 = vmatpush.bf16.msrb.mxu1 %v516_v58 }
 0x11e   : > { %v1575_v12 = vpop.permute.xlu2 %1574 }
 0x11f   : > { %1412 = vmatmul.msk.bf16.vlgmr.msrb.gmra.mxu0 %vm440_vm0, %v1499_v60  ;;  %1413 = vmatmul.msk.bf16.vlgmr.msrb.gmra.mxu1 %vm440_vm0, %v1499_v60  ;;  %v1577_v21 = vunpack.i.h.bf16 %v1575_v12  ;;  %v1576_v22 = vunpack.i.l.bf16 %v1575_v12  ;;  %v1501_v60 = vld [vmem:[%s2085_s3 + $0x10] sm:$0xff]  ;;  %v1503_v12 = vld [vmem:[%s2085_s3 + $0x20] sm:$0xff] }
 0x120   : > { %1426 = vmatpush.bf16.msk.msra.mxu0 %vm1831_vm5, %v1817_v41  ;;  %1430 = vmatpush.bf16.msk.msra.mxu1 %vm1838_vm6, %v1819_v42 }
 0x126   : > { %v1565_v62 = vpop.permute.xlu0 %1564  ;;  %v1590_v46 = vpop.permute.xlu2 %1589 }
 0x127   : > { %v1545_v61 = vpop.permute.xlu1 %1544  ;;  %v1567_v25 = vunpack.i.h.bf16 %v1565_v62  ;;  %v1566_v26 = vunpack.i.l.bf16 %v1565_v62  ;;  %v1592_v48 = vunpack.i.h.bf16 %v1590_v46  ;;  %v1591_v49 = vunpack.i.l.bf16 %v1590_v46 }
 0x128   : > { %v1547_v1 = vunpack.i.h.bf16 %v1545_v61  ;;  %v1546_v2 = vunpack.i.l.bf16 %v1545_v61  ;;  %v1504_v61 = vld [vmem:[%s2085_s3 + $0x28] sm:$0xff] }
 0x12e   : > { %v1580_v5 = vpop.permute.xlu0 %1579 }
 0x12f   : > { %v1550_v0 = vpop.permute.xlu1 %1549  ;;  %1427 = vmatmul.msk.bf16.vlgmr.msra.gmra.mxu0 %vm440_vm0, %v1502_v63  ;;  %1431 = vmatmul.msk.bf16.vlgmr.msra.gmra.mxu1 %vm440_vm0, %v1502_v63  ;;  %v1582_v19 = vunpack.i.h.bf16 %v1580_v5  ;;  %v1581_v20 = vunpack.i.l.bf16 %v1580_v5 }
 0x130   : > { %v1552_v3 = vunpack.i.h.bf16 %v1550_v0  ;;  %v1551_v4 = vunpack.i.l.bf16 %v1550_v0 }
 0x131   : > { %v710_v30 = vsel %vm709_vm8, %v1576_v22, %v1581_v20  ;;  %v711_v33 = vsel %vm709_vm8, %v1577_v21, %v1582_v19  ;;  %v712_v34 = vsel %vm709_vm8, %v1581_v20, %v1576_v22  ;;  %v713_v35 = vsel %vm709_vm8, %v1582_v19, %v1577_v21  ;;  %v998_v20 = vld [vmem:[%s2090_s8] sm:$0xff]  ;;  %v1211_v22 = vld [vmem:[%s2092_s10 + $0x8] sm:$0xff] }
 0x132   : > { %v528_v9 = vsel %vm525_vm7, %v1551_v4, %v1546_v2  ;;  %v529_v11 = vsel %vm525_vm7, %v1552_v3, %v1547_v1  ;;  %v526_v14 = vsel %vm525_vm7, %v1546_v2, %v1551_v4  ;;  %v527_v16 = vsel %vm525_vm7, %v1547_v1, %v1552_v3  ;;  %v888_v21 = vld [vmem:[%s2087_s5] sm:$0xf] }
 0x133   : > { %v530_v13 = vpack.c.bf16 %v529_v11, %v528_v9  ;;  %v531_v17 = vpack.c.bf16 %v527_v16, %v526_v14  ;;  %v714_v44 = vpack.c.bf16 %v711_v33, %v710_v30  ;;  %v715_v45 = vpack.c.bf16 %v713_v35, %v712_v34  ;;  %v891_v14 = vld [vmem:[%s2088_s6] sm:$0xff] }
 0x134   : > { %983 = vperm.xlu2 %1603, %v891_v14   ;;  %v1915_v16 = vpack.i.bf16 %v1777_v7, %v1775_v6  ;;  %v1927_v19 = vpack.i.bf16 %v1783_v10, %v1779_v8 }
 0x135   : > { %547 = vmatpush.bf16.msra.mxu2 %v530_v13  ;;  %561 = vmatpush.bf16.msra.mxu3 %v531_v17  ;;  %v889_v13 = vld [vmem:[%s2087_s5 + $0x4] sm:$0xf]  ;;  %v1505_v17 = vld [vmem:[%s2085_s3 + $0x30] sm:$0xff] }
 0x136   : > { %v1595_v62 = vpop.permute.xlu0 %1594 }
 0x137   : > { %v1570_v23 = vpop.permute.xlu1 %1569  ;;  %v1597_v0 = vunpack.i.h.bf16 %v1595_v62  ;;  %v1596_v1 = vunpack.i.l.bf16 %v1595_v62 }
 0x138   : > { %v1572_v28 = vunpack.i.h.bf16 %v1570_v23  ;;  %v1571_v29 = vunpack.i.l.bf16 %v1570_v23  ;;  %1406 = vmatmul.msk.bf16.vlgmr.msra.gmra.mxu2 %vm440_vm0, %v1500_v18  ;;  %1407 = vmatmul.msk.bf16.vlgmr.msra.gmra.mxu3 %vm440_vm0, %v1500_v18  ;;  %v890_v18 = vld [vmem:[%s2087_s5 + $0x8] sm:$0xf] }
 0x13a   : > { %v615_v36 = vsel %vm612_vm9, %v1571_v29, %v1566_v26  ;;  %v616_v37 = vsel %vm612_vm9, %v1572_v28, %v1567_v25  ;;  %v613_v38 = vsel %vm612_vm9, %v1566_v26, %v1571_v29  ;;  %v614_v39 = vsel %vm612_vm9, %v1567_v25, %v1572_v28 }
 0x13b   : > { %v617_v40 = vpack.c.bf16 %v616_v37, %v615_v36  ;;  %v618_v43 = vpack.c.bf16 %v614_v39, %v613_v38 }
 0x13c   : > { %1615 = vrot.lane.b32.xlu2 %v1915_v16, %s1660_s29 }
 0x13d   : > { %634 = vmatpush.bf16.msrb.mxu2 %v617_v40  ;;  %648 = vmatpush.bf16.msrb.mxu3 %v618_v43 }
 0x13f   : > { %v1585_v47 = vpop.permute.xlu1 %1584 }
 0x140   : > { %v1587_v50 = vunpack.i.h.bf16 %v1585_v47  ;;  %v1586_v51 = vunpack.i.l.bf16 %v1585_v47 }
 0x141   : > { %731 = vmatpush.bf16.msra.mxu2 %v714_v44  ;;  %745 = vmatpush.bf16.msra.mxu3 %v715_v45 }
 0x142   : > { %v766_v52 = vsel %vm764_vm10, %v1587_v50, %v1592_v48  ;;  %v768_v53 = vsel %vm764_vm10, %v1592_v48, %v1587_v50  ;;  %v765_v54 = vsel %vm764_vm10, %v1586_v51, %v1591_v49  ;;  %v767_v55 = vsel %vm764_vm10, %v1591_v49, %v1586_v51 }
 0x143   : > { %v769_v57 = vpack.c.bf16 %v766_v52, %v765_v54  ;;  %v770_v58 = vpack.c.bf16 %v768_v53, %v767_v55 }
 0x144   : > { %1630 = vrot.lane.b32.xlu2 %v1927_v19, %s1663_s13 }
 0x145   : > { %786 = vmatpush.bf16.msrb.mxu0 %v769_v57  ;;  %800 = vmatpush.bf16.msrb.mxu1 %v770_v58 }
 0x147   : > { %v1600_v63 = vpop.permute.xlu1 %1599 }
 0x148   : > { %v1602_v2 = vunpack.i.h.bf16 %v1600_v63  ;;  %v1601_v3 = vunpack.i.l.bf16 %v1600_v63  ;;  %1418 = vmatmul.msk.bf16.vlgmr.msrb.gmra.mxu2 %vm440_vm0, %v1501_v60  ;;  %1442 = vmatmul.msk.bf16.vlgmr.msrb.gmra.mxu0 %vm440_vm0, %v1504_v61 }
 0x149   : > { %1452 = vmatpush.bf16.msk.msra.mxu0 %vm1831_vm5, %v1817_v41  ;;  %1456 = vmatpush.bf16.msk.msra.mxu1 %vm1838_vm6, %v1819_v42 }
 0x14a   : > { %1419 = vmatmul.msk.bf16.vlgmr.msrb.gmra.mxu3 %vm440_vm0, %v1501_v60  ;;  %1443 = vmatmul.msk.bf16.vlgmr.msrb.gmra.mxu1 %vm440_vm0, %v1504_v61  ;;  %v821_v41 = vsel %vm819_vm11, %v1597_v0, %v1602_v2  ;;  %v823_v4 = vsel %vm819_vm11, %v1602_v2, %v1597_v0  ;;  %v820_v5 = vsel %vm819_vm11, %v1596_v1, %v1601_v3 }
 0x14b   : > { %v822_v9 = vsel %vm819_vm11, %v1601_v3, %v1596_v1  ;;  %v824_v42 = vpack.c.bf16 %v821_v41, %v820_v5 }
 0x14c   : > { %v825_v11 = vpack.c.bf16 %v823_v4, %v822_v9  ;;  %1152 = vperm.xlu2 %1603, %v998_v20  }
 0x14d   : > { %960 = vmatpush.bf16.msrb.mxu0 %v714_v44  ;;  %973 = vmatpush.bf16.msrb.mxu1 %v715_v45 }
 0x14e   : > { %841 = vmatpush.bf16.msrb.mxu2 %v824_v42  ;;  %855 = vmatpush.bf16.msrb.mxu3 %v825_v11 }
 0x154   : > { %1221 = vperm.xlu2 %1603, %v1211_v22  }
 0x158   : > { %1436 = vmatmul.msk.bf16.vlgmr.msra.gmra.mxu2 %vm440_vm0, %v1503_v12  ;;  %1453 = vmatmul.msk.bf16.vlgmr.msra.gmra.mxu0 %vm440_vm0, %v889_v13 }
 0x159   : > { %931 = vmatpush.bf16.msra.mxu2 %v617_v40 }
 0x15a   : > { %1437 = vmatmul.msk.bf16.vlgmr.msra.gmra.mxu3 %vm440_vm0, %v1503_v12  ;;  %1457 = vmatmul.msk.bf16.vlgmr.msra.gmra.mxu1 %vm440_vm0, %v889_v13 }
 0x15b   : > { %944 = vmatpush.bf16.msra.mxu3 %v618_v43 }
 0x168   : > { %1448 = vmatmul.msk.bf16.vlgmr.msrb.gmra.mxu2 %vm440_vm0, %v1505_v17  ;;  %1460 = vmatmul.msk.bf16.vlgmr.msrb.gmra.mxu0 %vm440_vm0, %v890_v18 }
 0x16a   : > { %1449 = vmatmul.msk.bf16.vlgmr.msrb.gmra.mxu3 %vm440_vm0, %v1505_v17  ;;  %1461 = vmatmul.msk.bf16.vlgmr.msrb.gmra.mxu1 %vm440_vm0, %v890_v18 }
 0x178   : > { %1458 = vmatmul.msk.bf16.vlgmr.msra.gmra.mxu2 %vm440_vm0, %v888_v21 }
 0x17a   : > { %1459 = vmatmul.msk.bf16.vlgmr.msra.gmra.mxu3 %vm440_vm0, %v888_v21 }
 0x19c   : > { %v585_v23 = vpop.f32.mrf.mxu0  ;;  %v599_v25 = vpop.f32.mrf.mxu1 }
 0x1a4   : > { %v587_v26 = vpop.f32.mrf.mxu0  ;;  %v601_v28 = vpop.f32.mrf.mxu1 }
 0x1ac   : > { %v678_v29 = vpop.f32.mrf.mxu0  ;;  %v692_v30 = vpop.f32.mrf.mxu1 }
 0x1b4   : > { %v680_v34 = vpop.f32.mrf.mxu0  ;;  %v694_v37 = vpop.f32.mrf.mxu1 }
 0x1bb   : > { %v549_v33 = vpop.f32.mrf.mxu2  ;;  %v563_v36 = vpop.f32.mrf.mxu3 }
 0x1bc   : > { %v586_v35 = vadd.f32 %v585_v23, %v549_v33  ;;  %v600_v38 = vadd.f32 %v599_v25, %v563_v36 }
 0x1c3   : > { %v551_v39 = vpop.f32.mrf.mxu2  ;;  %v565_v43 = vpop.f32.mrf.mxu3 }
 0x1c4   : > { %v588_v40 = vadd.f32 %v587_v26, %v551_v39  ;;  %v602_v44 = vadd.f32 %v601_v28, %v565_v43  ;;  %v984_v43 = vpop.permute.xlu2 %983 }
 0x1c5   : > { %v788_v45 = vpop.f32.mrf.mxu0 }
 0x1c7   : > { %v802_v46 = vpop.f32.mrf.mxu1 }
 0x1cb   : > { %v636_v47 = vpop.f32.mrf.mxu2 }
 0x1cc   : > { %v655_v48 = vadd.f32 %v636_v47, %v586_v35 }
 0x1cd   : > { %v650_v49 = vpop.f32.mrf.mxu3  ;;  %v790_v51 = vpop.f32.mrf.mxu0 }
 0x1ce   : > { %v656_v50 = vadd.f32 %v650_v49, %v600_v38  ;;  %v697_v52 = vadd.f32 %v678_v29, %v655_v48 }
 0x1cf   : > { %v804_v53 = vpop.f32.mrf.mxu1 }
 0x1d0   : > { %v698_v54 = vadd.f32 %v692_v30, %v656_v50 }
 0x1d3   : > { %v638_v55 = vpop.f32.mrf.mxu2 }
 0x1d4   : > { %v657_v57 = vadd.f32 %v638_v55, %v588_v40 }
 0x1d5   : > { %v652_v58 = vpop.f32.mrf.mxu3  ;;  %v904_v61 = vpop.f32.mrf.mxu0 }
 0x1d6   : > { %v658_v60 = vadd.f32 %v652_v58, %v602_v44  ;;  %v699_v62 = vadd.f32 %v680_v34, %v657_v57 }
 0x1d7   : > { %v917_v0 = vpop.f32.mrf.mxu1 }
 0x1d8   : > { %v700_v63 = vadd.f32 %v694_v37, %v658_v60  ;;  %v1507_v60 = vld [vmem:[%s2089_s7 + $0x8] sm:$0xff] }
 0x1db   : > { %v733_v1 = vpop.f32.mrf.mxu2 }
 0x1dc   : > { %v752_v2 = vadd.f32 %v733_v1, %v697_v52 }
 0x1dd   : > { %v747_v3 = vpop.f32.mrf.mxu3  ;;  %v906_v4 = vpop.f32.mrf.mxu0 }
 0x1de   : > { %v753_v41 = vadd.f32 %v747_v3, %v698_v54  ;;  %v807_v5 = vadd.f32 %v788_v45, %v752_v2 }
 0x1df   : > { %v919_v42 = vpop.f32.mrf.mxu1 }
 0x1e0   : > { %v808_v9 = vadd.f32 %v802_v46, %v753_v41 }
 0x1e3   : > { %v735_v11 = vpop.f32.mrf.mxu2 }
 0x1e4   : > { %v754_v12 = vadd.f32 %v735_v11, %v699_v62  ;;  %v500_v62 = vld [vmem:[%s2086_s4] sm:$0xff] }
 0x1e5   : > { %v749_v13 = vpop.f32.mrf.mxu3  ;;  %v962_v17 = vpop.f32.mrf.mxu0 }
 0x1e6   : > { %v755_v14 = vadd.f32 %v749_v13, %v700_v63  ;;  %v809_v18 = vadd.f32 %v790_v51, %v754_v12  ;;  %v999_v63 = vld [vmem:[%s2090_s8 + $0x8] sm:$0xff] }
 0x1e7   : > { %v975_v21 = vpop.f32.mrf.mxu1 }
 0x1e8   : > { %v810_v20 = vadd.f32 %v804_v53, %v755_v14 }
 0x1eb   : > { %v843_v22 = vpop.f32.mrf.mxu2 }
 0x1ec   : > { %v1946_v23 = vadd.f32 %v843_v22, %v807_v5 }
 0x1ed   : > { %v857_v25 = vpop.f32.mrf.mxu3  ;;  %v964_v28 = vpop.f32.mrf.mxu0 }
 0x1ee   : > { %v1948_v26 = vadd.f32 %v857_v25, %v808_v9  ;;  %v1506_v28 = vld [vmem:[%s2089_s7] sm:$0xff] }
 0x1ef   : > { %v977_v29 = vpop.f32.mrf.mxu1 }
 0x1f3   : > { %v845_v30 = vpop.f32.mrf.mxu2 }
 0x1f4   : > { %v1950_v33 = vadd.f32 %v845_v30, %v809_v18 }
 0x1f5   : > { %v859_v34 = vpop.f32.mrf.mxu3 }
 0x1f6   : > { %v1952_v35 = vadd.f32 %v859_v34, %v810_v20  ;;  %v1508_v34 = vld [vmem:[%s2089_s7 + $0x10] sm:$0xff] }
 0x1fb   : > { %v933_v36 = vpop.f32.mrf.mxu2 }
 0x1fc   : > { %v934_v37 = vadd.f32 %v933_v36, %v904_v61  ;;  %v501_v61 = vld [vmem:[%s2086_s4 + $0x8] sm:$0xff] }
 0x1fd   : > { %v946_v38 = vpop.f32.mrf.mxu3 }
 0x1fe   : > { %v947_v39 = vadd.f32 %v946_v38, %v917_v0  ;;  %v979_v40 = vadd.f32 %v962_v17, %v934_v37 }
 0x200   : > { %v980_v44 = vadd.f32 %v975_v21, %v947_v39  ;;  %v986_v45 = vadd.f32 %v984_v43, %v979_v40 }
 0x202   : > { %v987_v46 = vadd.f32 %v984_v43, %v980_v44  ;;  %v988_v47 = vmax.f32 %v986_v45, 0.0 }
 0x203   : > { %v935_v49 = vpop.f32.mrf.mxu2 }
 0x204   : > { %v989_v48 = vmax.f32 %v987_v46, 0.0  ;;  %v990_v51 = vsel %vm1799_vm1, %v988_v47, 0.0 }
 0x205   : > { %v948_v50 = vpop.f32.mrf.mxu3  ;;  %v1008_v53 = vpack.c.bf16 %v990_v51, %v990_v51 }
 0x206   : > { %v991_v52 = vsel %vm1803_vm2, %v989_v48, 0.0 }
 0x207   : > { %v1609_v54 = vpack.i.bf16 %v991_v52, %v990_v51  ;;  %v1009_v55 = vpack.c.bf16 %v991_v52, %v991_v52  ;;  %v1021_v57 = vsel %vm1019_vm12, %v1008_v53, 0 }
 0x208   : > { %1033 = vmatpush.bf16.msrb.mxu2 %v1021_v57 }
 0x209   : > { %1610 = vrot.lane.b32.xlu1 %v1609_v54, %s1663_s13  ;;  %1605 = vrot.lane.b32.xlu0 %v1609_v54, %s1660_s29  ;;  %v1024_v58 = vsel %vm1019_vm12, %v1009_v55, 0 }
 0x20a   : > { %1047 = vmatpush.bf16.msrb.mxu3 %v1024_v58 }
 0x20b   : > { %1466 = vmatmul.msk.bf16.vlgmr.msrb.gmra.mxu2 %vm1015_vm13, %v1507_v60 }
 0x20d   : > { %1467 = vmatmul.msk.bf16.vlgmr.msrb.gmra.mxu3 %vm1015_vm13, %v1507_v60 }
 0x211   : > { %1625 = vrot.lane.b32.xlu1 %v1915_v16, %s1663_s13  ;;  %1620 = vrot.lane.b32.xlu0 %v1927_v19, %s1660_s29  ;;  %v1210_v16 = vld [vmem:[%s2092_s10] sm:$0xff]  ;;  %v1616_v19 = vpop.permute.xlu2 %1615 }
 0x212   : > { %v1618_v36 = vunpack.i.h.bf16 %v1616_v19  ;;  %v1617_v37 = vunpack.i.l.bf16 %v1616_v19 }
 0x219   : > { %873 = vperm.xlu1 %1634, %v501_v61   ;;  %868 = vperm.xlu0 %1542, %v500_v62   ;;  %v1631_v18 = vpop.permute.xlu2 %1630 }
 0x21a   : > { %v1633_v29 = vunpack.i.h.bf16 %v1631_v18  ;;  %v1632_v30 = vunpack.i.l.bf16 %v1631_v18 }
 0x221   : > { %1157 = vperm.xlu0 %1542, %v999_v63   ;;  %1216 = vperm.xlu1 %1634, %v1210_v16  }
 0x27b   : > { %v1611_v0 = vpop.permute.xlu1 %1610  ;;  %v1606_v1 = vpop.permute.xlu0 %1605 }
 0x27c   : > { %v1613_v2 = vunpack.i.h.bf16 %v1611_v0  ;;  %v1612_v3 = vunpack.i.l.bf16 %v1611_v0  ;;  %v1608_v41 = vunpack.i.h.bf16 %v1606_v1  ;;  %v1607_v4 = vunpack.i.l.bf16 %v1606_v1 }
 0x27e   : > { %v1005_v5 = vsel %vm612_vm9, %v1608_v41, %v1607_v4  ;;  %v1004_v9 = vsel %vm612_vm9, %v1607_v4, %v1608_v41  ;;  %v1100_v42 = vsel %vm709_vm8, %v1612_v3, %v1613_v2  ;;  %v1101_v11 = vsel %vm709_vm8, %v1613_v2, %v1612_v3 }
 0x27f   : > { %v1006_v12 = vpack.c.bf16 %v1005_v5, %v1005_v5  ;;  %v1007_v13 = vpack.c.bf16 %v1004_v9, %v1004_v9  ;;  %v1102_v14 = vpack.c.bf16 %v1100_v42, %v1100_v42  ;;  %v1103_v17 = vpack.c.bf16 %v1101_v11, %v1101_v11 }
 0x281   : > { %v1063_v20 = vsel %vm1019_vm12, %v1006_v12, 0  ;;  %v1066_v21 = vsel %vm1019_vm12, %v1007_v13, 0  ;;  %v1113_v22 = vsel %vm1019_vm12, %v1102_v14, 0  ;;  %v1116_v25 = vsel %vm1019_vm12, %v1103_v17, 0 }
 0x282   : > { %1075 = vmatpush.bf16.msra.mxu0 %v1063_v20  ;;  %1089 = vmatpush.bf16.msra.mxu1 %v1066_v21 }
 0x283   : > { %1125 = vmatpush.bf16.msra.mxu2 %v1113_v22  ;;  %1139 = vmatpush.bf16.msra.mxu3 %v1116_v25  ;;  %v1626_v38 = vpop.permute.xlu1 %1625  ;;  %v1621_v39 = vpop.permute.xlu0 %1620 }
 0x284   : > { %v1628_v40 = vunpack.i.h.bf16 %v1626_v38  ;;  %v1627_v43 = vunpack.i.l.bf16 %v1626_v38  ;;  %v1623_v44 = vunpack.i.h.bf16 %v1621_v39  ;;  %v1622_v45 = vunpack.i.l.bf16 %v1621_v39 }
 0x285   : > { %1472 = vmatmul.msk.bf16.vlgmr.msra.gmra.mxu0 %vm1015_vm13, %v1506_v28  ;;  %1473 = vmatmul.msk.bf16.vlgmr.msra.gmra.mxu1 %vm1015_vm13, %v1506_v28 }
 0x286   : > { %v1197_v46 = vsel %vm709_vm8, %v1628_v40, %v1633_v29  ;;  %v1199_v47 = vsel %vm709_vm8, %v1633_v29, %v1628_v40  ;;  %v1196_v48 = vsel %vm709_vm8, %v1627_v43, %v1632_v30  ;;  %v1198_v49 = vsel %vm709_vm8, %v1632_v30, %v1627_v43  ;;  %1478 = vmatmul.msk.bf16.vlgmr.msra.gmra.mxu2 %vm1015_vm13, %v1508_v34 }
 0x287   : > { %v1181_v50 = vsel %vm612_vm9, %v1618_v36, %v1623_v44  ;;  %v1183_v51 = vsel %vm612_vm9, %v1623_v44, %v1618_v36  ;;  %v1180_v52 = vsel %vm612_vm9, %v1617_v37, %v1622_v45  ;;  %v1182_v53 = vsel %vm612_vm9, %v1622_v45, %v1617_v37  ;;  %1479 = vmatmul.msk.bf16.vlgmr.msra.gmra.mxu3 %vm1015_vm13, %v1508_v34 }
 0x288   : > { %v1186_v54 = vmax.f32 %v1777_v7, %v1183_v51  ;;  %v1187_v55 = vmax.f32 %v1783_v10, %v1181_v50  ;;  %v1184_v57 = vmax.f32 %v1775_v6, %v1182_v53  ;;  %v1185_v58 = vmax.f32 %v1779_v8, %v1180_v52 }
 0x28a   : > { %v1202_v60 = vmax.f32 %v1186_v54, %v1197_v46  ;;  %v1203_v61 = vmax.f32 %v1187_v55, %v1199_v47  ;;  %v1200_v62 = vmax.f32 %v1184_v57, %v1196_v48  ;;  %v1201_v63 = vmax.f32 %v1185_v58, %v1198_v49 }
 0x28b   : > { %v869_v16 = vpop.permute.xlu0 %868  ;;  %v874_v9 = vpop.permute.xlu1 %873 }
 0x28c   : > { %v1485_v19 = vpack.c.bf16 %v1202_v60, %v1200_v62  ;;  %v1489_v0 = vpack.c.bf16 %v1203_v61, %v1201_v63  ;;  %v876_v15 = vadd.f32 %v869_v16, %v1946_v23  ;;  %v877_v1 = vadd.f32 %v869_v16, %v1948_v26  ;;  %v1509_v23 = vld [vmem:[%s2091_s9] sm:$0xff] }
 0x28d   : > { %v878_v49 = vadd.f32 %v874_v9, %v1950_v33  ;;  %v879_v52 = vadd.f32 %v874_v9, %v1952_v35 }
 0x28e   : > { %1486 = vmatpush.bf16.msk.msrb.mxu0 %vm1831_vm5, %v1485_v19  ;;  %1490 = vmatpush.bf16.msk.msrb.mxu1 %vm1838_vm6, %v1489_v0  ;;  %v880_v6 = vmax.f32 %v876_v15, 0.0  ;;  %v881_v7 = vmax.f32 %v877_v1, 0.0  ;;  %v1035_v59 = vpop.f32.mrf.mxu2 }
 0x28f   : > { %v882_v63 = vmax.f32 %v878_v49, 0.0  ;;  %v883_v19 = vmax.f32 %v879_v52, 0.0 }
 0x290   : > { %v884_v8 = vsel %vm1799_vm1, %v880_v6, 0.0  ;;  %v885_v10 = vsel %vm1803_vm2, %v881_v7, 0.0  ;;  %v1049_v2 = vpop.f32.mrf.mxu3 }
 0x291   : > { %v1281_v26 = vadd.f32 %v1811_v31, %v884_v8  ;;  %v1282_v56 = vadd.f32 %v1813_v32, %v885_v10  ;;  %v1153_v31 = vpop.permute.xlu2 %1152  ;;  %v886_v8 = vsel %vm1799_vm1, %v882_v63, 0.0 }
 0x293   : > { %v1217_v29 = vpop.permute.xlu1 %1216  ;;  %v1158_v39 = vpop.permute.xlu0 %1157 }
 0x295   : > { %1487 = vmatmul.msk.bf16.vlgmr.msrb.gmra.mxu0 %vm440_vm0, %v1509_v23  ;;  %1491 = vmatmul.msk.bf16.vlgmr.msrb.gmra.mxu1 %vm440_vm0, %v1509_v23  ;;  %v887_v23 = vsel %vm1803_vm2, %v883_v19, 0.0 }
 0x296   : > { %v1037_v3 = vpop.f32.mrf.mxu2 }
 0x298   : > { %v1051_v41 = vpop.f32.mrf.mxu3 }
 0x299   : > { %v1222_v33 = vpop.permute.xlu2 %1221 }
 0x302   : > { %v1077_v4 = vpop.f32.mrf.mxu0  ;;  %v1091_v5 = vpop.f32.mrf.mxu1 }
 0x303   : > { %v1078_v42 = vadd.f32 %v1077_v4, %v1035_v59  ;;  %v1092_v11 = vadd.f32 %v1091_v5, %v1049_v2 }
 0x309   : > { %v1127_v12 = vpop.f32.mrf.mxu2 }
 0x30a   : > { %v1146_v13 = vadd.f32 %v1127_v12, %v1078_v42  ;;  %v1141_v14 = vpop.f32.mrf.mxu3  ;;  %v1079_v17 = vpop.f32.mrf.mxu0 }
 0x30b   : > { %v1147_v18 = vadd.f32 %v1141_v14, %v1092_v11  ;;  %v1093_v32 = vpop.f32.mrf.mxu1  ;;  %v1080_v28 = vadd.f32 %v1079_v17, %v1037_v3 }
 0x30c   : > { %v1160_v20 = vadd.f32 %v1153_v31, %v1146_v13  ;;  %v1094_v30 = vadd.f32 %v1093_v32, %v1051_v41 }
 0x30d   : > { %v1161_v21 = vadd.f32 %v1153_v31, %v1147_v18 }
 0x30e   : > { %v1164_v22 = vmax.f32 %v1160_v20, 0.0 }
 0x30f   : > { %v1165_v25 = vmax.f32 %v1161_v21, 0.0 }
 0x310   : > { %v1168_v40 = vsel %vm1799_vm1, %v1164_v22, 0.0 }
 0x311   : > { %v1129_v34 = vpop.f32.mrf.mxu2  ;;  %v1169_v46 = vsel %vm1803_vm2, %v1165_v25, 0.0  ;;  %v1285_v53 = vadd.f32 %v1281_v26, %v1168_v40 }
 0x312   : > { %v1148_v36 = vadd.f32 %v1129_v34, %v1080_v28  ;;  %v1143_v37 = vpop.f32.mrf.mxu3  ;;  %v1241_v38 = vpop.f32.mrf.mxu0  ;;  %v1286_v58 = vadd.f32 %v1282_v56, %v1169_v46 }
 0x313   : > { %v1149_v43 = vadd.f32 %v1143_v37, %v1094_v30  ;;  %v1242_v44 = vadd.f32 %v1241_v38, %v1217_v29  ;;  %v1255_v45 = vpop.f32.mrf.mxu1 }
 0x314   : > { %v1162_v47 = vadd.f32 %v1158_v39, %v1148_v36  ;;  %v1256_v48 = vadd.f32 %v1255_v45, %v1217_v29 }
 0x315   : > { %v1163_v50 = vadd.f32 %v1158_v39, %v1149_v43  ;;  %v1260_v51 = vmax.f32 %v1242_v44, 0.0 }
 0x316   : > { %v1261_v54 = vmax.f32 %v1256_v48, 0.0  ;;  %v1166_v55 = vmax.f32 %v1162_v47, 0.0 }
 0x317   : > { %v1264_v57 = vsel %vm1799_vm1, %v1260_v51, 0.0  ;;  %v1167_v60 = vmax.f32 %v1163_v50, 0.0 }
 0x318   : > { %v1289_v61 = vadd.f32 %v1285_v53, %v1264_v57  ;;  %v1265_v62 = vsel %vm1803_vm2, %v1261_v54, 0.0  ;;  %v1170_v35 = vsel %vm1799_vm1, %v1166_v55, 0.0 }
 0x319   : > { %v1290_v16 = vadd.f32 %v1286_v58, %v1265_v62  ;;  %v1171_v6 = vsel %vm1803_vm2, %v1167_v60, 0.0  ;;  %v1287_v26 = vadd.f32 %v1170_v35, %v886_v8 }
 0x31a   : > { %1293 = vst [vmem:[%s406_s16] sm:$0xff] %v1289_v61  ;;  %v1243_v0 = vpop.f32.mrf.mxu0  ;;  %v1288_v2 = vadd.f32 %v1171_v6, %v887_v23 }
 0x31b   : > { %1294 = vst [vmem:[%s406_s16 + $0x8] sm:$0xff] %v1290_v16  ;;  %v1244_v15 = vadd.f32 %v1243_v0, %v1222_v33  ;;  %v1257_v1 = vpop.f32.mrf.mxu1 }
 0x31c   : > { %v1258_v7 = vadd.f32 %v1257_v1, %v1222_v33 }
 0x31d   : > { %v1262_v10 = vmax.f32 %v1244_v15, 0.0 }
 0x31e   : > { %v1263_v56 = vmax.f32 %v1258_v7, 0.0 }
 0x31f   : > { %v1266_v59 = vsel %vm1799_vm1, %v1262_v10, 0.0  ;;  %1303 = sbr.rel (!%p1756_p5) target bundleno = 812 (0x32c), region = 91 }
 0x320   : > { %v1291_v3 = vadd.f32 %v1287_v26, %v1266_v59  ;;  %v1267_v41 = vsel %vm1803_vm2, %v1263_v56, 0.0 }
 0x321   : > { %v1292_v4 = vadd.f32 %v1288_v2, %v1267_v41  ;;  %v1319_v5 = vld [vmem:[%s406_s16] sm:$0xff] (%p1756_p5) }
 0x322   : > { %1295 = vst [vmem:[%s406_s16 + $0x10] sm:$0xff] %v1291_v3  ;;  %v1321_v9 = vld [vmem:[%s406_s16 + $0x8] sm:$0xff] (%p1756_p5) }
 0x323   : > { %1296 = vst [vmem:[%s406_s16 + $0x18] sm:$0xff] %v1292_v4 }
 0x324   : > { %1320 = vst [vmem:[%s1306_s26] sm:$0xff] %v1319_v5 }
 0x325   : > { %1322 = vst [vmem:[%s1306_s26 + $0x8] sm:$0xff] %v1321_v9 }
 0x329   : > { %v1323_v24 = vld [vmem:[%s406_s16 + $0x10] sm:$0xff] }
 0x32a   : > { %v1325_v42 = vld [vmem:[%s406_s16 + $0x18] sm:$0xff]  ;;  %1324 = vst [vmem:[%s1306_s26 + $0x20] sm:$0xff] %v1323_v24 }
 0x32b   : > { %1326 = vst [vmem:[%s1306_s26 + $0x28] sm:$0xff] %v1325_v42 }
 0x32c PF: > { %p18_p10 = scmp.ge.s32.totalorder %s1743_s21, 4   ;;  %s2103_s17 = smov %s1653_s18 }
 0x32d   : > { %s2104_s18 = smov %s1754_s24  ;;  %s2105_s19 = smov %s1743_s21 }
 0x32e   :  { %20 = sbr.rel (!%p18_p10) target bundleno = 2 (0x2), region = 145 }

// kernel: forward.7
= control target key start
LH: loop header
LB: loop body
LE: loop exit
PB: predicated region body
PF: predicated region fallthrough
CT: control target
= control target key end

     0   :  { %vm84_vm0 = vcmask 523264   ;;  %v1242_v12 = vmov 0   ;;  %vm115_vm1 = vcmask 130048   ;;  %v1243_v49 = vmov 0.0   ;;  %s1647_s3 = inlined_call_operand.vmem [shape: f32[64,16], index: 3, kind: input, shape index: {}]   ;;  %s1648_s4 = inlined_call_operand.vmem [shape: f32[1,16], index: 4, kind: input, shape index: {}]   ;;  %s1649_s0 = inlined_call_operand.vmem [shape: f32[8,64], index: 0, kind: input, shape index: {}]   ;;  %s1650_s9 = inlined_call_operand.vmem [shape: f32[1,16], index: 9, kind: input, shape index: {}]   ;;  %s1651_s10 = inlined_call_operand.vmem [shape: f32[1,16], index: 10, kind: input, shape index: {}]   ;;  %s1652_s5 = inlined_call_operand.vmem [shape: f32[16,16], index: 5, kind: input, shape index: {}]   ;;  %s1653_s1 = inlined_call_operand.vmem [shape: f32[8,1], index: 1, kind: input, shape index: {}]   ;;  %s1654_s6 = inlined_call_operand.vmem [shape: f32[1,16], index: 6, kind: input, shape index: {}]   ;;  %s1655_s2 = inlined_call_operand.vmem [shape: f32[6,1], index: 2, kind: input, shape index: {}]   ;;  %s1656_s8 = inlined_call_operand.vmem [shape: f32[1,16], index: 8, kind: input, shape index: {}]   ;;  %s1657_s7 = inlined_call_operand.vmem [shape: f32[16,16], index: 7, kind: input, shape index: {}]   ;;  %s1658_s11 = inlined_call_operand.vmem [shape: f32[16,16], index: 11, kind: input, shape index: {}]   ;;  %s1659_s13 = inlined_call_operand.vmem [shape: f32[4,16,16], index: 13, kind: input, shape index: {}]   ;;  %s1660_s12 = inlined_call_operand.vmem [shape: f32[1,16], index: 12, kind: input, shape index: {}]   ;;  %s1661_s15 = inlined_call_operand.vmem [shape: f32[4,1,16], index: 15, kind: input, shape index: {}]   ;;  %s1662_s14 = inlined_call_operand.vmem [shape: f32[4,16,16], index: 14, kind: input, shape index: {}]   ;;  %s1663_s17 = inlined_call_operand.vmem [shape: f32[1,16], index: 17, kind: input, shape index: {}]   ;;  %s1664_s16 = inlined_call_operand.vmem [shape: f32[16,16], index: 16, kind: input, shape index: {}]   ;;  %s1665_s18 = inlined_call_operand.vmem [shape: f32[16,16], index: 18, kind: input, shape index: {}]   ;;  %s1666_s19 = inlined_call_operand.vmem [shape: f32[1,16], index: 19, kind: input, shape index: {}]   ;;  %s1667_s20 = inlined_call_operand.vmem [shape: f32[16,64], index: 20, kind: input, shape index: {}]   ;;  %s1668_s21 = inlined_call_operand.vmem [shape: f32[1,64], index: 21, kind: input, shape index: {}]   ;;  %s1669_s22 = inlined_call_operand.vmem [shape: f32[6,64], index: 22, kind: output, shape index: {}]  }
   0x1   :  { %1672 = sst [smem:[#allocation2_spill]] %s1647_s3  ;;  %1164 = vset.pattern.permute.xlu0 %v1242_v12  ;;  %v997_v13 = vld [vmem:[%s1655_s2] sm:$0x3f]  ;;  %v141_v25 = vld [vmem:[%s1657_s7 + $0x8] sm:$0xff]  ;;  %v220_v31 = vld [vmem:[%s1659_s13 + $0x18] sm:$0xff] }
   0x2   :  { %1673 = sst [smem:[#allocation3_spill]] %s1648_s4  ;;  %163 = vmatpush.msra.mxu2 %v141_v25  ;;  %v140_v28 = vld [vmem:[%s1657_s7] sm:$0xff]  ;;  %v1419_v29 = vld [vmem:[%s1658_s11 + $0x8] sm:$0xff]  ;;  %v219_v38 = vld [vmem:[%s1659_s13 + $0x10] sm:$0xff] }
   0x3   :  { %1674 = sst [smem:[#allocation4_spill]] %s1649_s0  ;;  %210 = vmatpush.msra.mxu3 %v1419_v29  ;;  %v1425_v30 = vld [vmem:[%s1658_s11] sm:$0xff]  ;;  %v222_v32 = vld [vmem:[%s1659_s13 + $0x28] sm:$0xff]  ;;  %v1459_v42 = vld [vmem:[%s1662_s14 + $0x18] sm:$0xff] }
   0x4   :  { %1675 = sst [smem:[#allocation5_spill]] %s1650_s9  ;;  %164 = vmatpush.msra.mxu2 %v140_v28  ;;  %v1168_v33 = vld [vmem:[%s1654_s6] ss:$0 sm:$0xff]  ;;  %v218_v37 = vld [vmem:[%s1659_s13 + $0x8] sm:$0xff]  ;;  %v1471_v44 = vld [vmem:[%s1662_s14 + $0x10] sm:$0xff] }
   0x5   :  { %1676 = sst [smem:[#allocation6_spill]] %s1651_s10  ;;  %211 = vmatpush.msra.mxu3 %v1425_v30  ;;  %v221_v39 = vld [vmem:[%s1659_s13 + $0x20] sm:$0xff]  ;;  %v1454_v41 = vld [vmem:[%s1662_s14 + $0x8] sm:$0xff]  ;;  %v224_v45 = vld [vmem:[%s1659_s13 + $0x38] sm:$0xff] }
   0x6   :  { %1677 = sst [smem:[#allocation7_spill]] %s1652_s5  ;;  %280 = vmatpush.msrb.mxu2 %v220_v31  ;;  %v217_v40 = vld [vmem:[%s1659_s13] sm:$0xff]  ;;  %v1479_v46 = vld [vmem:[%s1662_s14 + $0x28] sm:$0xff]  ;;  %v223_v47 = vld [vmem:[%s1659_s13 + $0x30] sm:$0xff] }
   0x7   :  { %1678 = sst [smem:[#allocation8_spill]] %s1653_s1  ;;  %303 = vmatpush.msrb.mxu3 %v222_v32  ;;  %v1464_v43 = vld [vmem:[%s1662_s14] sm:$0xff]  ;;  %v1509_v58 = vld [vmem:[%s1662_s14 + $0x38] sm:$0xff]  ;;  %v1516_v59 = vld [vmem:[%s1662_s14 + $0x30] sm:$0xff] }
   0x8   :  { %s1679_s29 = sld [smem:[#allocation2_spill]]  ;;  %281 = vmatpush.msrb.mxu2 %v219_v38  ;;  %v1488_v48 = vld [vmem:[%s1662_s14 + $0x20] sm:$0xff] }
   0x9   :  { %s1680_s3 = sld [smem:[#allocation4_spill]]  ;;  %304 = vmatpush.msrb.mxu3 %v221_v39  ;;  %v1169_v50 = vld [vmem:[%s1656_s8] ss:$0 sm:$0xff] }
   0xa   :  { %s1681_s5 = sld [smem:[#allocation7_spill]]  ;;  %v1503_v51 = vld [vmem:[%s1660_s12] ss:$0 sm:$0xff] }
   0xb   :  { %s1682_s26 = sld [smem:[#allocation8_spill]] }
   0xc   :  { %s1683_s30 = sld [smem:[#allocation3_spill]] }
   0xd   :  { %s1684_s23 = sld [smem:[#allocation5_spill]] }
   0xe   :  { %v79_v0 = vld [vmem:[%s1679_s29 + $0x38] sm:$0xff]  ;;  %v78_v1 = vld [vmem:[%s1679_s29 + $0x30] sm:$0xff]  ;;  %v77_v2 = vld [vmem:[%s1679_s29 + $0x28] sm:$0xff]  ;;  %s1685_s24 = sld [smem:[#allocation6_spill]] }
   0xf   :  { %96 = vmatpush.msra.mxu0 %v79_v0  ;;  %v76_v3 = vld [vmem:[%s1679_s29 + $0x20] sm:$0xff]  ;;  %v75_v4 = vld [vmem:[%s1679_s29 + $0x18] sm:$0xff]  ;;  %v74_v5 = vld [vmem:[%s1679_s29 + $0x10] sm:$0xff] }
  0x10   :  { %v73_v6 = vld [vmem:[%s1679_s29 + $0x8] sm:$0xff]  ;;  %v72_v7 = vld [vmem:[%s1679_s29] sm:$0xff] }
  0x11   :  { %97 = vmatpush.msra.mxu0 %v78_v1  ;;  %v71_v8 = vld [vmem:[%s1680_s3] sm:$0xff]  ;;  %v110_v9 = vld [vmem:[%s1681_s5 + $0x8] sm:$0xff] }
  0x12   :  { %133 = vmatpush.msra.mxu1 %v110_v9  ;;  %v109_v10 = vld [vmem:[%s1681_s5] sm:$0xff] }
  0x13   :  { %98 = vmatpush.msra.mxu0 %v77_v2  ;;  %v170_v11 = vld [vmem:[%s1682_s26] sm:$0xff] }
  0x14   :  { %134 = vmatpush.msra.mxu1 %v109_v10  ;;  %174 = vperm.xlu0 %1164, %v170_v11   ;;  %v1165_v14 = vld [vmem:[%s1683_s30] ss:$0 sm:$0xff]  ;;  %v1172_v1 = vld [vmem:[%s1661_s15 + $0x1] ss:$0 sm:$0xff]  ;;  %v1174_v2 = vld [vmem:[%s1661_s15 + $0x3] ss:$0 sm:$0xff] }
  0x15   :  { %99 = vmatpush.msra.mxu0 %v76_v3  ;;  %v1166_v18 = vld [vmem:[%s1684_s23] ss:$0 sm:$0xff] }
  0x16   :  { %v1167_v20 = vld [vmem:[%s1685_s24] ss:$0 sm:$0xff]  ;;  %257 = vmatpush.msrb.mxu1 %v218_v37 }
  0x17   :  { %100 = vmatpush.msra.mxu0 %v75_v4  ;;  %v1171_v0 = vld [vmem:[%s1661_s15] ss:$0 sm:$0xff] }
  0x18   :  { %258 = vmatpush.msrb.mxu1 %v217_v40 }
  0x19   :  { %101 = vmatpush.msra.mxu0 %v74_v5 }
  0x1b   :  { %102 = vmatpush.msra.mxu0 %v73_v6 }
  0x1c   :  { %1000 = vperm.xlu0 %1164, %v997_v13  }
  0x1d   :  { %103 = vmatpush.msra.mxu0 %v72_v7 }
  0x1e   :  { %1126 = vmatmul.msk.f32.vlgmr.msra.gmra.mxu0 %vm84_vm0, %v71_v8 }
  0x1f   :  { %391 = vmatpush.msrb.mxu0 %v1479_v46 }
  0x21   :  { %392 = vmatpush.msrb.mxu0 %v1488_v48 }
  0x23   :  { %547 = vmatpush.msra.mxu0 %v1479_v46 }
  0x25   :  { %548 = vmatpush.msra.mxu0 %v1488_v48 }
  0x26   :  { %393 = vmatmul.f32.vlgmr.msrb.gmra.mxu0 %v1243_v49 }
  0x27   :  { %713 = vmatpush.msrb.mxu0 %v1479_v46 }
  0x29   :  { %714 = vmatpush.msrb.mxu0 %v1488_v48 }
  0x86   :  { %v175_v19 = vpop.permute.xlu0 %174 }
  0x87   :  { %v180_v21 = vmul.f32 %v1166_v18, %v175_v19 }
  0x89   :  { %v185_v22 = vadd.f32 %v1167_v20, %v180_v21 }
  0x8b   :  { %v186_v27 = vmax.f32 %v185_v22, 0.0 }
  0x8d   :  { %1129 = vmatmul.msk.f32.vlgmr.msra.gmra.mxu3 %vm115_vm1, %v186_v27 }
  0x8e   :  { %v1001_v23 = vpop.permute.xlu0 %1000  ;;  %370 = vmatpush.msra.mxu3 %v1459_v42 }
  0x8f   :  { %v1003_v24 = vmul.f32 %v1166_v18, %v1001_v23 }
  0x90   :  { %371 = vmatpush.msra.mxu3 %v1471_v44 }
  0x91   :  { %v1411_v26 = vadd.f32 %v1167_v20, %v1003_v24 }
  0x9b   :  { %v105_v15 = vpop.f32.mrf.mxu0 }
  0x9c   :  { %v106_v16 = vadd.f32 %v1165_v14, %v105_v15 }
  0x9e   :  { %v108_v17 = vmax.f32 %v106_v16, 0.0 }
  0xa0   :  { %1127 = vmatmul.msk.f32.vlgmr.msra.gmra.mxu1 %vm115_vm1, %v108_v17  ;;  %v1173_v17 = vld [vmem:[%s1661_s15 + $0x2] ss:$0 sm:$0xff] }
  0xa1   :  { %326 = vmatpush.msra.mxu1 %v224_v45 }
  0xa3   :  { %327 = vmatpush.msra.mxu1 %v223_v47  ;;  %v394_v23 = vpop.f32.mrf.mxu0 }
 0x110   :  { %v213_v52 = vpop.f32.mrf.mxu3 }
 0x111   :  { %v214_v55 = vadd.f32 %v1503_v51, %v213_v52 }
 0x11d   :  { %v136_v34 = vpop.f32.mrf.mxu1 }
 0x11e   :  { %v137_v35 = vadd.f32 %v1168_v33, %v136_v34 }
 0x120   :  { %v139_v36 = vmax.f32 %v137_v35, 0.0 }
 0x122   :  { %1128 = vmatmul.msk.f32.vlgmr.msra.gmra.mxu2 %vm115_vm1, %v139_v36 }
 0x123   :  { %349 = vmatpush.msra.mxu2 %v1454_v41 }
 0x125   :  { %350 = vmatpush.msra.mxu2 %v1464_v43 }
 0x1a5   :  { %v166_v53 = vpop.f32.mrf.mxu2 }
 0x1a6   :  { %v167_v54 = vadd.f32 %v1169_v50, %v166_v53 }
 0x1a8   :  { %v169_v56 = vmax.f32 %v167_v54, 0.0 }
 0x1aa   :  { %v216_v57 = vadd.f32 %v214_v55, %v169_v56 }
 0x1ac   :  { %1130 = vmatmul.msk.f32.vlgmr.msrb.gmra.mxu1 %vm115_vm1, %v216_v57  ;;  %1131 = vmatmul.msk.f32.vlgmr.msrb.gmra.mxu2 %vm115_vm1, %v216_v57 }
 0x1ad   :  { %1132 = vmatmul.msk.f32.vlgmr.msrb.gmra.mxu3 %vm115_vm1, %v216_v57  ;;  %412 = vmatpush.msrb.mxu1 %v1509_v58 }
 0x1ae   :  { %499 = vmatpush.msrb.mxu2 %v1454_v41  ;;  %523 = vmatpush.msrb.mxu3 %v1459_v42 }
 0x1af   :  { %413 = vmatpush.msrb.mxu1 %v1516_v59 }
 0x1b0   :  { %500 = vmatpush.msrb.mxu2 %v1464_v43  ;;  %524 = vmatpush.msrb.mxu3 %v1471_v44 }
 0x1b4   :  { %1133 = vmatmul.msk.f32.vlgmr.msra.gmra.mxu1 %vm115_vm1, %v216_v57  ;;  %351 = vmatmul.f32.vlgmr.msra.gmra.mxu2 %v1243_v49 }
 0x1b5   :  { %372 = vmatmul.f32.vlgmr.msra.gmra.mxu3 %v1243_v49  ;;  %571 = vmatpush.msra.mxu1 %v1509_v58 }
 0x1b6   :  { %665 = vmatpush.msra.mxu2 %v1454_v41  ;;  %689 = vmatpush.msra.mxu3 %v1459_v42 }
 0x1b7   :  { %572 = vmatpush.msra.mxu1 %v1516_v59 }
 0x1b8   :  { %666 = vmatpush.msra.mxu2 %v1464_v43  ;;  %690 = vmatpush.msra.mxu3 %v1471_v44 }
 0x1bc   :  { %414 = vmatmul.f32.vlgmr.msrb.gmra.mxu1 %v1243_v49 }
 0x1bd   :  { %737 = vmatpush.msrb.mxu1 %v1509_v58 }
 0x1bf   :  { %738 = vmatpush.msrb.mxu1 %v1516_v59 }
 0x229   :  { %v260_v60 = vpop.f32.mrf.mxu1 }
 0x22a   :  { %v1543_v3 = vadd.f32 %v1171_v0, %v260_v60 }
 0x22f   :  { %v283_v61 = vpop.f32.mrf.mxu2 }
 0x230   :  { %v306_v62 = vpop.f32.mrf.mxu3  ;;  %v1545_v4 = vadd.f32 %v1172_v1, %v283_v61 }
 0x231   :  { %v329_v63 = vpop.f32.mrf.mxu1  ;;  %v1555_v21 = vadd.f32 %v1173_v17, %v306_v62 }
 0x232   :  { %v1547_v6 = vadd.f32 %v1174_v2, %v329_v63 }
 0x233   :  { %v397_v25 = vadd.f32 %v394_v23, %v1555_v21 }
 0x237   :  { %v352_v5 = vpop.f32.mrf.mxu2 }
 0x238   :  { %v355_v7 = vadd.f32 %v352_v5, %v1543_v3  ;;  %v373_v8 = vpop.f32.mrf.mxu3 }
 0x239   :  { %v376_v9 = vadd.f32 %v373_v8, %v1545_v4  ;;  %v415_v10 = vpop.f32.mrf.mxu1 }
 0x23a   :  { %v1134_v11 = vmul.f32 -1.442695, %v355_v7  ;;  %v418_v12 = vadd.f32 %v415_v10, %v1547_v6 }
 0x23b   :  { %v1135_v13 = vmul.f32 -1.442695, %v376_v9 }
 0x23c   :  { %1178 = vpow2.f32 %v1134_v11  ;;  %v1136_v14 = vmul.f32 -1.442695, %v418_v12 }
 0x23d   :  { %1180 = vpow2.f32 %v1135_v13 }
 0x23e   :  { %1182 = vpow2.f32 %v1136_v14 }
 0x242   :  { %v1179_v15 = vpop.eup %1178 }
 0x243   :  { %v1181_v16 = vpop.eup %1180  ;;  %v422_v18 = vadd.f32 1.0, %v1179_v15 }
 0x244   :  { %v1183_v19 = vpop.eup %1182  ;;  %v441_v20 = vadd.f32 1.0, %v1181_v16 }
 0x245   :  { %1184 = vrcp.f32 %v422_v18  ;;  %v461_v22 = vadd.f32 1.0, %v1183_v19  ;;  %v432_v34 = vand.u32 2147483647, %v422_v18  ;;  %v434_v35 = vand.u32 2147483648, %v422_v18 }
 0x246   :  { %1186 = vrcp.f32 %v441_v20  ;;  %v453_v38 = vand.u32 2147483648, %v441_v20  ;;  %v451_v45 = vand.u32 2147483647, %v441_v20  ;;  %vm428_vm4 = vweird.f32 %v422_v18 }
 0x247   :  { %1188 = vrcp.f32 %v461_v22  ;;  %v435_v50 = vor.u32 1.1754944e-38, %v434_v35  ;;  %vm447_vm6 = vweird.f32 %v441_v20  ;;  %vm433_vm7 = vcmp.eq.f32.partialorder %v432_v34, 8.507059e+37 }
 0x248   :  { %1190 = vtanh.f32 %v397_v25  ;;  %v454_v54 = vor.u32 1.1754944e-38, %v453_v38  ;;  %vm452_vm9 = vcmp.eq.f32.partialorder %v451_v45, 8.507059e+37  ;;  %v473_v2 = vand.u32 2147483648, %v461_v22 }
 0x249   :  { %vm467_vm11 = vweird.f32 %v461_v22  ;;  %v471_v5 = vand.u32 2147483647, %v461_v22 }
 0x24a   :  { %v474_v8 = vor.u32 1.1754944e-38, %v473_v2 }
 0x24b   :  { %v1185_v24 = vpop.eup %1184  ;;  %vm472_vm13 = vcmp.eq.f32.partialorder %v471_v5, 8.507059e+37 }
 0x24c   :  { %v1187_v27 = vpop.eup %1186  ;;  %v424_v28 = vmul.f32 %v1185_v24, %v422_v18  ;;  %vm429_vm2 = vweird.f32 %v1185_v24 }
 0x24d   :  { %v443_v31 = vmul.f32 %v1187_v27, %v441_v20  ;;  %v1189_v33 = vpop.eup %1188  ;;  %vm448_vm3 = vweird.f32 %v1187_v27  ;;  %vm430_vm5 = vmor %vm428_vm4, %vm429_vm2 }
 0x24e   :  { %v425_v32 = vsub.f32 1.0, %v424_v28  ;;  %v463_v39 = vmul.f32 %v1189_v33, %v461_v22  ;;  %vm449_vm8 = vmor %vm447_vm6, %vm448_vm3  ;;  %v1191_v55 = vpop.eup %1190  ;;  %vm468_vm10 = vweird.f32 %v1189_v33 }
 0x24f   :  { %v444_v36 = vsub.f32 1.0, %v443_v31  ;;  %vm469_vm12 = vmor %vm467_vm11, %vm468_vm10 }
 0x250   :  { %v426_v37 = vmul.f32 %v1185_v24, %v425_v32  ;;  %v464_v49 = vsub.f32 1.0, %v463_v39 }
 0x251   :  { %v445_v40 = vmul.f32 %v1187_v27, %v444_v36 }
 0x252   :  { %v427_v47 = vadd.f32 %v1185_v24, %v426_v37  ;;  %v465_v62 = vmul.f32 %v1189_v33, %v464_v49 }
 0x253   :  { %v446_v52 = vadd.f32 %v1187_v27, %v445_v40 }
 0x254   :  { %v431_v53 = vsel %vm430_vm5, %v1185_v24, %v427_v47  ;;  %v466_v1 = vadd.f32 %v1189_v33, %v465_v62 }
 0x255   :  { %v436_v56 = vsel %vm433_vm7, %v435_v50, %v431_v53  ;;  %v450_v57 = vsel %vm449_vm8, %v1187_v27, %v446_v52 }
 0x256   :  { %v478_v60 = vmul.f32 %v1191_v55, %v436_v56  ;;  %v455_v61 = vsel %vm452_vm9, %v454_v54, %v450_v57  ;;  %v470_v7 = vsel %vm469_vm12, %v1189_v33, %v466_v1 }
 0x257   :  { %v477_v63 = vmul.f32 0.0, %v455_v61  ;;  %v475_v10 = vsel %vm472_vm13, %v474_v8, %v470_v7 }
 0x259   :  { %v1558_v0 = vadd.f32 %v478_v60, %v477_v63 }
 0x25b   :  { %1192 = vtanh.f32 %v1558_v0  ;;  %v640_v57 = vrot.slane %v1558_v0, 6 }
 0x261   :  { %v1193_v9 = vpop.eup %1192 }
 0x262   :  { %v481_v11 = vmul.f32 %v1193_v9, %v475_v10 }
 0x264   :  { %1137 = vmatmul.msk.f32.vlgmr.msrb.gmra.mxu2 %vm115_vm1, %v481_v11  ;;  %1138 = vmatmul.msk.f32.vlgmr.msrb.gmra.mxu3 %vm115_vm1, %v481_v11 }
 0x265   :  { %1139 = vmatmul.msk.f32.vlgmr.msra.gmra.mxu0 %vm115_vm1, %v481_v11  ;;  %1140 = vmatmul.msk.f32.vlgmr.msra.gmra.mxu1 %vm115_vm1, %v481_v11 }
 0x266   :  { %831 = vmatpush.msrb.mxu2 %v1454_v41  ;;  %855 = vmatpush.msrb.mxu3 %v1459_v42 }
 0x267   :  { %879 = vmatpush.msra.mxu0 %v1479_v46  ;;  %903 = vmatpush.msra.mxu1 %v1509_v58 }
 0x268   :  { %832 = vmatpush.msrb.mxu2 %v1464_v43  ;;  %856 = vmatpush.msrb.mxu3 %v1471_v44 }
 0x269   :  { %880 = vmatpush.msra.mxu0 %v1488_v48  ;;  %904 = vmatpush.msra.mxu1 %v1516_v59 }
 0x2e2   :  { %v574_v12 = vpop.f32.mrf.mxu1  ;;  %v550_v22 = vpop.f32.mrf.mxu0 }
 0x2e3   :  { %v578_v13 = vrot.slane %v574_v12, 6  ;;  %v554_v24 = vrot.slane %v550_v22, 6 }
 0x2e5   :  { %v580_v14 = vadd.f32 %v578_v13, %v1547_v6  ;;  %v556_v28 = vadd.f32 %v554_v24, %v1555_v21 }
 0x2e7   :  { %v1143_v15 = vmul.f32 -1.442695, %v580_v14  ;;  %v502_v41 = vpop.f32.mrf.mxu2  ;;  %v526_v16 = vpop.f32.mrf.mxu3 }
 0x2e8   :  { %v506_v42 = vrot.slane %v502_v41, 6  ;;  %v530_v17 = vrot.slane %v526_v16, 6 }
 0x2e9   :  { %1194 = vpow2.f32 %v1143_v15 }
 0x2ea   :  { %v508_v46 = vadd.f32 %v506_v42, %v1543_v3  ;;  %v532_v43 = vadd.f32 %v530_v17, %v1545_v4 }
 0x2ec   :  { %v1141_v58 = vmul.f32 -1.442695, %v508_v46  ;;  %v1142_v44 = vmul.f32 -1.442695, %v532_v43 }
 0x2ee   :  { %1196 = vpow2.f32 %v1141_v58 }
 0x2ef   :  { %v1195_v48 = vpop.eup %1194  ;;  %1198 = vpow2.f32 %v1142_v44 }
 0x2f0   :  { %v623_v59 = vadd.f32 1.0, %v1195_v48 }
 0x2f2   :  { %1200 = vrcp.f32 %v623_v59  ;;  %v635_v8 = vand.u32 2147483648, %v623_v59  ;;  %vm629_vm8 = vweird.f32 %v623_v59  ;;  %v633_v9 = vand.u32 2147483647, %v623_v59 }
 0x2f4   :  { %v1197_v18 = vpop.eup %1196  ;;  %v636_v11 = vor.u32 1.1754944e-38, %v635_v8  ;;  %vm634_vm10 = vcmp.eq.f32.partialorder %v633_v9, 8.507059e+37 }
 0x2f5   :  { %v1199_v19 = vpop.eup %1198  ;;  %v584_v20 = vadd.f32 1.0, %v1197_v18 }
 0x2f6   :  { %v603_v23 = vadd.f32 1.0, %v1199_v19 }
 0x2f7   :  { %1202 = vrcp.f32 %v584_v20  ;;  %v596_v36 = vand.u32 2147483648, %v584_v20  ;;  %v594_v39 = vand.u32 2147483647, %v584_v20  ;;  %vm590_vm0 = vweird.f32 %v584_v20 }
 0x2f8   :  { %1204 = vrcp.f32 %v603_v23  ;;  %v1201_v25 = vpop.eup %1200  ;;  %v615_v40 = vand.u32 2147483648, %v603_v23  ;;  %v613_v47 = vand.u32 2147483647, %v603_v23  ;;  %vm609_vm3 = vweird.f32 %v603_v23 }
 0x2f9   :  { %v625_v34 = vmul.f32 %v1201_v25, %v623_v59  ;;  %1206 = vtanh.f32 %v556_v28  ;;  %v597_v52 = vor.u32 1.1754944e-38, %v596_v36  ;;  %vm595_vm4 = vcmp.eq.f32.partialorder %v594_v39, 8.507059e+37 }
 0x2fa   :  { %v616_v55 = vor.u32 1.1754944e-38, %v615_v40  ;;  %vm614_vm6 = vcmp.eq.f32.partialorder %v613_v47, 8.507059e+37  ;;  %vm630_vm7 = vweird.f32 %v1201_v25 }
 0x2fb   :  { %v626_v49 = vsub.f32 1.0, %v625_v34  ;;  %vm631_vm9 = vmor %vm629_vm8, %vm630_vm7 }
 0x2fd   :  { %v1203_v27 = vpop.eup %1202  ;;  %v627_v62 = vmul.f32 %v1201_v25, %v626_v49 }
 0x2fe   :  { %v1205_v31 = vpop.eup %1204  ;;  %v586_v32 = vmul.f32 %v1203_v27, %v584_v20  ;;  %vm591_vm14 = vweird.f32 %v1203_v27 }
 0x2ff   :  { %v605_v33 = vmul.f32 %v1205_v31, %v603_v23  ;;  %vm610_vm15 = vweird.f32 %v1205_v31  ;;  %vm592_vm2 = vmor %vm590_vm0, %vm591_vm14  ;;  %v1207_v56 = vpop.eup %1206  ;;  %v628_v7 = vadd.f32 %v1201_v25, %v627_v62 }
 0x300   :  { %v587_v35 = vsub.f32 1.0, %v586_v32  ;;  %vm611_vm5 = vmor %vm609_vm3, %vm610_vm15 }
 0x301   :  { %v606_v37 = vsub.f32 1.0, %v605_v33  ;;  %v632_v10 = vsel %vm631_vm9, %v1201_v25, %v628_v7 }
 0x302   :  { %v588_v38 = vmul.f32 %v1203_v27, %v587_v35  ;;  %v637_v12 = vsel %vm634_vm10, %v636_v11, %v632_v10 }
 0x303   :  { %v607_v45 = vmul.f32 %v1205_v31, %v606_v37 }
 0x304   :  { %v589_v50 = vadd.f32 %v1203_v27, %v588_v38 }
 0x305   :  { %v608_v53 = vadd.f32 %v1205_v31, %v607_v45 }
 0x306   :  { %v593_v54 = vsel %vm592_vm2, %v1203_v27, %v589_v50 }
 0x307   :  { %v598_v60 = vsel %vm595_vm4, %v597_v52, %v593_v54  ;;  %v612_v61 = vsel %vm611_vm5, %v1205_v31, %v608_v53 }
 0x308   :  { %v643_v63 = vmul.f32 %v1207_v56, %v598_v60  ;;  %v617_v1 = vsel %vm614_vm6, %v616_v55, %v612_v61 }
 0x309   :  { %v642_v2 = vmul.f32 %v640_v57, %v617_v1 }
 0x30b   :  { %v1578_v5 = vadd.f32 %v643_v63, %v642_v2 }
 0x30d   :  { %1208 = vtanh.f32 %v1578_v5  ;;  %v806_v62 = vrot.slane %v1578_v5, 6 }
 0x313   :  { %v1209_v0 = vpop.eup %1208 }
 0x314   :  { %v646_v13 = vmul.f32 %v1209_v0, %v637_v12 }
 0x316   :  { %v648_v14 = vrot.slane %v646_v13, 2 }
 0x318   :  { %1144 = vmatmul.msk.f32.vlgmr.msra.gmra.mxu2 %vm115_vm1, %v648_v14  ;;  %1145 = vmatmul.msk.f32.vlgmr.msra.gmra.mxu3 %vm115_vm1, %v648_v14 }
 0x319   :  { %1146 = vmatmul.msk.f32.vlgmr.msrb.gmra.mxu0 %vm115_vm1, %v648_v14  ;;  %1147 = vmatmul.msk.f32.vlgmr.msrb.gmra.mxu1 %vm115_vm1, %v648_v14 }
 0x31a   :  { %1023 = vmatpush.msra.mxu2 %v1419_v29 }
 0x31c   :  { %1024 = vmatpush.msra.mxu2 %v1425_v30 }
 0x396   :  { %v740_v15 = vpop.f32.mrf.mxu1  ;;  %v716_v23 = vpop.f32.mrf.mxu0 }
 0x397   :  { %v744_v41 = vrot.slane %v740_v15, 4  ;;  %v720_v25 = vrot.slane %v716_v23, 4 }
 0x399   :  { %v746_v16 = vadd.f32 %v744_v41, %v1547_v6  ;;  %v722_v31 = vadd.f32 %v720_v25, %v1555_v21  ;;  %v1005_v41 = vmax.f32 %v1411_v26, 0.0 }
 0x39b   :  { %v1150_v42 = vmul.f32 -1.442695, %v746_v16  ;;  %v668_v17 = vpop.f32.mrf.mxu2  ;;  %v692_v46 = vpop.f32.mrf.mxu3 }
 0x39c   :  { %v672_v43 = vrot.slane %v668_v17, 4  ;;  %v696_v58 = vrot.slane %v692_v46, 4 }
 0x39d   :  { %1210 = vpow2.f32 %v1150_v42 }
 0x39e   :  { %v674_v44 = vadd.f32 %v672_v43, %v1543_v3  ;;  %v698_v48 = vadd.f32 %v696_v58, %v1545_v4 }
 0x3a0   :  { %v1148_v59 = vmul.f32 -1.442695, %v674_v44  ;;  %v1149_v18 = vmul.f32 -1.442695, %v698_v48 }
 0x3a2   :  { %1212 = vpow2.f32 %v1148_v59 }
 0x3a3   :  { %v1211_v29 = vpop.eup %1210  ;;  %1214 = vpow2.f32 %v1149_v18 }
 0x3a4   :  { %v789_v30 = vadd.f32 1.0, %v1211_v29 }
 0x3a6   :  { %1216 = vrcp.f32 %v789_v30  ;;  %v801_v10 = vand.u32 2147483648, %v789_v30  ;;  %vm795_vm5 = vweird.f32 %v789_v30  ;;  %v799_v11 = vand.u32 2147483647, %v789_v30 }
 0x3a8   :  { %v1213_v19 = vpop.eup %1212  ;;  %v802_v12 = vor.u32 1.1754944e-38, %v801_v10  ;;  %vm800_vm7 = vcmp.eq.f32.partialorder %v799_v11, 8.507059e+37 }
 0x3a9   :  { %v1215_v20 = vpop.eup %1214  ;;  %v750_v22 = vadd.f32 1.0, %v1213_v19 }
 0x3aa   :  { %v769_v24 = vadd.f32 1.0, %v1215_v20 }
 0x3ab   :  { %1218 = vrcp.f32 %v750_v22  ;;  %v762_v37 = vand.u32 2147483648, %v750_v22  ;;  %v760_v40 = vand.u32 2147483647, %v750_v22  ;;  %vm756_vm13 = vweird.f32 %v750_v22 }
 0x3ac   :  { %1220 = vrcp.f32 %v769_v24  ;;  %v1217_v27 = vpop.eup %1216  ;;  %v781_v45 = vand.u32 2147483648, %v769_v24  ;;  %v779_v49 = vand.u32 2147483647, %v769_v24  ;;  %vm775_vm15 = vweird.f32 %v769_v24 }
 0x3ad   :  { %v791_v35 = vmul.f32 %v1217_v27, %v789_v30  ;;  %1222 = vtanh.f32 %v722_v31  ;;  %v763_v53 = vor.u32 1.1754944e-38, %v762_v37  ;;  %vm761_vm0 = vcmp.eq.f32.partialorder %v760_v40, 8.507059e+37 }
 0x3ae   :  { %v782_v56 = vor.u32 1.1754944e-38, %v781_v45  ;;  %vm780_vm3 = vcmp.eq.f32.partialorder %v779_v49, 8.507059e+37  ;;  %vm796_vm4 = vweird.f32 %v1217_v27 }
 0x3af   :  { %v792_v50 = vsub.f32 1.0, %v791_v35  ;;  %vm797_vm6 = vmor %vm795_vm5, %vm796_vm4 }
 0x3b1   :  { %v1219_v28 = vpop.eup %1218  ;;  %v793_v63 = vmul.f32 %v1217_v27, %v792_v50 }
 0x3b2   :  { %v1221_v32 = vpop.eup %1220  ;;  %v752_v33 = vmul.f32 %v1219_v28, %v750_v22  ;;  %vm757_vm11 = vweird.f32 %v1219_v28 }
 0x3b3   :  { %v771_v34 = vmul.f32 %v1221_v32, %v769_v24  ;;  %vm776_vm12 = vweird.f32 %v1221_v32  ;;  %vm758_vm14 = vmor %vm756_vm13, %vm757_vm11  ;;  %v1223_v57 = vpop.eup %1222  ;;  %v794_v9 = vadd.f32 %v1217_v27, %v793_v63 }
 0x3b4   :  { %v753_v36 = vsub.f32 1.0, %v752_v33  ;;  %vm777_vm2 = vmor %vm775_vm15, %vm776_vm12 }
 0x3b5   :  { %v772_v38 = vsub.f32 1.0, %v771_v34  ;;  %v798_v0 = vsel %vm797_vm6, %v1217_v27, %v794_v9  ;;  %v979_v9 = vlaneseq }
 0x3b6   :  { %v754_v39 = vmul.f32 %v1219_v28, %v753_v36  ;;  %v803_v14 = vsel %vm800_vm7, %v802_v12, %v798_v0 }
 0x3b7   :  { %v773_v47 = vmul.f32 %v1221_v32, %v772_v38 }
 0x3b8   :  { %v755_v52 = vadd.f32 %v1219_v28, %v754_v39 }
 0x3b9   :  { %v774_v54 = vadd.f32 %v1221_v32, %v773_v47 }
 0x3ba   :  { %v759_v55 = vsel %vm758_vm14, %v1219_v28, %v755_v52 }
 0x3bb   :  { %v764_v60 = vsel %vm761_vm0, %v763_v53, %v759_v55  ;;  %v778_v61 = vsel %vm777_vm2, %v1221_v32, %v774_v54  ;;  %v1061_v32 = vld [vmem:[%s1665_s18 + $0x8] sm:$0xff] }
 0x3bc   :  { %v809_v1 = vmul.f32 %v1223_v57, %v764_v60  ;;  %v783_v2 = vsel %vm780_vm3, %v782_v56, %v778_v61  ;;  %1083 = vmatpush.msrb.mxu0 %v1061_v32 }
 0x3bd   :  { %v808_v7 = vmul.f32 %v806_v62, %v783_v2 }
 0x3bf   :  { %v1592_v8 = vadd.f32 %v809_v1, %v808_v7 }
 0x3c1   :  { %1224 = vtanh.f32 %v1592_v8  ;;  %v972_v62 = vrot.slane %v1592_v8, 6 }
 0x3c7   :  { %v1225_v13 = vpop.eup %1224 }
 0x3c8   :  { %v812_v5 = vmul.f32 %v1225_v13, %v803_v14  ;;  %v980_v13 = vshrl.u32 %v979_v9, 7 }
 0x3ca   :  { %v814_v15 = vrot.slane %v812_v5, 4  ;;  %vm989_vm5 = vcmp.ge.s32.totalorder %v980_v13, 3  ;;  %vm990_vm6 = vcmp.lt.s32.totalorder %v980_v13, 6  ;;  %vm982_vm7 = vcmp.lt.s32.totalorder %v980_v13, 3 }
 0x3cc   :  { %1151 = vmatmul.msk.f32.vlgmr.msrb.gmra.mxu2 %vm115_vm1, %v814_v15  ;;  %1152 = vmatmul.msk.f32.vlgmr.msrb.gmra.mxu3 %vm115_vm1, %v814_v15 }
 0x3cd   :  { %1153 = vmatmul.msk.f32.vlgmr.msra.gmra.mxu0 %vm115_vm1, %v814_v15  ;;  %1154 = vmatmul.msk.f32.vlgmr.msra.gmra.mxu1 %vm115_vm1, %v814_v15 }
 0x3d4   :  { %1158 = vmatmul.msk.f32.vlgmr.msra.gmra.mxu2 %vm115_vm1, %v1005_v41 }
 0x44a   :  { %v906_v16 = vpop.f32.mrf.mxu1  ;;  %v882_v23 = vpop.f32.mrf.mxu0 }
 0x44b   :  { %v910_v42 = vrot.slane %v906_v16, 2  ;;  %v886_v25 = vrot.slane %v882_v23, 2 }
 0x44d   :  { %v912_v17 = vadd.f32 %v910_v42, %v1547_v6  ;;  %v888_v31 = vadd.f32 %v886_v25, %v1555_v21 }
 0x44f   :  { %v1157_v46 = vmul.f32 -1.442695, %v912_v17  ;;  %v834_v43 = vpop.f32.mrf.mxu2  ;;  %v858_v58 = vpop.f32.mrf.mxu3 }
 0x450   :  { %v838_v44 = vrot.slane %v834_v43, 2  ;;  %v862_v48 = vrot.slane %v858_v58, 2 }
 0x451   :  { %1226 = vpow2.f32 %v1157_v46 }
 0x452   :  { %v840_v59 = vadd.f32 %v838_v44, %v1543_v3  ;;  %v864_v18 = vadd.f32 %v862_v48, %v1545_v4  ;;  %v1031_v3 = vld [vmem:[%s1664_s16 + $0x8] sm:$0xff]  ;;  %v1030_v4 = vld [vmem:[%s1664_s16] sm:$0xff] }
 0x453   :  { %1053 = vmatpush.msra.mxu3 %v1031_v3 }
 0x454   :  { %v1155_v29 = vmul.f32 -1.442695, %v840_v59  ;;  %v1156_v30 = vmul.f32 -1.442695, %v864_v18  ;;  %v1060_v59 = vld [vmem:[%s1665_s18] sm:$0xff]  ;;  %v1091_v18 = vld [vmem:[%s1667_s20 + $0x8] sm:$0xff] }
 0x455   :  { %1054 = vmatpush.msra.mxu3 %v1030_v4  ;;  %1084 = vmatpush.msrb.mxu0 %v1060_v59 }
 0x456   :  { %1228 = vpow2.f32 %v1155_v29  ;;  %1113 = vmatpush.msrb.mxu1 %v1091_v18  ;;  %v1175_v29 = vld [vmem:[%s1663_s17] ss:$0 sm:$0xff] }
 0x457   :  { %v1227_v26 = vpop.eup %1226  ;;  %1230 = vpow2.f32 %v1156_v30  ;;  %v1026_v17 = vpop.f32.mrf.mxu2 }
 0x458   :  { %v1604_v19 = vadd.f32 1.0, %v1227_v26  ;;  %v1027_v44 = vadd.f32 %v1503_v51, %v1026_v17 }
 0x45a   :  { %1232 = vrcp.f32 %v1604_v19  ;;  %v967_v0 = vand.u32 2147483648, %v1604_v19  ;;  %vm961_vm2 = vweird.f32 %v1604_v19  ;;  %v965_v12 = vand.u32 2147483647, %v1604_v19 }
 0x45c   :  { %v1229_v20 = vpop.eup %1228  ;;  %v968_v5 = vor.u32 1.1754944e-38, %v967_v0  ;;  %vm966_vm4 = vcmp.eq.f32.partialorder %v965_v12, 8.507059e+37 }
 0x45d   :  { %v1231_v22 = vpop.eup %1230  ;;  %v916_v6 = vadd.f32 1.0, %v1229_v20  ;;  %v1176_v20 = vld [vmem:[%s1666_s19] ss:$0 sm:$0xff] }
 0x45e   :  { %v935_v24 = vadd.f32 1.0, %v1231_v22 }
 0x45f   :  { %1234 = vrcp.f32 %v916_v6  ;;  %v928_v38 = vand.u32 2147483648, %v916_v6  ;;  %v926_v45 = vand.u32 2147483647, %v916_v6  ;;  %vm922_vm10 = vweird.f32 %v916_v6 }
 0x460   :  { %1236 = vrcp.f32 %v935_v24  ;;  %v1233_v27 = vpop.eup %1232  ;;  %v947_v47 = vand.u32 2147483648, %v935_v24  ;;  %v945_v21 = vand.u32 2147483647, %v935_v24  ;;  %vm941_vm12 = vweird.f32 %v935_v24 }
 0x461   :  { %v957_v36 = vmul.f32 %v1233_v27, %v1604_v19  ;;  %1238 = vtanh.f32 %v888_v31  ;;  %v929_v53 = vor.u32 1.1754944e-38, %v928_v38  ;;  %vm927_vm13 = vcmp.eq.f32.partialorder %v926_v45, 8.507059e+37  ;;  %v1090_v19 = vld [vmem:[%s1667_s20] sm:$0xff] }
 0x462   :  { %v948_v56 = vor.u32 1.1754944e-38, %v947_v47  ;;  %vm946_vm15 = vcmp.eq.f32.partialorder %v945_v21, 8.507059e+37  ;;  %vm962_vm0 = vweird.f32 %v1233_v27  ;;  %1114 = vmatpush.msrb.mxu1 %v1090_v19 }
 0x463   :  { %v958_v50 = vsub.f32 1.0, %v957_v36  ;;  %vm963_vm3 = vmor %vm961_vm2, %vm962_vm0 }
 0x465   :  { %v1235_v28 = vpop.eup %1234  ;;  %v959_v1 = vmul.f32 %v1233_v27, %v958_v50 }
 0x466   :  { %v1237_v33 = vpop.eup %1236  ;;  %v918_v34 = vmul.f32 %v1235_v28, %v916_v6  ;;  %vm923_vm8 = vweird.f32 %v1235_v28 }
 0x467   :  { %v937_v35 = vmul.f32 %v1237_v33, %v935_v24  ;;  %vm942_vm9 = vweird.f32 %v1237_v33  ;;  %vm924_vm11 = vmor %vm922_vm10, %vm923_vm8  ;;  %v1239_v57 = vpop.eup %1238  ;;  %v960_v11 = vadd.f32 %v1233_v27, %v959_v1  ;;  %v1177_v24 = vld [vmem:[%s1668_s21] ss:$0 sm:$0xff] }
 0x468   :  { %v919_v37 = vsub.f32 1.0, %v918_v34  ;;  %vm943_vm14 = vmor %vm941_vm12, %vm942_vm9  ;;  %vm1120_vm9 = vcmask 521216  }
 0x469   :  { %v938_v39 = vsub.f32 1.0, %v937_v35  ;;  %v964_v14 = vsel %vm963_vm3, %v1233_v27, %v960_v11  ;;  %vm991_vm8 = vmand %vm989_vm5, %vm990_vm6 }
 0x46a   :  { %v920_v40 = vmul.f32 %v1235_v28, %v919_v37  ;;  %v969_v15 = vsel %vm966_vm4, %v968_v5, %v964_v14 }
 0x46b   :  { %v939_v49 = vmul.f32 %v1237_v33, %v938_v39 }
 0x46c   :  { %v921_v52 = vadd.f32 %v1235_v28, %v920_v40 }
 0x46d   :  { %v940_v54 = vadd.f32 %v1237_v33, %v939_v49 }
 0x46e   :  { %v925_v55 = vsel %vm924_vm11, %v1235_v28, %v921_v52 }
 0x46f   :  { %v944_v60 = vsel %vm943_vm14, %v1237_v33, %v940_v54  ;;  %v930_v61 = vsel %vm927_vm13, %v929_v53, %v925_v55 }
 0x470   :  { %v949_v63 = vsel %vm946_vm15, %v948_v56, %v944_v60  ;;  %v975_v2 = vmul.f32 %v1239_v57, %v930_v61 }
 0x471   :  { %v974_v7 = vmul.f32 %v972_v62, %v949_v63 }
 0x473   :  { %v976_v10 = vadd.f32 %v975_v2, %v974_v7 }
 0x475   :  { %1240 = vtanh.f32 %v976_v10 }
 0x47b   :  { %v1241_v8 = vpop.eup %1240 }
 0x47c   :  { %v978_v41 = vmul.f32 %v1241_v8, %v969_v15 }
 0x47e   :  { %v984_v16 = vperm.slane %v978_v41, 6  ;;  %v992_v42 = vperm.slane %v978_v41, 7 }
 0x480   :  { %v987_v46 = vsel %vm982_vm7, %v984_v16, 0.0  ;;  %v995_v43 = vsel %vm991_vm8, %v992_v42, 0.0 }
 0x481   :  { %v996_v58 = vadd.f32 %v995_v43, %v987_v46 }
 0x483   :  { %v1029_v48 = vadd.f32 %v1027_v44, %v996_v58 }
 0x485   :  { %1159 = vmatmul.msk.f32.vlgmr.msra.gmra.mxu3 %vm115_vm1, %v1029_v48 }
 0x508   :  { %v1056_v30 = vpop.f32.mrf.mxu3 }
 0x509   :  { %v1057_v26 = vadd.f32 %v1175_v29, %v1056_v30 }
 0x50b   :  { %v1059_v51 = vmax.f32 %v1057_v26, 0.0 }
 0x50d   :  { %1160 = vmatmul.msk.f32.vlgmr.msrb.gmra.mxu0 %vm115_vm1, %v1059_v51 }
 0x58a   :  { %v1086_v22 = vpop.f32.mrf.mxu0 }
 0x58b   :  { %v1087_v6 = vadd.f32 %v1176_v20, %v1086_v22 }
 0x58d   :  { %v1089_v23 = vmax.f32 %v1087_v6, 0.0 }
 0x58f   :  { %1161 = vmatmul.msk.f32.vlgmr.msrb.gmra.mxu1 %vm115_vm1, %v1089_v23 }
 0x60c   :  { %v1116_v25 = vpop.f32.mrf.mxu1 }
 0x60d   :  { %v1117_v3 = vadd.f32 %v1177_v24, %v1116_v25 }
 0x60f   :  { %v1119_v4 = vmax.f32 %v1117_v3, 0.0 }
 0x611   :  { %1121 = vst.msk [vmem:[%s1669_s22] sm:$0x3f] %vm1120_vm9, %v1119_v4 }

// kernel: forward.8
= control target key start
LH: loop header
LB: loop body
LE: loop exit
PB: predicated region body
PF: predicated region fallthrough
CT: control target
= control target key end

     0   :  { %s1307_s17 = smov 0   ;;  %s1309_s18 = smov 0   ;;  %s1512_s0 = inlined_call_operand.vmem [shape: f32[16,384], index: 0, kind: input, shape index: {}]   ;;  %s1513_s1 = inlined_call_operand.vmem [shape: bf16[1,16,16], index: 1, kind: input, shape index: {}]   ;;  %s1514_s2 = inlined_call_operand.vmem [shape: f32[16,1], index: 2, kind: input, shape index: {}]   ;;  %s1515_s3 = inlined_call_operand.vmem [shape: bf16[7,16,16], index: 3, kind: input, shape index: {}]   ;;  %s1516_s4 = inlined_call_operand.vmem [shape: f32[16,1], index: 4, kind: input, shape index: {}]   ;;  %s1517_s5 = inlined_call_operand.vmem [shape: bf16[3,8,16], index: 5, kind: input, shape index: {}]   ;;  %s1518_s6 = inlined_call_operand.vmem [shape: f32[8,1], index: 6, kind: input, shape index: {}]   ;;  %s1519_s7 = inlined_call_operand.vmem [shape: bf16[3,16,8], index: 7, kind: input, shape index: {}]   ;;  %s1520_s8 = inlined_call_operand.vmem [shape: f32[16,1], index: 8, kind: input, shape index: {}]   ;;  %s1521_s9 = inlined_call_operand.vmem [shape: bf16[1,16,16], index: 9, kind: input, shape index: {}]   ;;  %s1522_s10 = inlined_call_operand.vmem [shape: f32[16,1], index: 10, kind: input, shape index: {}]   ;;  %s1523_s11 = inlined_call_operand.vmem [shape: f32[16,384], index: 11, kind: output, shape index: {}]  }
   0x1   :  { %s1311_s19 = smov 0  }
   0x2 LB: > { %s1045_s20 = sadd.s32 4294967295, %s1238_s19   ;;  %s1324_s21 = sadd.s32 1, %s1238_s19   ;;  %s1238_s19 = sphi %s1311_s19, %s1531_s19   ;;  %s1234_s18 = sphi %s1309_s18, %s1530_s18   ;;  %s1230_s17 = sphi %s1307_s17, %s1529_s17  }
   0x3   : > { %s25_s22 = ssub.s32 %s1238_s19, %s1324_s21  ;;  %s28_s23 = sadd.s32 1, %s1234_s18 }
   0x4   : > { %p26_p0 = scmp.eq.s32.totalorder %s25_s22, 0  ;;  %p35_p1 = scmp.ne.s32.totalorder %s1234_s18, %s1230_s17 }
   0x5   : > { %p36_p2 = scmp.eq.s32.totalorder %s1238_s19, 0  ;;  %p275_p3 = scmp.eq.s32.totalorder %s1045_s20, 2 }
   0x6   : > { %s1335_s24 = scalar_select %p26_p0, %s1234_s18, %s28_s23  }
   0x7   : > { %p37_p4 = por %p36_p2, %p35_p1  ;;  %p1337_p5 = por %p275_p3, %p35_p1 }
   0x8   : > { %p1048_p6 = scmp.ge.s32.totalorder %s1238_s19, 3 }
   0xa   : > { %327 = sbr.rel (%p1048_p6) target bundleno = 21 (0x15), region = 56 }
   0xf   : > { %330 = sbr.rel (!%p37_p4) target bundleno = 21 (0x15), region = 60  ;;  %s332_s26 = sand.u32 (%p37_p4), 1, %s1234_s18  }
  0x10   : > { %s1050_s27 = sshll.u32 (%p37_p4), %s1238_s19, 3  ;;  %s1049_s28 = sshll.u32 (%p37_p4), %s332_s26, 4 }
  0x11   : > { %s336_s12 = scalar_lea.vmem (%p37_p4), %s1512_s0, %s1050_s27  ;;  %s334_s13 = scalar_lea.vmem (%p37_p4), [#allocation2], %s1049_s28 }
  0x12   : > { %v367_v0 = vld [vmem:[%s336_s12] sm:$0xff] (%p37_p4)  ;;  %v369_v1 = vld [vmem:[%s336_s12 + $0x18] sm:$0xff] (%p37_p4) }
  0x13   : > { %368 = vst [vmem:[%s334_s13] sm:$0xff] (%p37_p4), %v367_v0 }
  0x14   : > { %370 = vst [vmem:[%s334_s13 + $0x8] sm:$0xff] %v369_v1 }
  0x15 PF: > { %p1051_p7 = scmp.ge.s32.totalorder %s1238_s19, 1  ;;  %p375_p8 = scmp.lt.s32.totalorder %s1238_s19, 4 }
  0x17   : > { %p376_p9 = pnand %p1051_p7, %p375_p8 }
  0x18   : > { %s382_s14 = sand.u32 (!%p376_p9), 1, %s1230_s17   ;;  %s1241_s29 = smov (!%p376_p9), 1  }
  0x19   : > { %379 = sbr.rel (%p376_p9) target bundleno = 751 (0x2ef), region = 98  ;;  %s1353_s22 = sshll.u32 (!%p376_p9), %s382_s14, 4 }
  0x1a   : > { %s384_s23 = scalar_lea.vmem (!%p376_p9), [#allocation2], %s1353_s22  ;;  %s1242_s30 = smov (!%p376_p9), 126  }
  0x1b   : > { %s1243_s12 = smov (!%p376_p9), 3   ;;  %s1244_s13 = smov (!%p376_p9), 127  }
  0x1c   : > { %s1245_s14 = smov (!%p376_p9), 2   ;;  %s1246_s15 = smov (!%p376_p9), 125  }
  0x1d   : > { %s419_s16 = scalar_lea.vmem (!%p376_p9), [#allocation3], %s1353_s22 }
  0x1e   : > { %v428_v2 = vld [vmem:[%s1514_s2] sm:$0xff]  ;;  %v1240_v3 = vmov 0   ;;  %v1358_v5 = vld [vmem:[%s384_s23 + $0x8] sm:$0xff]  ;;  %vm446_vm0 = vcmask 130048   ;;  %v421_v9 = vlaneseq  ;;  %v1133_v49 = vld [vmem:[%s1515_s3 + $0x10] sm:$0xff]  ;;  %vm780_vm4 = vcmask 1043456  }
  0x1f   : > { %1173 = vset.pattern.permute.xlu0 %v1240_v3  ;;  %1199 = vset.pattern.permute.xlu1 %v1240_v3  ;;  %v1356_v4 = vld [vmem:[%s384_s23] sm:$0xff]  ;;  %v429_v8 = vld [vmem:[%s1514_s2 + $0x8] sm:$0xff]  ;;  %v1134_v29 = vld [vmem:[%s1515_s3 + $0x18] sm:$0xff]  ;;  %vm776_vm5 = vcmask 64512   ;;  %s1127_s22 = sshll.u32 (%p1337_p5), %s1045_s20, 3 }
  0x20   : > { %433 = vperm.xlu0 %1173, %v428_v2   ;;  %1215 = vset.pattern.permute.xlu2 %v1240_v3  ;;  %v430_v6 = vpack.c.bf16 %v1358_v5, %v1356_v4  ;;  %v1130_v7 = vld [vmem:[%s1513_s1] sm:$0xff]  ;;  %v422_v10 = vand.u32 127, %v421_v9  ;;  %v925_v13 = vshrl.u32 %v421_v9, 7  ;;  %v1210_v53 = vpack.i.bf16 %v1358_v5, %v1356_v4  ;;  %v1132_v58 = vld [vmem:[%s1515_s3 + $0x8] sm:$0xff]  ;;  %v1137_v60 = vld [vmem:[%s1515_s3 + $0x30] sm:$0xff]  ;;  %s951_s26 = scalar_lea.vmem (%p1337_p5), %s1523_s11, %s1127_s22 }
  0x21   : > { %v701_v40 = vld [vmem:[%s1518_s6] sm:$0xff]  ;;  %v1136_v61 = vld [vmem:[%s1515_s3 + $0x28] sm:$0xff] }
  0x22   : > { %457 = vmatpush.bf16.msra.mxu0 %v430_v6  ;;  %v423_v12 = vand.u32 63, %v422_v10  ;;  %vm927_vm2 = vcmp.lt.s32.totalorder %v925_v13, 4  ;;  %v699_v41 = vld [vmem:[%s1517_s5 + $0x4] sm:$0xf]  ;;  %v766_v62 = vld [vmem:[%s1520_s8 + $0x8] sm:$0xff] }
  0x23   : > { %v1131_v51 = vld [vmem:[%s1515_s3] sm:$0xff]  ;;  %v700_v0 = vld [vmem:[%s1517_s5 + $0x8] sm:$0xf] }
  0x24   : > { %vm1369_vm1 = vcmp.lt.s32.totalorder %v423_v12, 12  ;;  %v485_v59 = vld [vmem:[%s1516_s4] sm:$0xff] }
  0x25   : > { %1058 = vmatmul.msk.bf16.vlgmr.msra.gmra.mxu0 %vm446_vm0, %v1130_v7  ;;  %vm1380_vm3 = vmpackc.low %vm1369_vm1, %vm1369_vm1  ;;  %v1135_v63 = vld [vmem:[%s1515_s3 + $0x20] sm:$0xff] }
  0x26   : > { %v698_v1 = vld [vmem:[%s1517_s5] sm:$0xf] }
  0x28   : > { %438 = vperm.xlu0 %1173, %v429_v8  }
  0x92   : > { %v434_v11 = vpop.permute.xlu0 %433 }
  0x9a   : > { %v439_v20 = vpop.permute.xlu0 %438 }
  0xa2   : > { %v459_v14 = vpop.f32.mrf.mxu0 }
  0xa3   : > { %v460_v15 = vadd.f32 %v459_v14, %v434_v11 }
  0xa5   : > { %v464_v17 = vmax.f32 %v460_v15, 0.0 }
  0xa7   : > { %v469_v18 = vsel %vm1369_vm1, %v464_v17, 0.0 }
  0xa8   : > { %v1375_v19 = vsel %vm927_vm2, %v469_v18, 0.0 }
  0xaa   : > { %v461_v21 = vpop.f32.mrf.mxu0 }
  0xab   : > { %v462_v22 = vadd.f32 %v461_v21, %v439_v20 }
  0xad   : > { %v465_v23 = vmax.f32 %v462_v22, 0.0 }
  0xaf   : > { %v470_v25 = vsel %vm1369_vm1, %v465_v23, 0.0  ;;  %v1079_v26 = vpack.c.bf16 %v465_v23, %v464_v17  ;;  %v1141_v23 = vld [vmem:[%s1521_s9] sm:$0xff] }
  0xb0   : > { %v1194_v27 = vpack.i.bf16 %v470_v25, %v469_v18 }
  0xb1   : > { %1080 = vmatpush.bf16.msk.msrb.mxu0 %vm1380_vm3, %v1079_v26 }
  0xb2   : > { %1195 = vrot.lane.b32.xlu0 %v1194_v27, %s1241_s29  ;;  %1185 = vrot.lane.b32.xlu2 %v1194_v27, %s1242_s30 }
  0xb3   : > { %1175 = vrot.lane.b32.xlu1 %v1194_v27, %s1243_s12 }
  0xb4   : > { %1081 = vmatmul.msk.bf16.vlgmr.msrb.gmra.mxu0 %vm446_vm0, %v1134_v29 }
  0xb5   : > { %1099 = vmatpush.bf16.msk.msra.mxu0 %vm1380_vm3, %v1079_v26 }
  0xba   : > { %1190 = vrot.lane.b32.xlu2 %v1194_v27, %s1244_s13  ;;  %1206 = vrot.lane.b32.xlu0 %v1210_v53, %s1241_s29 }
  0xbb   : > { %1180 = vrot.lane.b32.xlu1 %v1194_v27, %s1245_s14 }
  0xc2   : > { %1201 = vrot.lane.b32.xlu2 %v1194_v27, %s1246_s15 }
  0xc3   : > { %753 = vperm.xlu1 %1199, %v701_v40  }
  0xc4   : > { %1100 = vmatmul.msk.bf16.vlgmr.msra.gmra.mxu0 %vm446_vm0, %v699_v41 }
  0xcb   : > { %1211 = vrot.lane.b32.xlu1 %v1210_v53, %s1244_s13 }
  0xd3   : > { %684 = vperm.xlu1 %1199, %v485_v59   ;;  %v486_v59 = vld [vmem:[%s1516_s4 + $0x8] sm:$0xff] }
  0xdb   : > { %860 = vperm.xlu1 %1199, %v766_v62  }
 0x10c   : > { %v1186_v28 = vpop.permute.xlu2 %1185 }
 0x10d   : > { %v1188_v35 = vunpack.i.h.bf16 %v1186_v28  ;;  %v1187_v36 = vunpack.i.l.bf16 %v1186_v28 }
 0x10f   : > { %v628_v50 = vpack.c.bf16 %v1188_v35, %v1187_v36 }
 0x114   : > { %v1191_v30 = vpop.permute.xlu2 %1190 }
 0x115   : > { %v1193_v45 = vunpack.i.h.bf16 %v1191_v30  ;;  %v1192_v46 = vunpack.i.l.bf16 %v1191_v30 }
 0x117   : > { %v599_v52 = vpack.c.bf16 %v1193_v45, %v1192_v46 }
 0x11c   : > { %v1202_v31 = vpop.permute.xlu2 %1201 }
 0x11d   : > { %v1204_v32 = vunpack.i.h.bf16 %v1202_v31  ;;  %v1203_v33 = vunpack.i.l.bf16 %v1202_v31 }
 0x11f   : > { %v657_v48 = vpack.c.bf16 %v1204_v32, %v1203_v33 }
 0x124   : > { %v1196_v34 = vpop.permute.xlu0 %1195 }
 0x125   : > { %v1198_v37 = vunpack.i.h.bf16 %v1196_v34  ;;  %v1197_v38 = vunpack.i.l.bf16 %v1196_v34  ;;  %v1176_v39 = vpop.permute.xlu1 %1175 }
 0x126   : > { %v1178_v42 = vunpack.i.h.bf16 %v1176_v39  ;;  %v1177_v43 = vunpack.i.l.bf16 %v1176_v39 }
 0x127   : > { %v545_v44 = vpack.c.bf16 %v1198_v37, %v1197_v38 }
 0x128   : > { %v491_v47 = vpack.c.bf16 %v1178_v42, %v1177_v43 }
 0x129   : > { %561 = vmatpush.bf16.msra.mxu3 %v545_v44 }
 0x12a   : > { %534 = vmatpush.bf16.msra.mxu2 %v491_v47 }
 0x12c   : > { %1073 = vmatmul.msk.bf16.vlgmr.msra.gmra.mxu3 %vm446_vm0, %v1133_v49  ;;  %v1207_v8 = vpop.permute.xlu0 %1206 }
 0x12d   : > { %673 = vmatpush.bf16.msrb.mxu3 %v657_v48  ;;  %v1181_v54 = vpop.permute.xlu1 %1180  ;;  %1068 = vmatmul.msk.bf16.vlgmr.msra.gmra.mxu2 %vm446_vm0, %v1131_v51  ;;  %v1209_v11 = vunpack.i.h.bf16 %v1207_v8  ;;  %v1208_v12 = vunpack.i.l.bf16 %v1207_v8  ;;  %v1140_v8 = vld [vmem:[%s1519_s7 + $0x10] sm:$0xff] }
 0x12e   : > { %644 = vmatpush.bf16.msrb.mxu2 %v628_v50  ;;  %v1183_v55 = vunpack.i.h.bf16 %v1181_v54  ;;  %v1182_v56 = vunpack.i.l.bf16 %v1181_v54 }
 0x12f   : > { %v874_v13 = vmax.f32 %v1358_v5, %v1209_v11  ;;  %v873_v14 = vmax.f32 %v1356_v4, %v1208_v12 }
 0x130   : > { %v496_v57 = vpack.c.bf16 %v1183_v55, %v1182_v56 }
 0x131   : > { %v588_v2 = vpop.f32.mrf.mxu0 }
 0x132   : > { %744 = vmatpush.bf16.msra.mxu2 %v599_v52  ;;  %512 = vmatpush.bf16.msra.mxu1 %v496_v57 }
 0x135   : > { %1063 = vmatmul.msk.bf16.vlgmr.msra.gmra.mxu1 %vm446_vm0, %v1132_v58  ;;  %v754_v3 = vpop.permute.xlu1 %753 }
 0x136   : > { %615 = vmatpush.bf16.msrb.mxu1 %v599_v52 }
 0x139   : > { %v590_v6 = vpop.f32.mrf.mxu0 }
 0x13a   : > { %728 = vmatpush.bf16.msra.mxu1 %v545_v44 }
 0x13c   : > { %1096 = vmatmul.msk.bf16.vlgmr.msrb.gmra.mxu3 %vm446_vm0, %v1137_v60  ;;  %v886_v60 = vld [vmem:[%s1522_s10 + $0x8] sm:$0xff] }
 0x13d   : > { %1091 = vmatmul.msk.bf16.vlgmr.msrb.gmra.mxu2 %vm446_vm0, %v1136_v61  ;;  %v1212_v7 = vpop.permute.xlu1 %1211  ;;  %v1139_v61 = vld [vmem:[%s1519_s7 + $0x8] sm:$0xff] }
 0x13e   : > { %v1214_v9 = vunpack.i.h.bf16 %v1212_v7  ;;  %v1213_v10 = vunpack.i.l.bf16 %v1212_v7 }
 0x140   : > { %v879_v17 = vmax.f32 %v873_v14, %v1213_v10  ;;  %v880_v18 = vmax.f32 %v874_v13, %v1214_v9 }
 0x141   : > { %v714_v15 = vpop.f32.mrf.mxu0 }
 0x142   : > { %v1123_v20 = vpack.c.bf16 %v880_v18, %v879_v17 }
 0x144   : > { %1124 = vmatpush.bf16.msk.msrb.mxu2 %vm1380_vm3, %v1123_v20 }
 0x145   : > { %1086 = vmatmul.msk.bf16.vlgmr.msrb.gmra.mxu1 %vm446_vm0, %v1135_v63  ;;  %v685_v38 = vpop.permute.xlu1 %684 }
 0x149   : > { %v716_v26 = vpop.f32.mrf.mxu0 }
 0x14d   : > { %1102 = vmatmul.msk.bf16.vlgmr.msra.gmra.mxu2 %vm446_vm0, %v700_v0 }
 0x155   : > { %1101 = vmatmul.msk.bf16.vlgmr.msra.gmra.mxu1 %vm446_vm0, %v698_v1  ;;  %v1138_v1 = vld [vmem:[%s1519_s7] sm:$0xff] }
 0x15d   : > { %1125 = vmatmul.msk.bf16.vlgmr.msrb.gmra.mxu2 %vm446_vm0, %v1141_v23 }
 0x1af   : > { %v563_v22 = vpop.f32.mrf.mxu3 }
 0x1b0   : > { %v536_v21 = vpop.f32.mrf.mxu2 }
 0x1b2   : > { %v514_v25 = vpop.f32.mrf.mxu1 }
 0x1b3   : > { %v537_v27 = vadd.f32 %v536_v21, %v514_v25 }
 0x1b5   : > { %v568_v5 = vadd.f32 %v563_v22, %v537_v27 }
 0x1b7   : > { %v593_v4 = vadd.f32 %v588_v2, %v568_v5  ;;  %v565_v30 = vpop.f32.mrf.mxu3  ;;  %v885_v2 = vld [vmem:[%s1522_s10] sm:$0xff] }
 0x1b8   : > { %v538_v28 = vpop.f32.mrf.mxu2 }
 0x1ba   : > { %v516_v29 = vpop.f32.mrf.mxu1 }
 0x1bb   : > { %v539_v31 = vadd.f32 %v538_v28, %v516_v29 }
 0x1bd   : > { %v569_v32 = vadd.f32 %v565_v30, %v539_v31 }
 0x1bf   : > { %v594_v33 = vadd.f32 %v590_v6, %v569_v32  ;;  %v675_v36 = vpop.f32.mrf.mxu3 }
 0x1c0   : > { %v646_v34 = vpop.f32.mrf.mxu2 }
 0x1c2   : > { %v617_v24 = vpop.f32.mrf.mxu1 }
 0x1c3   : > { %v622_v35 = vadd.f32 %v617_v24, %v593_v4 }
 0x1c5   : > { %v651_v37 = vadd.f32 %v646_v34, %v622_v35 }
 0x1c7   : > { %v680_v39 = vadd.f32 %v675_v36, %v651_v37  ;;  %v677_v9 = vpop.f32.mrf.mxu3  ;;  %v861_v36 = vpop.permute.xlu1 %860 }
 0x1c8   : > { %v648_v40 = vpop.f32.mrf.mxu2 }
 0x1c9   : > { %v692_v41 = vadd.f32 %v685_v38, %v680_v39 }
 0x1ca   : > { %v619_v42 = vpop.f32.mrf.mxu1 }
 0x1cb   : > { %v694_v43 = vmax.f32 %v692_v41, 0.0  ;;  %v623_v44 = vadd.f32 %v619_v42, %v594_v33 }
 0x1cd   : > { %v696_v45 = vsel %vm1369_vm1, %v694_v43, 0.0  ;;  %v652_v46 = vadd.f32 %v648_v40, %v623_v44 }
 0x1ce   : > { %v935_v47 = vadd.f32 %v1375_v19, %v696_v45  ;;  %v765_v19 = vld [vmem:[%s1520_s8] sm:$0xff] }
 0x1cf   : > { %v681_v27 = vadd.f32 %v677_v9, %v652_v46 }
 0x1d0   : > { %v746_v48 = vpop.f32.mrf.mxu2 }
 0x1d2   : > { %v730_v49 = vpop.f32.mrf.mxu1 }
 0x1d3   : > { %v731_v50 = vadd.f32 %v730_v49, %v714_v15 }
 0x1d5   : > { %v750_v51 = vadd.f32 %v746_v48, %v731_v50 }
 0x1d7   : > { %v756_v52 = vadd.f32 %v754_v3, %v750_v51 }
 0x1d8   : > { %v748_v53 = vpop.f32.mrf.mxu2 }
 0x1d9   : > { %v757_v54 = vmax.f32 %v756_v52, 0.0 }
 0x1da   : > { %v732_v55 = vpop.f32.mrf.mxu1 }
 0x1db   : > { %v758_v56 = vsel %vm1369_vm1, %v757_v54, 0.0 }
 0x1dc   : > { %823 = vrot.lane.b32.xlu0 %v758_v56, %s1244_s13  ;;  %v770_v57 = vpack.c.bf16 %v758_v56, %v758_v56  ;;  %767 = vrot.lane.b32.xlu2 %v758_v56, %s1241_s29 }
 0x1de   : > { %v782_v58 = vsel %vm780_vm4, %v770_v57, 0 }
 0x1df   : > { %791 = vmatpush.bf16.msra.mxu3 %v782_v58 }
 0x1e0   : > { %v915_v13 = vpop.f32.mrf.mxu2 }
 0x1e2   : > { %1107 = vmatmul.msk.bf16.vlgmr.msra.gmra.mxu3 %vm776_vm5, %v1139_v61 }
 0x1e4   : > { %855 = vperm.xlu0 %1173, %v765_v19   ;;  %689 = vperm.xlu2 %1215, %v486_v59  }
 0x1e8   : > { %v917_v28 = vpop.f32.mrf.mxu2 }
 0x1ec   : > { %895 = vperm.xlu0 %1173, %v886_v60   ;;  %890 = vperm.xlu2 %1215, %v885_v2  }
 0x236   : > { %v768_v62 = vpop.permute.xlu2 %767 }
 0x237   : > { %v769_v63 = vpack.c.bf16 %v768_v62, %v768_v62 }
 0x239   : > { %v807_v0 = vsel %vm780_vm4, %v769_v63, 0 }
 0x23a   : > { %816 = vmatpush.bf16.msrb.mxu0 %v807_v0 }
 0x23d   : > { %1112 = vmatmul.msk.bf16.vlgmr.msrb.gmra.mxu0 %vm776_vm5, %v1138_v1 }
 0x23e   : > { %v690_v10 = vpop.permute.xlu2 %689 }
 0x23f   : > { %v693_v29 = vadd.f32 %v690_v10, %v681_v27 }
 0x241   : > { %v695_v38 = vmax.f32 %v693_v29, 0.0 }
 0x243   : > { %v697_v42 = vsel %vm1369_vm1, %v695_v38, 0.0 }
 0x246   : > { %v891_v15 = vpop.permute.xlu2 %890 }
 0x247   : > { %v916_v18 = vadd.f32 %v915_v13, %v891_v15 }
 0x249   : > { %v920_v23 = vmax.f32 %v916_v18, 0.0 }
 0x24b   : > { %v922_v31 = vsel %vm1369_vm1, %v920_v23, 0.0 }
 0x24e   : > { %v824_v3 = vpop.permute.xlu0 %823 }
 0x24f   : > { %v825_v6 = vpack.c.bf16 %v824_v3, %v824_v3 }
 0x251   : > { %v835_v7 = vsel %vm780_vm4, %v825_v6, 0 }
 0x252   : > { %844 = vmatpush.bf16.msrb.mxu1 %v835_v7 }
 0x255   : > { %1117 = vmatmul.msk.bf16.vlgmr.msrb.gmra.mxu1 %vm776_vm5, %v1140_v8 }
 0x256   : > { %v856_v14 = vpop.permute.xlu0 %855 }
 0x25e   : > { %v896_v4 = vpop.permute.xlu0 %895 }
 0x25f   : > { %v918_v24 = vadd.f32 %v917_v28, %v896_v4 }
 0x261   : > { %v921_v40 = vmax.f32 %v918_v24, 0.0 }
 0x263   : > { %v923_v45 = vsel %vm1369_vm1, %v921_v40, 0.0 }
 0x265   : > { %v793_v11 = vpop.f32.mrf.mxu3 }
 0x26d   : > { %v795_v25 = vpop.f32.mrf.mxu3 }
 0x2ba   : > { %v818_v12 = vpop.f32.mrf.mxu0 }
 0x2bb   : > { %v819_v17 = vadd.f32 %v818_v12, %v793_v11 }
 0x2c2   : > { %v820_v26 = vpop.f32.mrf.mxu0 }
 0x2c3   : > { %v821_v32 = vadd.f32 %v820_v26, %v795_v25 }
 0x2d2   : > { %v846_v20 = vpop.f32.mrf.mxu1 }
 0x2d3   : > { %v851_v21 = vadd.f32 %v846_v20, %v819_v17 }
 0x2d5   : > { %v863_v22 = vadd.f32 %v856_v14, %v851_v21 }
 0x2d7   : > { %v865_v5 = vmax.f32 %v863_v22, 0.0 }
 0x2d9   : > { %v867_v30 = vsel %vm1369_vm1, %v865_v5, 0.0 }
 0x2da   : > { %v937_v33 = vadd.f32 %v935_v47, %v867_v30  ;;  %v848_v34 = vpop.f32.mrf.mxu1 }
 0x2db   : > { %v852_v35 = vadd.f32 %v848_v34, %v821_v32 }
 0x2dc   : > { %v939_v37 = vadd.f32 %v937_v33, %v922_v31 }
 0x2dd   : > { %v864_v39 = vadd.f32 %v861_v36, %v852_v35 }
 0x2de   : > { %941 = vst [vmem:[%s419_s16] sm:$0xff] %v939_v37 }
 0x2df   : > { %v866_v41 = vmax.f32 %v864_v39, 0.0 }
 0x2e1   : > { %v868_v43 = vsel %vm1369_vm1, %v866_v41, 0.0 }
 0x2e2   : > { %v938_v44 = vadd.f32 %v868_v43, %v697_v42  ;;  %949 = sbr.rel (!%p1337_p5) target bundleno = 751 (0x2ef), region = 106 }
 0x2e4   : > { %v940_v46 = vadd.f32 %v938_v44, %v923_v45 }
 0x2e5   : > { %v982_v47 = vld [vmem:[%s419_s16] sm:$0xff] (%p1337_p5) }
 0x2e6   : > { %942 = vst [vmem:[%s419_s16 + $0x8] sm:$0xff] %v940_v46 }
 0x2e7   : > { %983 = vst [vmem:[%s951_s26] sm:$0xff] %v982_v47 }
 0x2ed   : > { %v984_v48 = vld [vmem:[%s419_s16 + $0x8] sm:$0xff] }
 0x2ee   : > { %985 = vst [vmem:[%s951_s26 + $0x18] sm:$0xff] %v984_v48 }
 0x2ef PF: > { %p18_p10 = scmp.ge.s32.totalorder %s1324_s21, 5   ;;  %s1529_s17 = smov %s1234_s18 }
 0x2f0   : > { %s1530_s18 = smov %s1335_s24  ;;  %s1531_s19 = smov %s1324_s21 }
 0x2f1   :  { %20 = sbr.rel (!%p18_p10) target bundleno = 2 (0x2), region = 175 }

// kernel: forward.9
= control target key start
LH: loop header
LB: loop body
LE: loop exit
PB: predicated region body
PF: predicated region fallthrough
CT: control target
= control target key end

     0   :  { %s1072_s30 = smov 0   ;;  %s1074_s10 = smov 0   ;;  %s1221_s0 = inlined_call_operand.vmem [shape: f32[16,384], index: 0, kind: input, shape index: {}]   ;;  %s1222_s1 = inlined_call_operand.vmem [shape: bf16[3,16,16], index: 1, kind: input, shape index: {}]   ;;  %s1223_s2 = inlined_call_operand.vmem [shape: f32[16,1], index: 2, kind: input, shape index: {}]   ;;  %s1224_s3 = inlined_call_operand.vmem [shape: bf16[3,16,16], index: 3, kind: input, shape index: {}]   ;;  %s1225_s4 = inlined_call_operand.vmem [shape: f32[16,1], index: 4, kind: input, shape index: {}]   ;;  %s1226_s5 = inlined_call_operand.vmem [shape: bf16[7,8,16], index: 5, kind: input, shape index: {}]   ;;  %s1227_s6 = inlined_call_operand.vmem [shape: f32[8,1], index: 6, kind: input, shape index: {}]   ;;  %s1228_s7 = inlined_call_operand.vmem [shape: bf16[1,8,8], index: 7, kind: input, shape index: {}]   ;;  %s1229_s8 = inlined_call_operand.vmem [shape: f32[8,1], index: 8, kind: input, shape index: {}]   ;;  %s1230_s9 = inlined_call_operand.vmem [shape: f32[8,384], index: 9, kind: output, shape index: {}]  }
   0x1   :  { %s1076_s11 = smov 0  }
   0x2 LB: > { %s847_s12 = sadd.s32 4294967295, %s1013_s11   ;;  %s1089_s13 = sadd.s32 1, %s1013_s11   ;;  %s1013_s11 = sphi %s1076_s11, %s1233_s11   ;;  %s1009_s10 = sphi %s1074_s10, %s1232_s10   ;;  %s1005_s30 = sphi %s1072_s30, %s1231_s30  }
   0x3   : > { %s23_s14 = ssub.s32 %s1013_s11, %s1089_s13  ;;  %s26_s15 = sadd.s32 1, %s1009_s10 }
   0x4   : > { %p24_p0 = scmp.eq.s32.totalorder %s23_s14, 0  ;;  %p33_p1 = scmp.ne.s32.totalorder %s1009_s10, %s1005_s30 }
   0x5   : > { %p34_p2 = scmp.eq.s32.totalorder %s1013_s11, 0  ;;  %p850_p4 = scmp.ge.s32.totalorder %s1013_s11, 3 }
   0x6   : > { %s1098_s16 = scalar_select %p24_p0, %s1009_s10, %s26_s15  }
   0x7   : > { %p35_p3 = por %p34_p2, %p33_p1  ;;  %277 = sbr.rel (%p850_p4) target bundleno = 18 (0x12), region = 48 }
   0xc   : > { %280 = sbr.rel (!%p35_p3) target bundleno = 18 (0x12), region = 52  ;;  %s282_s17 = sand.u32 (%p35_p3), 1, %s1009_s10  }
   0xd   : > { %s852_s18 = sshll.u32 (%p35_p3), %s1013_s11, 3  ;;  %s851_s19 = sshll.u32 (%p35_p3), %s282_s17, 4 }
   0xe   : > { %s286_s22 = scalar_lea.vmem (%p35_p3), %s1221_s0, %s852_s18  ;;  %s284_s23 = scalar_lea.vmem (%p35_p3), [#allocation2], %s851_s19 }
   0xf   : > { %v317_v0 = vld [vmem:[%s286_s22] sm:$0xff] (%p35_p3)  ;;  %v319_v1 = vld [vmem:[%s286_s22 + $0x18] sm:$0xff] (%p35_p3) }
  0x10   : > { %318 = vst [vmem:[%s284_s23] sm:$0xff] (%p35_p3), %v317_v0 }
  0x11   : > { %320 = vst [vmem:[%s284_s23 + $0x8] sm:$0xff] %v319_v1 }
  0x12 PF: > { %p853_p5 = scmp.ge.s32.totalorder %s1013_s11, 1  ;;  %p325_p6 = scmp.lt.s32.totalorder %s1013_s11, 4 }
  0x14   : > { %p326_p7 = pnand %p853_p5, %p325_p6 }
  0x15   : > { %s332_s24 = sand.u32 (!%p326_p7), 1, %s1005_s30   ;;  %s1015_s27 = smov (!%p326_p7), 2  }
  0x16   : > { %329 = sbr.rel (%p326_p7) target bundleno = 975 (0x3cf), region = 90  ;;  %s854_s25 = sshll.u32 (!%p326_p7), %s332_s24, 4 }
  0x17   : > { %s334_s26 = scalar_lea.vmem (!%p326_p7), [#allocation2], %s854_s25  ;;  %s1016_s28 = smov (!%p326_p7), 1  }
  0x18   : > { %s1018_s19 = smov (!%p326_p7), 6   ;;  %s1019_s20 = smov (!%p326_p7), 5  }
  0x19   : > { %s1020_s23 = smov (!%p326_p7), 4   ;;  %p366_p8 = scmp.lt.s32.totalorder (!%p326_p7), %s847_s12, 2 }
  0x1b   : > { %v374_v2 = vld [vmem:[%s334_s26] sm:$0xff]  ;;  %v375_v3 = vld [vmem:[%s334_s26 + $0x8] sm:$0xff]  ;;  %vm399_vm0 = vcmask 130048   ;;  %v1017_v8 = vmov 0   ;;  %v371_v26 = vlaneseq  ;;  %s1021_s26 = smov 3   ;;  %vm768_vm6 = vcmask 1043456  }
  0x1c   : > { %v939_v4 = vpack.i.bf16 %v375_v3, %v374_v2  ;;  %v439_v5 = vpack.c.bf16 %v375_v3, %v374_v2  ;;  %v904_v6 = vld [vmem:[%s1222_s1 + $0x10] sm:$0xff]  ;;  %v382_v7 = vld [vmem:[%s1223_s2] sm:$0xff]  ;;  %949 = vset.pattern.permute.xlu1 %v1017_v8  ;;  %960 = vset.pattern.permute.xlu0 %v1017_v8  ;;  %v383_v9 = vld [vmem:[%s1223_s2 + $0x8] sm:$0xff]  ;;  %vm764_vm7 = vcmask 64512   ;;  %s1235_s12 = smov (!%p366_p8, %s847_s12), 2 }
  0x1d   : > { %466 = vperm.xlu1 %949, %v382_v7   ;;  %v490_v10 = vld [vmem:[%s1225_s4 + $0x8] sm:$0xff]  ;;  %v902_v15 = vld [vmem:[%s1222_s1] sm:$0xff]  ;;  %v372_v28 = vand.u32 127, %v371_v26  ;;  %v907_v44 = vld [vmem:[%s1224_s3 + $0x10] sm:$0xff] }
  0x1e   : > { %940 = vrot.lane.b32.xlu0 %v939_v4, %s1015_s27  ;;  %455 = vmatpush.bf16.msra.mxu2 %v439_v5  ;;  %v903_v20 = vld [vmem:[%s1222_s1 + $0x8] sm:$0xff]  ;;  %v489_v45 = vld [vmem:[%s1225_s4] sm:$0xff] }
  0x1f   : > { %v1132_v34 = vand.u32 63, %v372_v28  ;;  %v906_v50 = vld [vmem:[%s1224_s3 + $0x8] sm:$0xff]  ;;  %v905_v55 = vld [vmem:[%s1224_s3] sm:$0xff] }
  0x20   : > { %v592_v28 = vld [vmem:[%s1226_s5 + $0xc] sm:$0xf] }
  0x21   : > { %870 = vmatmul.msk.bf16.vlgmr.msra.gmra.mxu2 %vm399_vm0, %v904_v6  ;;  %vm478_vm1 = vcmp.lt.s32.totalorder %v1132_v34, 38  ;;  %vm584_vm3 = vcmp.lt.s32.totalorder %v1132_v34, 40  ;;  %vm752_vm5 = vcmp.lt.s32.totalorder %v1132_v34, 46 }
  0x22   : > { %vm885_vm2 = vmpackc.low %vm478_vm1, %vm478_vm1 }
  0x23   : > { %vm895_vm4 = vmpackc.low %vm584_vm3, %vm584_vm3 }
  0x25   : > { %471 = vperm.xlu1 %949, %v383_v9  }
  0x26   : > { %945 = vrot.lane.b32.xlu0 %v939_v4, %s1016_s28 }
  0x2d   : > { %577 = vperm.xlu1 %949, %v490_v10  }
  0x2e   : > { %572 = vperm.xlu0 %960, %v489_v45   ;;  %v594_v45 = vld [vmem:[%s1226_s5 + $0x14] sm:$0xf] }
  0x8f   : > { %v467_v25 = vpop.permute.xlu1 %466 }
  0x90   : > { %v941_v11 = vpop.permute.xlu0 %940 }
  0x91   : > { %v943_v12 = vunpack.i.h.bf16 %v941_v11  ;;  %v942_v13 = vunpack.i.l.bf16 %v941_v11 }
  0x93   : > { %v388_v14 = vpack.c.bf16 %v943_v12, %v942_v13  ;;  %v596_v12 = vld [vmem:[%s1227_s6] sm:$0xff] }
  0x94   : > { %v757_v13 = vld [vmem:[%s1229_s8] sm:$0xff] }
  0x95   : > { %432 = vmatpush.bf16.msra.mxu1 %v388_v14 }
  0x97   : > { %v472_v36 = vpop.permute.xlu1 %471 }
  0x98   : > { %v946_v16 = vpop.permute.xlu0 %945  ;;  %865 = vmatmul.msk.bf16.vlgmr.msra.gmra.mxu1 %vm399_vm0, %v902_v15 }
  0x99   : > { %v948_v17 = vunpack.i.h.bf16 %v946_v16  ;;  %v947_v18 = vunpack.i.l.bf16 %v946_v16 }
  0x9b   : > { %v393_v19 = vpack.c.bf16 %v948_v17, %v947_v18  ;;  %v590_v18 = vld [vmem:[%s1226_s5 + $0x4] sm:$0xf] }
  0x9d   : > { %410 = vmatpush.bf16.msra.mxu0 %v393_v19 }
  0x9f   : > { %v578_v4 = vpop.permute.xlu1 %577 }
  0xa0   : > { %860 = vmatmul.msk.bf16.vlgmr.msra.gmra.mxu0 %vm399_vm0, %v903_v20  ;;  %v573_v61 = vpop.permute.xlu0 %572 }
  0xa4   : > { %v457_v22 = vpop.f32.mrf.mxu2 }
  0xac   : > { %v459_v33 = vpop.f32.mrf.mxu2 }
 0x115   : > { %v434_v21 = vpop.f32.mrf.mxu1 }
 0x11d   : > { %v412_v23 = vpop.f32.mrf.mxu0  ;;  %v436_v29 = vpop.f32.mrf.mxu1 }
 0x11e   : > { %v435_v24 = vadd.f32 %v434_v21, %v412_v23  ;;  %v591_v23 = vld [vmem:[%s1226_s5 + $0x8] sm:$0xf] }
 0x120   : > { %v462_v27 = vadd.f32 %v457_v22, %v435_v24 }
 0x122   : > { %v474_v31 = vadd.f32 %v467_v25, %v462_v27 }
 0x124   : > { %v476_v37 = vmax.f32 %v474_v31, 0.0 }
 0x125   : > { %v414_v30 = vpop.f32.mrf.mxu0 }
 0x126   : > { %v437_v32 = vadd.f32 %v436_v29, %v414_v30  ;;  %v481_v41 = vsel %vm478_vm1, %v476_v37, 0.0 }
 0x128   : > { %v463_v35 = vadd.f32 %v459_v33, %v437_v32 }
 0x12a   : > { %v475_v38 = vadd.f32 %v472_v36, %v463_v35 }
 0x12c   : > { %v477_v39 = vmax.f32 %v475_v38, 0.0  ;;  %v589_v38 = vld [vmem:[%s1226_s5] sm:$0xf] }
 0x12e   : > { %v886_v40 = vpack.c.bf16 %v477_v39, %v476_v37  ;;  %v482_v42 = vsel %vm478_vm1, %v477_v39, 0.0  ;;  %v593_v39 = vld [vmem:[%s1226_s5 + $0x10] sm:$0xf] }
 0x12f   : > { %v950_v43 = vpack.i.bf16 %v482_v42, %v481_v41 }
 0x130   : > { %887 = vmatpush.bf16.msk.msrb.mxu1 %vm885_vm2, %v886_v40  ;;  %v595_v40 = vld [vmem:[%s1226_s5 + $0x18] sm:$0xf] }
 0x131   : > { %951 = vrot.lane.b32.xlu2 %v950_v43, %s1016_s28 }
 0x133   : > { %888 = vmatmul.msk.bf16.vlgmr.msrb.gmra.mxu1 %vm399_vm0, %v907_v44 }
 0x139   : > { %956 = vrot.lane.b32.xlu2 %v950_v43, %s1015_s27 }
 0x18b   : > { %v952_v46 = vpop.permute.xlu2 %951 }
 0x18c   : > { %v954_v47 = vunpack.i.h.bf16 %v952_v46  ;;  %v953_v48 = vunpack.i.l.bf16 %v952_v46 }
 0x18e   : > { %v500_v49 = vpack.c.bf16 %v954_v47, %v953_v48 }
 0x190   : > { %516 = vmatpush.bf16.msra.mxu3 %v500_v49 }
 0x193   : > { %v957_v51 = vpop.permute.xlu2 %956  ;;  %875 = vmatmul.msk.bf16.vlgmr.msra.gmra.mxu3 %vm399_vm0, %v906_v50 }
 0x194   : > { %v959_v52 = vunpack.i.h.bf16 %v957_v51  ;;  %v958_v53 = vunpack.i.l.bf16 %v957_v51 }
 0x196   : > { %v495_v54 = vpack.c.bf16 %v959_v52, %v958_v53 }
 0x198   : > { %538 = vmatpush.bf16.msrb.mxu0 %v495_v54 }
 0x19b   : > { %880 = vmatmul.msk.bf16.vlgmr.msrb.gmra.mxu0 %vm399_vm0, %v905_v55 }
 0x1b0   : > { %v563_v57 = vpop.f32.mrf.mxu1 }
 0x1b8   : > { %v565_v2 = vpop.f32.mrf.mxu1 }
 0x216   : > { %v518_v56 = vpop.f32.mrf.mxu3 }
 0x218   : > { %v540_v58 = vpop.f32.mrf.mxu0 }
 0x219   : > { %v541_v59 = vadd.f32 %v540_v58, %v518_v56 }
 0x21b   : > { %v568_v60 = vadd.f32 %v563_v57, %v541_v59 }
 0x21d   : > { %v580_v0 = vadd.f32 %v573_v61, %v568_v60 }
 0x21e   : > { %v520_v62 = vpop.f32.mrf.mxu3 }
 0x21f   : > { %v582_v5 = vmax.f32 %v580_v0, 0.0 }
 0x220   : > { %v542_v63 = vpop.f32.mrf.mxu0 }
 0x221   : > { %v543_v1 = vadd.f32 %v542_v63, %v520_v62  ;;  %v587_v8 = vsel %vm584_vm3, %v582_v5, 0.0 }
 0x223   : > { %v569_v3 = vadd.f32 %v565_v2, %v543_v1 }
 0x225   : > { %v581_v6 = vadd.f32 %v578_v4, %v569_v3 }
 0x227   : > { %v583_v7 = vmax.f32 %v581_v6, 0.0 }
 0x229   : > { %v588_v9 = vsel %vm584_vm3, %v583_v7, 0.0  ;;  %v896_v10 = vpack.c.bf16 %v583_v7, %v582_v5 }
 0x22a   : > { %v976_v11 = vpack.i.bf16 %v588_v9, %v587_v8  ;;  %v756_v8 = vld [vmem:[%s1228_s7] sm:$0xf] }
 0x22c   : > { %977 = vrot.lane.b32.xlu0 %v976_v11, %s1015_s27  ;;  %967 = vrot.lane.b32.xlu1 %v976_v11, %s1018_s19  ;;  %s855_s27 = sshll.u32 %s1235_s12, 3 }
 0x22d   : > { %962 = vrot.lane.b32.xlu2 %v976_v11, %s1019_s20  ;;  %s369_s14 = scalar_lea.vmem %s1230_s9, %s855_s27 }
 0x234   : > { %747 = vperm.xlu0 %960, %v596_v12   ;;  %982 = vrot.lane.b32.xlu1 %v976_v11, %s1016_s28 }
 0x235   : > { %972 = vrot.lane.b32.xlu2 %v976_v11, %s1020_s23 }
 0x23c   : > { %761 = vperm.xlu1 %949, %v757_v13  }
 0x23d   : > { %987 = vrot.lane.b32.xlu2 %v976_v11, %s1021_s26 }
 0x287   : > { %v963_v14 = vpop.permute.xlu2 %962 }
 0x288   : > { %v965_v15 = vunpack.i.h.bf16 %v963_v14  ;;  %v964_v16 = vunpack.i.l.bf16 %v963_v14 }
 0x28a   : > { %v606_v17 = vpack.c.bf16 %v965_v15, %v964_v16 }
 0x28c   : > { %617 = vmatpush.bf16.msrb.mxu2 %v606_v17 }
 0x28f   : > { %v973_v19 = vpop.permute.xlu2 %972  ;;  %889 = vmatmul.msk.bf16.vlgmr.msrb.gmra.mxu2 %vm399_vm0, %v590_v18 }
 0x290   : > { %v975_v20 = vunpack.i.h.bf16 %v973_v19  ;;  %v974_v21 = vunpack.i.l.bf16 %v973_v19 }
 0x292   : > { %v643_v22 = vpack.c.bf16 %v975_v20, %v974_v21 }
 0x294   : > { %654 = vmatpush.bf16.msra.mxu0 %v643_v22 }
 0x297   : > { %v988_v24 = vpop.permute.xlu2 %987  ;;  %891 = vmatmul.msk.bf16.vlgmr.msra.gmra.mxu0 %vm399_vm0, %v591_v23 }
 0x298   : > { %897 = vmatpush.bf16.msk.msrb.mxu0 %vm895_vm4, %v896_v10  ;;  %v990_v25 = vunpack.i.h.bf16 %v988_v24  ;;  %v989_v26 = vunpack.i.l.bf16 %v988_v24 }
 0x29a   : > { %v665_v27 = vpack.c.bf16 %v990_v25, %v989_v26 }
 0x29c   : > { %676 = vmatpush.bf16.msra.mxu1 %v665_v27 }
 0x29e   : > { %v978_v29 = vpop.permute.xlu0 %977  ;;  %v968_v30 = vpop.permute.xlu1 %967 }
 0x29f   : > { %v980_v31 = vunpack.i.h.bf16 %v978_v29  ;;  %v979_v32 = vunpack.i.l.bf16 %v978_v29  ;;  %v970_v33 = vunpack.i.h.bf16 %v968_v30  ;;  %v969_v35 = vunpack.i.l.bf16 %v968_v30  ;;  %892 = vmatmul.msk.bf16.vlgmr.msra.gmra.mxu1 %vm399_vm0, %v592_v28 }
 0x2a1   : > { %v687_v36 = vpack.c.bf16 %v980_v31, %v979_v32  ;;  %v601_v37 = vpack.c.bf16 %v970_v33, %v969_v35 }
 0x2a3   : > { %633 = vmatpush.bf16.msrb.mxu3 %v601_v37  ;;  %698 = vmatpush.bf16.msra.mxu2 %v687_v36 }
 0x2a6   : > { %v983_v41 = vpop.permute.xlu1 %982  ;;  %890 = vmatmul.msk.bf16.vlgmr.msrb.gmra.mxu3 %vm399_vm0, %v589_v38  ;;  %893 = vmatmul.msk.bf16.vlgmr.msra.gmra.mxu2 %vm399_vm0, %v593_v39  ;;  %v748_v1 = vpop.permute.xlu0 %747 }
 0x2a7   : > { %v985_v42 = vunpack.i.h.bf16 %v983_v41  ;;  %v984_v43 = vunpack.i.l.bf16 %v983_v41  ;;  %898 = vmatmul.msk.bf16.vlgmr.msrb.gmra.mxu0 %vm399_vm0, %v595_v40 }
 0x2a9   : > { %v709_v44 = vpack.c.bf16 %v985_v42, %v984_v43 }
 0x2ab   : > { %720 = vmatpush.bf16.msra.mxu3 %v709_v44 }
 0x2ae   : > { %v762_v9 = vpop.permute.xlu1 %761 }
 0x2b6   : > { %894 = vmatmul.msk.bf16.vlgmr.msra.gmra.mxu3 %vm399_vm0, %v594_v45 }
 0x312   : > { %v619_v46 = vpop.f32.mrf.mxu2 }
 0x314   : > { %v656_v47 = vpop.f32.mrf.mxu0 }
 0x31a   : > { %v621_v48 = vpop.f32.mrf.mxu2 }
 0x31c   : > { %v658_v49 = vpop.f32.mrf.mxu0  ;;  %v678_v50 = vpop.f32.mrf.mxu1 }
 0x324   : > { %v740_v51 = vpop.f32.mrf.mxu0  ;;  %v680_v52 = vpop.f32.mrf.mxu1 }
 0x329   : > { %v635_v53 = vpop.f32.mrf.mxu3  ;;  %v700_v54 = vpop.f32.mrf.mxu2 }
 0x32a   : > { %v636_v55 = vadd.f32 %v635_v53, %v619_v46 }
 0x32c   : > { %v742_v56 = vpop.f32.mrf.mxu0  ;;  %v660_v57 = vadd.f32 %v656_v47, %v636_v55 }
 0x32e   : > { %v682_v60 = vadd.f32 %v678_v50, %v660_v57 }
 0x330   : > { %v704_v61 = vadd.f32 %v700_v54, %v682_v60 }
 0x331   : > { %v637_v58 = vpop.f32.mrf.mxu3  ;;  %v702_v59 = vpop.f32.mrf.mxu2 }
 0x339   : > { %v722_v62 = vpop.f32.mrf.mxu3 }
 0x33a   : > { %v726_v63 = vadd.f32 %v722_v62, %v704_v61 }
 0x33c   : > { %v744_v0 = vadd.f32 %v740_v51, %v726_v63 }
 0x33e   : > { %v750_v2 = vadd.f32 %v748_v1, %v744_v0 }
 0x340   : > { %v751_v3 = vmax.f32 %v750_v2, 0.0 }
 0x341   : > { %v724_v4 = vpop.f32.mrf.mxu3 }
 0x342   : > { %v755_v5 = vsel %vm752_vm5, %v751_v3, 0.0 }
 0x343   : > { %v758_v6 = vpack.c.bf16 %v755_v5, %v755_v5 }
 0x345   : > { %v770_v7 = vsel %vm768_vm6, %v758_v6, 0 }
 0x346   : > { %779 = vmatpush.bf16.msrb.mxu1 %v770_v7 }
 0x349   : > { %899 = vmatmul.msk.bf16.vlgmr.msrb.gmra.mxu1 %vm764_vm7, %v756_v8 }
 0x3c6   : > { %v781_v10 = vpop.f32.mrf.mxu1 }
 0x3c7   : > { %v782_v11 = vadd.f32 %v781_v10, %v762_v9 }
 0x3c9   : > { %v785_v12 = vmax.f32 %v782_v11, 0.0 }
 0x3cb   : > { %v786_v13 = vsel %vm752_vm5, %v785_v12, 0.0 }
 0x3cc   : > { %787 = vst [vmem:[%s369_s14] sm:$0xff] %v786_v13 }
 0x3ce   : > { %v783_v14 = vpop.f32.mrf.mxu1 }
 0x3cf PF: > { %p16_p9 = scmp.ge.s32.totalorder %s1089_s13, 5   ;;  %s1231_s30 = smov %s1009_s10 }
 0x3d0   : > { %s1232_s10 = smov %s1098_s16  ;;  %s1233_s11 = smov %s1089_s13 }
 0x3d1   :  { %18 = sbr.rel (!%p16_p9) target bundleno = 2 (0x2), region = 129 }

</bundles_post_ra>
